<compile_context>
chip_gen: v6e
topology: v6e:2x2x1
jax: 0.10.0
libtpu: 0.0.40
codegen_flags: <defaults>
</compile_context>

<pallas_src>
import functools

import jax
import jax.numpy as jnp
from jax import lax
from jax.experimental import pallas as pl
from jax.experimental.pallas import tpu as pltpu


# ----------------------------------------------------------------------------
# In-kernel helpers (f32 math)
# ----------------------------------------------------------------------------
def _erf(x):
    # Abramowitz & Stegun 7.1.26 rational approximation (|err| < 1.5e-7),
    # matching PyTorch's exact-erf nn.GELU() default. The divide is routed to
    # the EUP via approx reciprocal (tiny extra error, VALU slot freed).
    p = 0.3275911
    a1, a2, a3, a4, a5 = (0.254829592, -0.284496736, 1.421413741,
                          -1.453152027, 1.061405429)
    ax = jnp.abs(x)
    t = pl.reciprocal(1.0 + p * ax, approx=True)
    poly = ((((a5 * t + a4) * t + a3) * t + a2) * t + a1) * t
    y = 1.0 - poly * jnp.exp(-ax * ax)
    return jnp.where(x >= 0.0, y, -y)


def _gelu_exact(x):
    return 0.5 * x * (1.0 + _erf(x * 0.7071067811865476))


def _layernorm(y, gamma, beta, eps=1e-5):
    mu = jnp.mean(y, axis=-1, keepdims=True)
    var = jnp.mean((y - mu) ** 2, axis=-1, keepdims=True)
    return (y - mu) * lax.rsqrt(var + eps) * gamma + beta


# ----------------------------------------------------------------------------
# Fused AttentionBlock kernel (single grid step, whole batch resident in VMEM)
# ----------------------------------------------------------------------------
def _attention_block_kernel(x_ref,                     # (S, B, D)  f32
                            wqkv_ref, bqkv_ref,        # (D, 3D) bf16 / (1, 3D) f32
                            wo_ref, bo_ref,            # (D, D)  bf16 / (1, D)  f32
                            ln1g_ref, ln1b_ref,        # (1, D) f32
                            w1_ref, b1_ref,            # (D, D) bf16 / (1, D) f32
                            w2_ref, b2_ref,            # (D, D) bf16 / (1, D) f32
                            ln2g_ref, ln2b_ref,        # (1, D) f32
                            o_ref,                     # (S, B, D)  f32
                            *, n_head):
    S, B, D = x_ref.shape
    H = n_head
    hd = D // H
    scale = 1.0 / (float(hd) ** 0.5)

    # Hoist all weight/bias reads out of the loops (JAX does not CSE the
    # implied broadcasts if they are re-issued per iteration).
    wqkv = wqkv_ref[...]
    bqkv = bqkv_ref[...]
    wo = wo_ref[...]
    bo = bo_ref[...]
    ln1g, ln1b = ln1g_ref[...], ln1b_ref[...]
    w1, b1 = w1_ref[...], b1_ref[...]
    w2, b2 = w2_ref[...], b2_ref[...]
    ln2g, ln2b = ln2g_ref[...], ln2b_ref[...]

    for b in range(B):                         # static unroll, B is tiny here
        x = x_ref[:, b, :]                     # (S, D) f32, strided slab load
        xb = x.astype(jnp.bfloat16)

        # --- fused QKV projection: one matmul, N = 3D ---
        qkv = jnp.dot(xb, wqkv, preferred_element_type=jnp.float32) + bqkv
        q = qkv[:, :D] * scale                 # scale Q once (S*hd ops, f32)
        k = qkv[:, D:2 * D]
        v = qkv[:, 2 * D:]

        # --- per-head attention (scores / softmax / context) ---
        # TODO(synk): at production hd use lax.fori_loop + VMEM ctx scratch.
        ctx_heads = []
        for h in range(H):
            qh = q[:, h * hd:(h + 1) * hd].astype(jnp.bfloat16)
            kh = k[:, h * hd:(h + 1) * hd].astype(jnp.bfloat16)
            vh = v[:, h * hd:(h + 1) * hd].astype(jnp.bfloat16)

            s = lax.dot_general(qh, kh, (((1,), (1,)), ((), ())),
                                preferred_element_type=jnp.float32)  # (S, S)
            s = s - jnp.max(s, axis=-1, keepdims=True)
            p = jnp.exp(s)
            p = p * pl.reciprocal(jnp.sum(p, axis=-1, keepdims=True),
                                  approx=True)
            ctx_heads.append(jnp.dot(p.astype(jnp.bfloat16), vh,
                                     preferred_element_type=jnp.float32))

        # --- fused out-projection: concat heads once, one K = D matmul ---
        ctx = jnp.concatenate(ctx_heads, axis=-1)                     # (S, D)
        attn = jnp.dot(ctx.astype(jnp.bfloat16), wo,
                       preferred_element_type=jnp.float32) + bo

        # --- residual + LayerNorm1 ---
        h1 = _layernorm(x + attn, ln1g, ln1b)

        # --- FFN (Linear -> GELU -> Linear) + residual + LayerNorm2 ---
        hh = jnp.dot(h1.astype(jnp.bfloat16), w1,
                     preferred_element_type=jnp.float32) + b1
        hh = _gelu_exact(hh)
        f = jnp.dot(hh.astype(jnp.bfloat16), w2,
                    preferred_element_type=jnp.float32) + b2
        o_ref[:, b, :] = _layernorm(h1 + f, ln2g, ln2b)


# ----------------------------------------------------------------------------
# Wrapper: one-time parameter re-layout (fused QKV) + pallas_call
# ----------------------------------------------------------------------------
def attention_block_forward(x, params, n_head):
    """x: (S, B, D) float32. Returns (S, B, D) float32."""
    S, B, D = x.shape
    assert D % n_head == 0

    # Fuse the three projection matrices into one (D, 3D) bf16 weight (and one
    # (1, 3D) bias) so the kernel does a single QKV matmul. Stored layout is
    # (in_features, out_features), i.e. x @ W_t + b == PyTorch's x @ W^T + b.
    wqkv = jnp.concatenate(
        [params["wq_t"], params["wk_t"], params["wv_t"]], axis=1
    ).astype(jnp.bfloat16)                                        # (D, 3D)
    bqkv = jnp.concatenate(
        [params["b_q"], params["b_k"], params["b_v"]]).reshape(1, 3 * D)
    wo = params["w_out_t"].astype(jnp.bfloat16)                   # (D, D)
    bo = params["b_out"].reshape(1, D)
    w1 = params["w1_t"].astype(jnp.bfloat16)
    b1 = params["b1"].reshape(1, D)
    w2 = params["w2_t"].astype(jnp.bfloat16)
    b2 = params["b2"].reshape(1, D)
    ln1g = params["ln1_g"].reshape(1, D)
    ln1b = params["ln1_b"].reshape(1, D)
    ln2g = params["ln2_g"].reshape(1, D)
    ln2b = params["ln2_b"].reshape(1, D)

    # Single grid step over the full problem: no host-side (S,B,D)<->(B,S,D)
    # transposes, no per-step pipelining overhead at demo sizes, and all
    # weights / activations loaded into VMEM exactly once.
    x_spec = pl.BlockSpec((S, B, D), lambda i: (0, 0, 0))
    qkvw_spec = pl.BlockSpec((D, 3 * D), lambda i: (0, 0))
    qkvb_spec = pl.BlockSpec((1, 3 * D), lambda i: (0, 0))
    wmat_spec = pl.BlockSpec((D, D), lambda i: (0, 0))
    row_spec = pl.BlockSpec((1, D), lambda i: (0, 0))

    kernel = functools.partial(_attention_block_kernel, n_head=n_head)

    out = pl.pallas_call(
        kernel,
        out_shape=jax.ShapeDtypeStruct((S, B, D), jnp.float32),
        grid=(1,),
        in_specs=[
            x_spec,                     # x
            qkvw_spec, qkvb_spec,       # fused QKV weight / bias
            wmat_spec, row_spec,        # out-proj weight / bias
            row_spec, row_spec,         # ln1 gamma / beta
            wmat_spec, row_spec,        # ffn linear1 weight / bias
            wmat_spec, row_spec,        # ffn linear2 weight / bias
            row_spec, row_spec,         # ln2 gamma / beta
        ],
        out_specs=x_spec,
        compiler_params=pltpu.CompilerParams(
            dimension_semantics=("arbitrary",),
            # Explicit limit (v5e default scoped limit is only 16 MiB); small
            # enough to be safe on v7x's 64 MiB physical VMEM as well.
            vmem_limit_bytes=32 * 1024 * 1024,
        ),
    )(x, wqkv, bqkv, wo, bo, ln1g, ln1b, w1, b1, w2, b2, ln2g, ln2b)

    return out


def init_params(key, n_dim):
    D = n_dim
    ks = jax.random.split(key, 12)
    sd = 0.02
    # Weights stored pre-transposed (in_features, out_features) so the kernel
    # computes x @ W_t + b, matching PyTorch's x @ W^T + b.
    # NOTE: FFN is D -> D -> D exactly as the reference FeedForwardBlock
    # (nn.Linear(n_dim, n_dim) twice), not the conventional 4*D hidden width.
    return {
        "wq_t":    sd * jax.random.normal(ks[0], (D, D), jnp.float32),
        "wk_t":    sd * jax.random.normal(ks[1], (D, D), jnp.float32),
        "wv_t":    sd * jax.random.normal(ks[2], (D, D), jnp.float32),
        "b_q":     sd * jax.random.normal(ks[3], (D,), jnp.float32),
        "b_k":     sd * jax.random.normal(ks[4], (D,), jnp.float32),
        "b_v":     sd * jax.random.normal(ks[5], (D,), jnp.float32),
        "w_out_t": sd * jax.random.normal(ks[6], (D, D), jnp.float32),
        "b_out":   sd * jax.random.normal(ks[7], (D,), jnp.float32),
        "w1_t":    sd * jax.random.normal(ks[8], (D, D), jnp.float32),
        "b1":      sd * jax.random.normal(ks[9], (D,), jnp.float32),
        "w2_t":    sd * jax.random.normal(ks[10], (D, D), jnp.float32),
        "b2":      sd * jax.random.normal(ks[11], (D,), jnp.float32),
        "ln1_g":   jnp.ones((D,), jnp.float32),
        "ln1_b":   jnp.zeros((D,), jnp.float32),
        "ln2_g":   jnp.ones((D,), jnp.float32),
        "ln2_b":   jnp.zeros((D,), jnp.float32),
    }


if __name__ == "__main__":
    S, B, D, H = 8, 2, 32, 8   # seq=8, batch=2, n_dim=32, n_head=8 (head_dim=4)

    root = jax.random.PRNGKey(0)
    k_x, k_p = jax.random.split(root)
    x = jax.random.normal(k_x, (S, B, D), dtype=jnp.float32)
    params = init_params(k_p, D)

    fwd = jax.jit(functools.partial(attention_block_forward, n_head=H))
    y = jax.block_until_ready(fwd(x, params))

    assert y.shape == (S, B, D)
    assert bool(jnp.all(jnp.isfinite(y)))
    print("KERNEL_OK")
</pallas_src>

<mosaic_0001>
module attributes {stable_mosaic.version = 11 : i64} {
  func.func @_attention_block_kernel(%arg0: i32, %arg1: memref<8x2x32xf32, #tpu.memory_space<vmem>>, %arg2: memref<32x96xbf16, #tpu.memory_space<vmem>>, %arg3: memref<1x96xf32, #tpu.memory_space<vmem>>, %arg4: memref<32x32xbf16, #tpu.memory_space<vmem>>, %arg5: memref<1x32xf32, #tpu.memory_space<vmem>>, %arg6: memref<1x32xf32, #tpu.memory_space<vmem>>, %arg7: memref<1x32xf32, #tpu.memory_space<vmem>>, %arg8: memref<32x32xbf16, #tpu.memory_space<vmem>>, %arg9: memref<1x32xf32, #tpu.memory_space<vmem>>, %arg10: memref<32x32xbf16, #tpu.memory_space<vmem>>, %arg11: memref<1x32xf32, #tpu.memory_space<vmem>>, %arg12: memref<1x32xf32, #tpu.memory_space<vmem>>, %arg13: memref<1x32xf32, #tpu.memory_space<vmem>>, %arg14: memref<8x2x32xf32, #tpu.memory_space<vmem>>) attributes {dimension_semantics = [#tpu.dimension_semantics<arbitrary>], iteration_bounds = array<i64: 1>, scalar_prefetch = 0 : i64, scratch_operands = 0 : i64, tpu.core_type = #tpu.core_type<tc>, window_params = [{pipeline_mode = #tpu.pipeline_mode<synchronous>, transform_indices = @transform_0, window_bounds = array<i64: 8, 2, 32>}, {pipeline_mode = #tpu.pipeline_mode<synchronous>, transform_indices = @transform_1, window_bounds = array<i64: 32, 96>}, {pipeline_mode = #tpu.pipeline_mode<synchronous>, transform_indices = @transform_2, window_bounds = array<i64: 1, 96>}, {pipeline_mode = #tpu.pipeline_mode<synchronous>, transform_indices = @transform_3, window_bounds = array<i64: 32, 32>}, {pipeline_mode = #tpu.pipeline_mode<synchronous>, transform_indices = @transform_4, window_bounds = array<i64: 1, 32>}, {pipeline_mode = #tpu.pipeline_mode<synchronous>, transform_indices = @transform_5, window_bounds = array<i64: 1, 32>}, {pipeline_mode = #tpu.pipeline_mode<synchronous>, transform_indices = @transform_6, window_bounds = array<i64: 1, 32>}, {pipeline_mode = #tpu.pipeline_mode<synchronous>, transform_indices = @transform_7, window_bounds = array<i64: 32, 32>}, {pipeline_mode = #tpu.pipeline_mode<synchronous>, transform_indices = @transform_8, window_bounds = array<i64: 1, 32>}, {pipeline_mode = #tpu.pipeline_mode<synchronous>, transform_indices = @transform_9, window_bounds = array<i64: 32, 32>}, {pipeline_mode = #tpu.pipeline_mode<synchronous>, transform_indices = @transform_10, window_bounds = array<i64: 1, 32>}, {pipeline_mode = #tpu.pipeline_mode<synchronous>, transform_indices = @transform_11, window_bounds = array<i64: 1, 32>}, {pipeline_mode = #tpu.pipeline_mode<synchronous>, transform_indices = @transform_12, window_bounds = array<i64: 1, 32>}, {pipeline_mode = #tpu.pipeline_mode<synchronous>, transform_indices = @transform_13, window_bounds = array<i64: 8, 2, 32>}]} {
    %c0 = arith.constant 0 : index
    %c0_0 = arith.constant 0 : index
    %0 = vector.load %arg2[%c0, %c0_0] : memref<32x96xbf16, #tpu.memory_space<vmem>>, vector<32x96xbf16>
    %c0_1 = arith.constant 0 : index
    %c0_2 = arith.constant 0 : index
    %1 = vector.load %arg3[%c0_1, %c0_2] : memref<1x96xf32, #tpu.memory_space<vmem>>, vector<1x96xf32>
    %c0_3 = arith.constant 0 : index
    %c0_4 = arith.constant 0 : index
    %2 = vector.load %arg4[%c0_3, %c0_4] : memref<32x32xbf16, #tpu.memory_space<vmem>>, vector<32x32xbf16>
    %c0_5 = arith.constant 0 : index
    %c0_6 = arith.constant 0 : index
    %3 = vector.load %arg5[%c0_5, %c0_6] : memref<1x32xf32, #tpu.memory_space<vmem>>, vector<1x32xf32>
    %c0_7 = arith.constant 0 : index
    %c0_8 = arith.constant 0 : index
    %4 = vector.load %arg6[%c0_7, %c0_8] : memref<1x32xf32, #tpu.memory_space<vmem>>, vector<1x32xf32>
    %c0_9 = arith.constant 0 : index
    %c0_10 = arith.constant 0 : index
    %5 = vector.load %arg7[%c0_9, %c0_10] : memref<1x32xf32, #tpu.memory_space<vmem>>, vector<1x32xf32>
    %c0_11 = arith.constant 0 : index
    %c0_12 = arith.constant 0 : index
    %6 = vector.load %arg8[%c0_11, %c0_12] : memref<32x32xbf16, #tpu.memory_space<vmem>>, vector<32x32xbf16>
    %c0_13 = arith.constant 0 : index
    %c0_14 = arith.constant 0 : index
    %7 = vector.load %arg9[%c0_13, %c0_14] : memref<1x32xf32, #tpu.memory_space<vmem>>, vector<1x32xf32>
    %c0_15 = arith.constant 0 : index
    %c0_16 = arith.constant 0 : index
    %8 = vector.load %arg10[%c0_15, %c0_16] : memref<32x32xbf16, #tpu.memory_space<vmem>>, vector<32x32xbf16>
    %c0_17 = arith.constant 0 : index
    %c0_18 = arith.constant 0 : index
    %9 = vector.load %arg11[%c0_17, %c0_18] : memref<1x32xf32, #tpu.memory_space<vmem>>, vector<1x32xf32>
    %c0_19 = arith.constant 0 : index
    %c0_20 = arith.constant 0 : index
    %10 = vector.load %arg12[%c0_19, %c0_20] : memref<1x32xf32, #tpu.memory_space<vmem>>, vector<1x32xf32>
    %c0_21 = arith.constant 0 : index
    %c0_22 = arith.constant 0 : index
    %11 = vector.load %arg13[%c0_21, %c0_22] : memref<1x32xf32, #tpu.memory_space<vmem>>, vector<1x32xf32>
    %c0_23 = arith.constant 0 : index
    %c0_24 = arith.constant 0 : index
    %c0_25 = arith.constant 0 : index
    %12 = vector.load %arg1[%c0_23, %c0_24, %c0_25] : memref<8x2x32xf32, #tpu.memory_space<vmem>>, vector<8x1x32xf32>
    %13 = vector.shape_cast %12 : vector<8x1x32xf32> to vector<8x32xf32>
    %14 = arith.truncf %13 : vector<8x32xf32> to vector<8x32xbf16>
    %cst = arith.constant dense<0.000000e+00> : vector<8x96xf32>
    %15 = tpu.matmul %14, %0, %cst {dimension_numbers = #tpu.dot_dimension_numbers<[1], [0], [0], [1], [0, 0, 1, 1], [], []>} : vector<8x32xbf16>, vector<32x96xbf16>, vector<8x96xf32> -> vector<8x96xf32>
    %16 = vector.broadcast %1 : vector<1x96xf32> to vector<8x96xf32>
    %17 = arith.addf %15, %16 : vector<8x96xf32>
    %18 = vector.extract_strided_slice %17 {offsets = [0, 0], sizes = [8, 32], strides = [1, 1]} : vector<8x96xf32> to vector<8x32xf32>
    %cst_26 = arith.constant 5.000000e-01 : f32
    %19 = vector.broadcast %cst_26 : f32 to vector<8x32xf32>
    %20 = arith.mulf %18, %19 : vector<8x32xf32>
    %21 = vector.extract_strided_slice %17 {offsets = [0, 32], sizes = [8, 32], strides = [1, 1]} : vector<8x96xf32> to vector<8x32xf32>
    %22 = vector.extract_strided_slice %17 {offsets = [0, 64], sizes = [8, 32], strides = [1, 1]} : vector<8x96xf32> to vector<8x32xf32>
    %23 = vector.extract_strided_slice %20 {offsets = [0, 0], sizes = [8, 4], strides = [1, 1]} : vector<8x32xf32> to vector<8x4xf32>
    %24 = arith.truncf %23 : vector<8x4xf32> to vector<8x4xbf16>
    %25 = vector.extract_strided_slice %21 {offsets = [0, 0], sizes = [8, 4], strides = [1, 1]} : vector<8x32xf32> to vector<8x4xf32>
    %26 = arith.truncf %25 : vector<8x4xf32> to vector<8x4xbf16>
    %27 = vector.extract_strided_slice %22 {offsets = [0, 0], sizes = [8, 4], strides = [1, 1]} : vector<8x32xf32> to vector<8x4xf32>
    %28 = arith.truncf %27 : vector<8x4xf32> to vector<8x4xbf16>
    %cst_27 = arith.constant dense<0.000000e+00> : vector<8x8xf32>
    %29 = tpu.matmul %24, %26, %cst_27 {dimension_numbers = #tpu.dot_dimension_numbers<[1], [1], [0], [0], [0, 0, 1, 0], [], []>} : vector<8x4xbf16>, vector<8x4xbf16>, vector<8x8xf32> -> vector<8x8xf32>
    %cst_28 = arith.constant dense<0xFF800000> : vector<8xf32>
    %30 = vector.multi_reduction <maximumf>, %29, %cst_28 [1] : vector<8x8xf32> to vector<8xf32>
    %31 = vector.shape_cast %30 : vector<8xf32> to vector<8x1xf32>
    %32 = vector.broadcast %31 : vector<8x1xf32> to vector<8x8xf32>
    %33 = arith.subf %29, %32 : vector<8x8xf32>
    %34 = math.exp %33 : vector<8x8xf32>
    %cst_29 = arith.constant dense<0.000000e+00> : vector<8xf32>
    %35 = vector.multi_reduction <add>, %34, %cst_29 [1] : vector<8x8xf32> to vector<8xf32>
    %36 = vector.shape_cast %35 : vector<8xf32> to vector<8x1xf32>
    %37 = tpu.reciprocal %36 {approx = true} : vector<8x1xf32> -> vector<8x1xf32>
    %38 = vector.broadcast %37 : vector<8x1xf32> to vector<8x8xf32>
    %39 = arith.mulf %34, %38 : vector<8x8xf32>
    %40 = arith.truncf %39 : vector<8x8xf32> to vector<8x8xbf16>
    %cst_30 = arith.constant dense<0.000000e+00> : vector<8x4xf32>
    %41 = tpu.matmul %40, %28, %cst_30 {dimension_numbers = #tpu.dot_dimension_numbers<[1], [0], [0], [1], [0, 0, 1, 1], [], []>} : vector<8x8xbf16>, vector<8x4xbf16>, vector<8x4xf32> -> vector<8x4xf32>
    %42 = vector.extract_strided_slice %20 {offsets = [0, 4], sizes = [8, 4], strides = [1, 1]} : vector<8x32xf32> to vector<8x4xf32>
    %43 = arith.truncf %42 : vector<8x4xf32> to vector<8x4xbf16>
    %44 = vector.extract_strided_slice %21 {offsets = [0, 4], sizes = [8, 4], strides = [1, 1]} : vector<8x32xf32> to vector<8x4xf32>
    %45 = arith.truncf %44 : vector<8x4xf32> to vector<8x4xbf16>
    %46 = vector.extract_strided_slice %22 {offsets = [0, 4], sizes = [8, 4], strides = [1, 1]} : vector<8x32xf32> to vector<8x4xf32>
    %47 = arith.truncf %46 : vector<8x4xf32> to vector<8x4xbf16>
    %cst_31 = arith.constant dense<0.000000e+00> : vector<8x8xf32>
    %48 = tpu.matmul %43, %45, %cst_31 {dimension_numbers = #tpu.dot_dimension_numbers<[1], [1], [0], [0], [0, 0, 1, 0], [], []>} : vector<8x4xbf16>, vector<8x4xbf16>, vector<8x8xf32> -> vector<8x8xf32>
    %cst_32 = arith.constant dense<0xFF800000> : vector<8xf32>
    %49 = vector.multi_reduction <maximumf>, %48, %cst_32 [1] : vector<8x8xf32> to vector<8xf32>
    %50 = vector.shape_cast %49 : vector<8xf32> to vector<8x1xf32>
    %51 = vector.broadcast %50 : vector<8x1xf32> to vector<8x8xf32>
    %52 = arith.subf %48, %51 : vector<8x8xf32>
    %53 = math.exp %52 : vector<8x8xf32>
    %cst_33 = arith.constant dense<0.000000e+00> : vector<8xf32>
    %54 = vector.multi_reduction <add>, %53, %cst_33 [1] : vector<8x8xf32> to vector<8xf32>
    %55 = vector.shape_cast %54 : vector<8xf32> to vector<8x1xf32>
    %56 = tpu.reciprocal %55 {approx = true} : vector<8x1xf32> -> vector<8x1xf32>
    %57 = vector.broadcast %56 : vector<8x1xf32> to vector<8x8xf32>
    %58 = arith.mulf %53, %57 : vector<8x8xf32>
    %59 = arith.truncf %58 : vector<8x8xf32> to vector<8x8xbf16>
    %cst_34 = arith.constant dense<0.000000e+00> : vector<8x4xf32>
    %60 = tpu.matmul %59, %47, %cst_34 {dimension_numbers = #tpu.dot_dimension_numbers<[1], [0], [0], [1], [0, 0, 1, 1], [], []>} : vector<8x8xbf16>, vector<8x4xbf16>, vector<8x4xf32> -> vector<8x4xf32>
    %61 = vector.extract_strided_slice %20 {offsets = [0, 8], sizes = [8, 4], strides = [1, 1]} : vector<8x32xf32> to vector<8x4xf32>
    %62 = arith.truncf %61 : vector<8x4xf32> to vector<8x4xbf16>
    %63 = vector.extract_strided_slice %21 {offsets = [0, 8], sizes = [8, 4], strides = [1, 1]} : vector<8x32xf32> to vector<8x4xf32>
    %64 = arith.truncf %63 : vector<8x4xf32> to vector<8x4xbf16>
    %65 = vector.extract_strided_slice %22 {offsets = [0, 8], sizes = [8, 4], strides = [1, 1]} : vector<8x32xf32> to vector<8x4xf32>
    %66 = arith.truncf %65 : vector<8x4xf32> to vector<8x4xbf16>
    %cst_35 = arith.constant dense<0.000000e+00> : vector<8x8xf32>
    %67 = tpu.matmul %62, %64, %cst_35 {dimension_numbers = #tpu.dot_dimension_numbers<[1], [1], [0], [0], [0, 0, 1, 0], [], []>} : vector<8x4xbf16>, vector<8x4xbf16>, vector<8x8xf32> -> vector<8x8xf32>
    %cst_36 = arith.constant dense<0xFF800000> : vector<8xf32>
    %68 = vector.multi_reduction <maximumf>, %67, %cst_36 [1] : vector<8x8xf32> to vector<8xf32>
    %69 = vector.shape_cast %68 : vector<8xf32> to vector<8x1xf32>
    %70 = vector.broadcast %69 : vector<8x1xf32> to vector<8x8xf32>
    %71 = arith.subf %67, %70 : vector<8x8xf32>
    %72 = math.exp %71 : vector<8x8xf32>
    %cst_37 = arith.constant dense<0.000000e+00> : vector<8xf32>
    %73 = vector.multi_reduction <add>, %72, %cst_37 [1] : vector<8x8xf32> to vector<8xf32>
    %74 = vector.shape_cast %73 : vector<8xf32> to vector<8x1xf32>
    %75 = tpu.reciprocal %74 {approx = true} : vector<8x1xf32> -> vector<8x1xf32>
    %76 = vector.broadcast %75 : vector<8x1xf32> to vector<8x8xf32>
    %77 = arith.mulf %72, %76 : vector<8x8xf32>
    %78 = arith.truncf %77 : vector<8x8xf32> to vector<8x8xbf16>
    %cst_38 = arith.constant dense<0.000000e+00> : vector<8x4xf32>
    %79 = tpu.matmul %78, %66, %cst_38 {dimension_numbers = #tpu.dot_dimension_numbers<[1], [0], [0], [1], [0, 0, 1, 1], [], []>} : vector<8x8xbf16>, vector<8x4xbf16>, vector<8x4xf32> -> vector<8x4xf32>
    %80 = vector.extract_strided_slice %20 {offsets = [0, 12], sizes = [8, 4], strides = [1, 1]} : vector<8x32xf32> to vector<8x4xf32>
    %81 = arith.truncf %80 : vector<8x4xf32> to vector<8x4xbf16>
    %82 = vector.extract_strided_slice %21 {offsets = [0, 12], sizes = [8, 4], strides = [1, 1]} : vector<8x32xf32> to vector<8x4xf32>
    %83 = arith.truncf %82 : vector<8x4xf32> to vector<8x4xbf16>
    %84 = vector.extract_strided_slice %22 {offsets = [0, 12], sizes = [8, 4], strides = [1, 1]} : vector<8x32xf32> to vector<8x4xf32>
    %85 = arith.truncf %84 : vector<8x4xf32> to vector<8x4xbf16>
    %cst_39 = arith.constant dense<0.000000e+00> : vector<8x8xf32>
    %86 = tpu.matmul %81, %83, %cst_39 {dimension_numbers = #tpu.dot_dimension_numbers<[1], [1], [0], [0], [0, 0, 1, 0], [], []>} : vector<8x4xbf16>, vector<8x4xbf16>, vector<8x8xf32> -> vector<8x8xf32>
    %cst_40 = arith.constant dense<0xFF800000> : vector<8xf32>
    %87 = vector.multi_reduction <maximumf>, %86, %cst_40 [1] : vector<8x8xf32> to vector<8xf32>
    %88 = vector.shape_cast %87 : vector<8xf32> to vector<8x1xf32>
    %89 = vector.broadcast %88 : vector<8x1xf32> to vector<8x8xf32>
    %90 = arith.subf %86, %89 : vector<8x8xf32>
    %91 = math.exp %90 : vector<8x8xf32>
    %cst_41 = arith.constant dense<0.000000e+00> : vector<8xf32>
    %92 = vector.multi_reduction <add>, %91, %cst_41 [1] : vector<8x8xf32> to vector<8xf32>
    %93 = vector.shape_cast %92 : vector<8xf32> to vector<8x1xf32>
    %94 = tpu.reciprocal %93 {approx = true} : vector<8x1xf32> -> vector<8x1xf32>
    %95 = vector.broadcast %94 : vector<8x1xf32> to vector<8x8xf32>
    %96 = arith.mulf %91, %95 : vector<8x8xf32>
    %97 = arith.truncf %96 : vector<8x8xf32> to vector<8x8xbf16>
    %cst_42 = arith.constant dense<0.000000e+00> : vector<8x4xf32>
    %98 = tpu.matmul %97, %85, %cst_42 {dimension_numbers = #tpu.dot_dimension_numbers<[1], [0], [0], [1], [0, 0, 1, 1], [], []>} : vector<8x8xbf16>, vector<8x4xbf16>, vector<8x4xf32> -> vector<8x4xf32>
    %99 = vector.extract_strided_slice %20 {offsets = [0, 16], sizes = [8, 4], strides = [1, 1]} : vector<8x32xf32> to vector<8x4xf32>
    %100 = arith.truncf %99 : vector<8x4xf32> to vector<8x4xbf16>
    %101 = vector.extract_strided_slice %21 {offsets = [0, 16], sizes = [8, 4], strides = [1, 1]} : vector<8x32xf32> to vector<8x4xf32>
    %102 = arith.truncf %101 : vector<8x4xf32> to vector<8x4xbf16>
    %103 = vector.extract_strided_slice %22 {offsets = [0, 16], sizes = [8, 4], strides = [1, 1]} : vector<8x32xf32> to vector<8x4xf32>
    %104 = arith.truncf %103 : vector<8x4xf32> to vector<8x4xbf16>
    %cst_43 = arith.constant dense<0.000000e+00> : vector<8x8xf32>
    %105 = tpu.matmul %100, %102, %cst_43 {dimension_numbers = #tpu.dot_dimension_numbers<[1], [1], [0], [0], [0, 0, 1, 0], [], []>} : vector<8x4xbf16>, vector<8x4xbf16>, vector<8x8xf32> -> vector<8x8xf32>
    %cst_44 = arith.constant dense<0xFF800000> : vector<8xf32>
    %106 = vector.multi_reduction <maximumf>, %105, %cst_44 [1] : vector<8x8xf32> to vector<8xf32>
    %107 = vector.shape_cast %106 : vector<8xf32> to vector<8x1xf32>
    %108 = vector.broadcast %107 : vector<8x1xf32> to vector<8x8xf32>
    %109 = arith.subf %105, %108 : vector<8x8xf32>
    %110 = math.exp %109 : vector<8x8xf32>
    %cst_45 = arith.constant dense<0.000000e+00> : vector<8xf32>
    %111 = vector.multi_reduction <add>, %110, %cst_45 [1] : vector<8x8xf32> to vector<8xf32>
    %112 = vector.shape_cast %111 : vector<8xf32> to vector<8x1xf32>
    %113 = tpu.reciprocal %112 {approx = true} : vector<8x1xf32> -> vector<8x1xf32>
    %114 = vector.broadcast %113 : vector<8x1xf32> to vector<8x8xf32>
    %115 = arith.mulf %110, %114 : vector<8x8xf32>
    %116 = arith.truncf %115 : vector<8x8xf32> to vector<8x8xbf16>
    %cst_46 = arith.constant dense<0.000000e+00> : vector<8x4xf32>
    %117 = tpu.matmul %116, %104, %cst_46 {dimension_numbers = #tpu.dot_dimension_numbers<[1], [0], [0], [1], [0, 0, 1, 1], [], []>} : vector<8x8xbf16>, vector<8x4xbf16>, vector<8x4xf32> -> vector<8x4xf32>
    %118 = vector.extract_strided_slice %20 {offsets = [0, 20], sizes = [8, 4], strides = [1, 1]} : vector<8x32xf32> to vector<8x4xf32>
    %119 = arith.truncf %118 : vector<8x4xf32> to vector<8x4xbf16>
    %120 = vector.extract_strided_slice %21 {offsets = [0, 20], sizes = [8, 4], strides = [1, 1]} : vector<8x32xf32> to vector<8x4xf32>
    %121 = arith.truncf %120 : vector<8x4xf32> to vector<8x4xbf16>
    %122 = vector.extract_strided_slice %22 {offsets = [0, 20], sizes = [8, 4], strides = [1, 1]} : vector<8x32xf32> to vector<8x4xf32>
    %123 = arith.truncf %122 : vector<8x4xf32> to vector<8x4xbf16>
    %cst_47 = arith.constant dense<0.000000e+00> : vector<8x8xf32>
    %124 = tpu.matmul %119, %121, %cst_47 {dimension_numbers = #tpu.dot_dimension_numbers<[1], [1], [0], [0], [0, 0, 1, 0], [], []>} : vector<8x4xbf16>, vector<8x4xbf16>, vector<8x8xf32> -> vector<8x8xf32>
    %cst_48 = arith.constant dense<0xFF800000> : vector<8xf32>
    %125 = vector.multi_reduction <maximumf>, %124, %cst_48 [1] : vector<8x8xf32> to vector<8xf32>
    %126 = vector.shape_cast %125 : vector<8xf32> to vector<8x1xf32>
    %127 = vector.broadcast %126 : vector<8x1xf32> to vector<8x8xf32>
    %128 = arith.subf %124, %127 : vector<8x8xf32>
    %129 = math.exp %128 : vector<8x8xf32>
    %cst_49 = arith.constant dense<0.000000e+00> : vector<8xf32>
    %130 = vector.multi_reduction <add>, %129, %cst_49 [1] : vector<8x8xf32> to vector<8xf32>
    %131 = vector.shape_cast %130 : vector<8xf32> to vector<8x1xf32>
    %132 = tpu.reciprocal %131 {approx = true} : vector<8x1xf32> -> vector<8x1xf32>
    %133 = vector.broadcast %132 : vector<8x1xf32> to vector<8x8xf32>
    %134 = arith.mulf %129, %133 : vector<8x8xf32>
    %135 = arith.truncf %134 : vector<8x8xf32> to vector<8x8xbf16>
    %cst_50 = arith.constant dense<0.000000e+00> : vector<8x4xf32>
    %136 = tpu.matmul %135, %123, %cst_50 {dimension_numbers = #tpu.dot_dimension_numbers<[1], [0], [0], [1], [0, 0, 1, 1], [], []>} : vector<8x8xbf16>, vector<8x4xbf16>, vector<8x4xf32> -> vector<8x4xf32>
    %137 = vector.extract_strided_slice %20 {offsets = [0, 24], sizes = [8, 4], strides = [1, 1]} : vector<8x32xf32> to vector<8x4xf32>
    %138 = arith.truncf %137 : vector<8x4xf32> to vector<8x4xbf16>
    %139 = vector.extract_strided_slice %21 {offsets = [0, 24], sizes = [8, 4], strides = [1, 1]} : vector<8x32xf32> to vector<8x4xf32>
    %140 = arith.truncf %139 : vector<8x4xf32> to vector<8x4xbf16>
    %141 = vector.extract_strided_slice %22 {offsets = [0, 24], sizes = [8, 4], strides = [1, 1]} : vector<8x32xf32> to vector<8x4xf32>
    %142 = arith.truncf %141 : vector<8x4xf32> to vector<8x4xbf16>
    %cst_51 = arith.constant dense<0.000000e+00> : vector<8x8xf32>
    %143 = tpu.matmul %138, %140, %cst_51 {dimension_numbers = #tpu.dot_dimension_numbers<[1], [1], [0], [0], [0, 0, 1, 0], [], []>} : vector<8x4xbf16>, vector<8x4xbf16>, vector<8x8xf32> -> vector<8x8xf32>
    %cst_52 = arith.constant dense<0xFF800000> : vector<8xf32>
    %144 = vector.multi_reduction <maximumf>, %143, %cst_52 [1] : vector<8x8xf32> to vector<8xf32>
    %145 = vector.shape_cast %144 : vector<8xf32> to vector<8x1xf32>
    %146 = vector.broadcast %145 : vector<8x1xf32> to vector<8x8xf32>
    %147 = arith.subf %143, %146 : vector<8x8xf32>
    %148 = math.exp %147 : vector<8x8xf32>
    %cst_53 = arith.constant dense<0.000000e+00> : vector<8xf32>
    %149 = vector.multi_reduction <add>, %148, %cst_53 [1] : vector<8x8xf32> to vector<8xf32>
    %150 = vector.shape_cast %149 : vector<8xf32> to vector<8x1xf32>
    %151 = tpu.reciprocal %150 {approx = true} : vector<8x1xf32> -> vector<8x1xf32>
    %152 = vector.broadcast %151 : vector<8x1xf32> to vector<8x8xf32>
    %153 = arith.mulf %148, %152 : vector<8x8xf32>
    %154 = arith.truncf %153 : vector<8x8xf32> to vector<8x8xbf16>
    %cst_54 = arith.constant dense<0.000000e+00> : vector<8x4xf32>
    %155 = tpu.matmul %154, %142, %cst_54 {dimension_numbers = #tpu.dot_dimension_numbers<[1], [0], [0], [1], [0, 0, 1, 1], [], []>} : vector<8x8xbf16>, vector<8x4xbf16>, vector<8x4xf32> -> vector<8x4xf32>
    %156 = vector.extract_strided_slice %20 {offsets = [0, 28], sizes = [8, 4], strides = [1, 1]} : vector<8x32xf32> to vector<8x4xf32>
    %157 = arith.truncf %156 : vector<8x4xf32> to vector<8x4xbf16>
    %158 = vector.extract_strided_slice %21 {offsets = [0, 28], sizes = [8, 4], strides = [1, 1]} : vector<8x32xf32> to vector<8x4xf32>
    %159 = arith.truncf %158 : vector<8x4xf32> to vector<8x4xbf16>
    %160 = vector.extract_strided_slice %22 {offsets = [0, 28], sizes = [8, 4], strides = [1, 1]} : vector<8x32xf32> to vector<8x4xf32>
    %161 = arith.truncf %160 : vector<8x4xf32> to vector<8x4xbf16>
    %cst_55 = arith.constant dense<0.000000e+00> : vector<8x8xf32>
    %162 = tpu.matmul %157, %159, %cst_55 {dimension_numbers = #tpu.dot_dimension_numbers<[1], [1], [0], [0], [0, 0, 1, 0], [], []>} : vector<8x4xbf16>, vector<8x4xbf16>, vector<8x8xf32> -> vector<8x8xf32>
    %cst_56 = arith.constant dense<0xFF800000> : vector<8xf32>
    %163 = vector.multi_reduction <maximumf>, %162, %cst_56 [1] : vector<8x8xf32> to vector<8xf32>
    %164 = vector.shape_cast %163 : vector<8xf32> to vector<8x1xf32>
    %165 = vector.broadcast %164 : vector<8x1xf32> to vector<8x8xf32>
    %166 = arith.subf %162, %165 : vector<8x8xf32>
    %167 = math.exp %166 : vector<8x8xf32>
    %cst_57 = arith.constant dense<0.000000e+00> : vector<8xf32>
    %168 = vector.multi_reduction <add>, %167, %cst_57 [1] : vector<8x8xf32> to vector<8xf32>
    %169 = vector.shape_cast %168 : vector<8xf32> to vector<8x1xf32>
    %170 = tpu.reciprocal %169 {approx = true} : vector<8x1xf32> -> vector<8x1xf32>
    %171 = vector.broadcast %170 : vector<8x1xf32> to vector<8x8xf32>
    %172 = arith.mulf %167, %171 : vector<8x8xf32>
    %173 = arith.truncf %172 : vector<8x8xf32> to vector<8x8xbf16>
    %cst_58 = arith.constant dense<0.000000e+00> : vector<8x4xf32>
    %174 = tpu.matmul %173, %161, %cst_58 {dimension_numbers = #tpu.dot_dimension_numbers<[1], [0], [0], [1], [0, 0, 1, 1], [], []>} : vector<8x8xbf16>, vector<8x4xbf16>, vector<8x4xf32> -> vector<8x4xf32>
    %175 = tpu.concatenate %41, %60, %79, %98, %117, %136, %155, %174 in 1 : vector<8x4xf32>, vector<8x4xf32>, vector<8x4xf32>, vector<8x4xf32>, vector<8x4xf32>, vector<8x4xf32>, vector<8x4xf32>, vector<8x4xf32> -> vector<8x32xf32>
    %176 = arith.truncf %175 : vector<8x32xf32> to vector<8x32xbf16>
    %cst_59 = arith.constant dense<0.000000e+00> : vector<8x32xf32>
    %177 = tpu.matmul %176, %2, %cst_59 {dimension_numbers = #tpu.dot_dimension_numbers<[1], [0], [0], [1], [0, 0, 1, 1], [], []>} : vector<8x32xbf16>, vector<32x32xbf16>, vector<8x32xf32> -> vector<8x32xf32>
    %178 = vector.broadcast %3 : vector<1x32xf32> to vector<8x32xf32>
    %179 = arith.addf %177, %178 : vector<8x32xf32>
    %180 = arith.addf %13, %179 : vector<8x32xf32>
    %cst_60 = arith.constant dense<0.000000e+00> : vector<8xf32>
    %181 = vector.multi_reduction <add>, %180, %cst_60 [1] : vector<8x32xf32> to vector<8xf32>
    %182 = vector.shape_cast %181 : vector<8xf32> to vector<8x1xf32>
    %cst_61 = arith.constant 3.200000e+01 : f32
    %183 = vector.broadcast %cst_61 : f32 to vector<8x1xf32>
    %184 = arith.divf %182, %183 : vector<8x1xf32>
    %185 = vector.broadcast %184 : vector<8x1xf32> to vector<8x32xf32>
    %186 = arith.subf %180, %185 : vector<8x32xf32>
    %187 = arith.mulf %186, %186 : vector<8x32xf32>
    %cst_62 = arith.constant dense<0.000000e+00> : vector<8xf32>
    %188 = vector.multi_reduction <add>, %187, %cst_62 [1] : vector<8x32xf32> to vector<8xf32>
    %189 = vector.shape_cast %188 : vector<8xf32> to vector<8x1xf32>
    %cst_63 = arith.constant 3.200000e+01 : f32
    %190 = vector.broadcast %cst_63 : f32 to vector<8x1xf32>
    %191 = arith.divf %189, %190 : vector<8x1xf32>
    %192 = vector.broadcast %184 : vector<8x1xf32> to vector<8x32xf32>
    %193 = arith.subf %180, %192 : vector<8x32xf32>
    %cst_64 = arith.constant 9.99999974E-6 : f32
    %194 = vector.broadcast %cst_64 : f32 to vector<8x1xf32>
    %195 = arith.addf %191, %194 : vector<8x1xf32>
    %196 = math.rsqrt %195 : vector<8x1xf32>
    %197 = vector.broadcast %196 : vector<8x1xf32> to vector<8x32xf32>
    %198 = arith.mulf %193, %197 : vector<8x32xf32>
    %199 = vector.broadcast %4 : vector<1x32xf32> to vector<8x32xf32>
    %200 = arith.mulf %198, %199 : vector<8x32xf32>
    %201 = vector.broadcast %5 : vector<1x32xf32> to vector<8x32xf32>
    %202 = arith.addf %200, %201 : vector<8x32xf32>
    %203 = arith.truncf %202 : vector<8x32xf32> to vector<8x32xbf16>
    %cst_65 = arith.constant dense<0.000000e+00> : vector<8x32xf32>
    %204 = tpu.matmul %203, %6, %cst_65 {dimension_numbers = #tpu.dot_dimension_numbers<[1], [0], [0], [1], [0, 0, 1, 1], [], []>} : vector<8x32xbf16>, vector<32x32xbf16>, vector<8x32xf32> -> vector<8x32xf32>
    %205 = vector.broadcast %7 : vector<1x32xf32> to vector<8x32xf32>
    %206 = arith.addf %204, %205 : vector<8x32xf32>
    %cst_66 = arith.constant 5.000000e-01 : f32
    %207 = vector.broadcast %cst_66 : f32 to vector<8x32xf32>
    %208 = arith.mulf %207, %206 : vector<8x32xf32>
    %cst_67 = arith.constant 0.707106769 : f32
    %209 = vector.broadcast %cst_67 : f32 to vector<8x32xf32>
    %210 = arith.mulf %206, %209 : vector<8x32xf32>
    %211 = math.absf %210 : vector<8x32xf32>
    %cst_68 = arith.constant 0.327591091 : f32
    %212 = vector.broadcast %cst_68 : f32 to vector<8x32xf32>
    %213 = arith.mulf %212, %211 : vector<8x32xf32>
    %cst_69 = arith.constant 1.000000e+00 : f32
    %214 = vector.broadcast %cst_69 : f32 to vector<8x32xf32>
    %215 = arith.addf %214, %213 : vector<8x32xf32>
    %216 = tpu.reciprocal %215 {approx = true} : vector<8x32xf32> -> vector<8x32xf32>
    %cst_70 = arith.constant 1.06140542 : f32
    %217 = vector.broadcast %cst_70 : f32 to vector<8x32xf32>
    %218 = arith.mulf %217, %216 : vector<8x32xf32>
    %cst_71 = arith.constant -1.45315206 : f32
    %219 = vector.broadcast %cst_71 : f32 to vector<8x32xf32>
    %220 = arith.addf %218, %219 : vector<8x32xf32>
    %221 = arith.mulf %220, %216 : vector<8x32xf32>
    %cst_72 = arith.constant 1.42141378 : f32
    %222 = vector.broadcast %cst_72 : f32 to vector<8x32xf32>
    %223 = arith.addf %221, %222 : vector<8x32xf32>
    %224 = arith.mulf %223, %216 : vector<8x32xf32>
    %cst_73 = arith.constant -0.284496725 : f32
    %225 = vector.broadcast %cst_73 : f32 to vector<8x32xf32>
    %226 = arith.addf %224, %225 : vector<8x32xf32>
    %227 = arith.mulf %226, %216 : vector<8x32xf32>
    %cst_74 = arith.constant 0.254829586 : f32
    %228 = vector.broadcast %cst_74 : f32 to vector<8x32xf32>
    %229 = arith.addf %227, %228 : vector<8x32xf32>
    %230 = arith.mulf %229, %216 : vector<8x32xf32>
    %cst_75 = arith.constant 0.000000e+00 : f32
    %231 = vector.broadcast %cst_75 : f32 to vector<8x32xf32>
    %232 = arith.subf %231, %211 : vector<8x32xf32>
    %233 = arith.mulf %232, %211 : vector<8x32xf32>
    %234 = math.exp %233 : vector<8x32xf32>
    %235 = arith.mulf %230, %234 : vector<8x32xf32>
    %cst_76 = arith.constant 1.000000e+00 : f32
    %236 = vector.broadcast %cst_76 : f32 to vector<8x32xf32>
    %237 = arith.subf %236, %235 : vector<8x32xf32>
    %cst_77 = arith.constant 0.000000e+00 : f32
    %238 = vector.broadcast %cst_77 : f32 to vector<8x32xf32>
    %239 = arith.cmpf oge, %210, %238 : vector<8x32xf32>
    %cst_78 = arith.constant 0.000000e+00 : f32
    %240 = vector.broadcast %cst_78 : f32 to vector<8x32xf32>
    %241 = arith.subf %240, %237 : vector<8x32xf32>
    %242 = arith.select %239, %237, %241 : vector<8x32xi1>, vector<8x32xf32>
    %cst_79 = arith.constant 1.000000e+00 : f32
    %243 = vector.broadcast %cst_79 : f32 to vector<8x32xf32>
    %244 = arith.addf %243, %242 : vector<8x32xf32>
    %245 = arith.mulf %208, %244 : vector<8x32xf32>
    %246 = arith.truncf %245 : vector<8x32xf32> to vector<8x32xbf16>
    %cst_80 = arith.constant dense<0.000000e+00> : vector<8x32xf32>
    %247 = tpu.matmul %246, %8, %cst_80 {dimension_numbers = #tpu.dot_dimension_numbers<[1], [0], [0], [1], [0, 0, 1, 1], [], []>} : vector<8x32xbf16>, vector<32x32xbf16>, vector<8x32xf32> -> vector<8x32xf32>
    %248 = vector.broadcast %9 : vector<1x32xf32> to vector<8x32xf32>
    %249 = arith.addf %247, %248 : vector<8x32xf32>
    %250 = arith.addf %202, %249 : vector<8x32xf32>
    %cst_81 = arith.constant dense<0.000000e+00> : vector<8xf32>
    %251 = vector.multi_reduction <add>, %250, %cst_81 [1] : vector<8x32xf32> to vector<8xf32>
    %252 = vector.shape_cast %251 : vector<8xf32> to vector<8x1xf32>
    %cst_82 = arith.constant 3.200000e+01 : f32
    %253 = vector.broadcast %cst_82 : f32 to vector<8x1xf32>
    %254 = arith.divf %252, %253 : vector<8x1xf32>
    %255 = vector.broadcast %254 : vector<8x1xf32> to vector<8x32xf32>
    %256 = arith.subf %250, %255 : vector<8x32xf32>
    %257 = arith.mulf %256, %256 : vector<8x32xf32>
    %cst_83 = arith.constant dense<0.000000e+00> : vector<8xf32>
    %258 = vector.multi_reduction <add>, %257, %cst_83 [1] : vector<8x32xf32> to vector<8xf32>
    %259 = vector.shape_cast %258 : vector<8xf32> to vector<8x1xf32>
    %cst_84 = arith.constant 3.200000e+01 : f32
    %260 = vector.broadcast %cst_84 : f32 to vector<8x1xf32>
    %261 = arith.divf %259, %260 : vector<8x1xf32>
    %262 = vector.broadcast %254 : vector<8x1xf32> to vector<8x32xf32>
    %263 = arith.subf %250, %262 : vector<8x32xf32>
    %cst_85 = arith.constant 9.99999974E-6 : f32
    %264 = vector.broadcast %cst_85 : f32 to vector<8x1xf32>
    %265 = arith.addf %261, %264 : vector<8x1xf32>
    %266 = math.rsqrt %265 : vector<8x1xf32>
    %267 = vector.broadcast %266 : vector<8x1xf32> to vector<8x32xf32>
    %268 = arith.mulf %263, %267 : vector<8x32xf32>
    %269 = vector.broadcast %10 : vector<1x32xf32> to vector<8x32xf32>
    %270 = arith.mulf %268, %269 : vector<8x32xf32>
    %271 = vector.broadcast %11 : vector<1x32xf32> to vector<8x32xf32>
    %272 = arith.addf %270, %271 : vector<8x32xf32>
    %c0_86 = arith.constant 0 : index
    %c0_87 = arith.constant 0 : index
    %c0_88 = arith.constant 0 : index
    %273 = vector.load %arg14[%c0_86, %c0_87, %c0_88] : memref<8x2x32xf32, #tpu.memory_space<vmem>>, vector<8x1x32xf32>
    %274 = vector.shape_cast %273 : vector<8x1x32xf32> to vector<8x32xf32>
    %275 = vector.shape_cast %272 : vector<8x32xf32> to vector<8x1x32xf32>
    tpu.vector_store %arg14[%c0_86, %c0_87, %c0_88], %275 {strides = array<i32>} : memref<8x2x32xf32, #tpu.memory_space<vmem>>, vector<8x1x32xf32>,
    %c0_89 = arith.constant 0 : index
    %c1 = arith.constant 1 : index
    %c0_90 = arith.constant 0 : index
    %276 = vector.load %arg1[%c0_89, %c1, %c0_90] : memref<8x2x32xf32, #tpu.memory_space<vmem>>, vector<8x1x32xf32>
    %277 = vector.shape_cast %276 : vector<8x1x32xf32> to vector<8x32xf32>
    %278 = arith.truncf %277 : vector<8x32xf32> to vector<8x32xbf16>
    %cst_91 = arith.constant dense<0.000000e+00> : vector<8x96xf32>
    %279 = tpu.matmul %278, %0, %cst_91 {dimension_numbers = #tpu.dot_dimension_numbers<[1], [0], [0], [1], [0, 0, 1, 1], [], []>} : vector<8x32xbf16>, vector<32x96xbf16>, vector<8x96xf32> -> vector<8x96xf32>
    %280 = vector.broadcast %1 : vector<1x96xf32> to vector<8x96xf32>
    %281 = arith.addf %279, %280 : vector<8x96xf32>
    %282 = vector.extract_strided_slice %281 {offsets = [0, 0], sizes = [8, 32], strides = [1, 1]} : vector<8x96xf32> to vector<8x32xf32>
    %cst_92 = arith.constant 5.000000e-01 : f32
    %283 = vector.broadcast %cst_92 : f32 to vector<8x32xf32>
    %284 = arith.mulf %282, %283 : vector<8x32xf32>
    %285 = vector.extract_strided_slice %281 {offsets = [0, 32], sizes = [8, 32], strides = [1, 1]} : vector<8x96xf32> to vector<8x32xf32>
    %286 = vector.extract_strided_slice %281 {offsets = [0, 64], sizes = [8, 32], strides = [1, 1]} : vector<8x96xf32> to vector<8x32xf32>
    %287 = vector.extract_strided_slice %284 {offsets = [0, 0], sizes = [8, 4], strides = [1, 1]} : vector<8x32xf32> to vector<8x4xf32>
    %288 = arith.truncf %287 : vector<8x4xf32> to vector<8x4xbf16>
    %289 = vector.extract_strided_slice %285 {offsets = [0, 0], sizes = [8, 4], strides = [1, 1]} : vector<8x32xf32> to vector<8x4xf32>
    %290 = arith.truncf %289 : vector<8x4xf32> to vector<8x4xbf16>
    %291 = vector.extract_strided_slice %286 {offsets = [0, 0], sizes = [8, 4], strides = [1, 1]} : vector<8x32xf32> to vector<8x4xf32>
    %292 = arith.truncf %291 : vector<8x4xf32> to vector<8x4xbf16>
    %cst_93 = arith.constant dense<0.000000e+00> : vector<8x8xf32>
    %293 = tpu.matmul %288, %290, %cst_93 {dimension_numbers = #tpu.dot_dimension_numbers<[1], [1], [0], [0], [0, 0, 1, 0], [], []>} : vector<8x4xbf16>, vector<8x4xbf16>, vector<8x8xf32> -> vector<8x8xf32>
    %cst_94 = arith.constant dense<0xFF800000> : vector<8xf32>
    %294 = vector.multi_reduction <maximumf>, %293, %cst_94 [1] : vector<8x8xf32> to vector<8xf32>
    %295 = vector.shape_cast %294 : vector<8xf32> to vector<8x1xf32>
    %296 = vector.broadcast %295 : vector<8x1xf32> to vector<8x8xf32>
    %297 = arith.subf %293, %296 : vector<8x8xf32>
    %298 = math.exp %297 : vector<8x8xf32>
    %cst_95 = arith.constant dense<0.000000e+00> : vector<8xf32>
    %299 = vector.multi_reduction <add>, %298, %cst_95 [1] : vector<8x8xf32> to vector<8xf32>
    %300 = vector.shape_cast %299 : vector<8xf32> to vector<8x1xf32>
    %301 = tpu.reciprocal %300 {approx = true} : vector<8x1xf32> -> vector<8x1xf32>
    %302 = vector.broadcast %301 : vector<8x1xf32> to vector<8x8xf32>
    %303 = arith.mulf %298, %302 : vector<8x8xf32>
    %304 = arith.truncf %303 : vector<8x8xf32> to vector<8x8xbf16>
    %cst_96 = arith.constant dense<0.000000e+00> : vector<8x4xf32>
    %305 = tpu.matmul %304, %292, %cst_96 {dimension_numbers = #tpu.dot_dimension_numbers<[1], [0], [0], [1], [0, 0, 1, 1], [], []>} : vector<8x8xbf16>, vector<8x4xbf16>, vector<8x4xf32> -> vector<8x4xf32>
    %306 = vector.extract_strided_slice %284 {offsets = [0, 4], sizes = [8, 4], strides = [1, 1]} : vector<8x32xf32> to vector<8x4xf32>
    %307 = arith.truncf %306 : vector<8x4xf32> to vector<8x4xbf16>
    %308 = vector.extract_strided_slice %285 {offsets = [0, 4], sizes = [8, 4], strides = [1, 1]} : vector<8x32xf32> to vector<8x4xf32>
    %309 = arith.truncf %308 : vector<8x4xf32> to vector<8x4xbf16>
    %310 = vector.extract_strided_slice %286 {offsets = [0, 4], sizes = [8, 4], strides = [1, 1]} : vector<8x32xf32> to vector<8x4xf32>
    %311 = arith.truncf %310 : vector<8x4xf32> to vector<8x4xbf16>
    %cst_97 = arith.constant dense<0.000000e+00> : vector<8x8xf32>
    %312 = tpu.matmul %307, %309, %cst_97 {dimension_numbers = #tpu.dot_dimension_numbers<[1], [1], [0], [0], [0, 0, 1, 0], [], []>} : vector<8x4xbf16>, vector<8x4xbf16>, vector<8x8xf32> -> vector<8x8xf32>
    %cst_98 = arith.constant dense<0xFF800000> : vector<8xf32>
    %313 = vector.multi_reduction <maximumf>, %312, %cst_98 [1] : vector<8x8xf32> to vector<8xf32>
    %314 = vector.shape_cast %313 : vector<8xf32> to vector<8x1xf32>
    %315 = vector.broadcast %314 : vector<8x1xf32> to vector<8x8xf32>
    %316 = arith.subf %312, %315 : vector<8x8xf32>
    %317 = math.exp %316 : vector<8x8xf32>
    %cst_99 = arith.constant dense<0.000000e+00> : vector<8xf32>
    %318 = vector.multi_reduction <add>, %317, %cst_99 [1] : vector<8x8xf32> to vector<8xf32>
    %319 = vector.shape_cast %318 : vector<8xf32> to vector<8x1xf32>
    %320 = tpu.reciprocal %319 {approx = true} : vector<8x1xf32> -> vector<8x1xf32>
    %321 = vector.broadcast %320 : vector<8x1xf32> to vector<8x8xf32>
    %322 = arith.mulf %317, %321 : vector<8x8xf32>
    %323 = arith.truncf %322 : vector<8x8xf32> to vector<8x8xbf16>
    %cst_100 = arith.constant dense<0.000000e+00> : vector<8x4xf32>
    %324 = tpu.matmul %323, %311, %cst_100 {dimension_numbers = #tpu.dot_dimension_numbers<[1], [0], [0], [1], [0, 0, 1, 1], [], []>} : vector<8x8xbf16>, vector<8x4xbf16>, vector<8x4xf32> -> vector<8x4xf32>
    %325 = vector.extract_strided_slice %284 {offsets = [0, 8], sizes = [8, 4], strides = [1, 1]} : vector<8x32xf32> to vector<8x4xf32>
    %326 = arith.truncf %325 : vector<8x4xf32> to vector<8x4xbf16>
    %327 = vector.extract_strided_slice %285 {offsets = [0, 8], sizes = [8, 4], strides = [1, 1]} : vector<8x32xf32> to vector<8x4xf32>
    %328 = arith.truncf %327 : vector<8x4xf32> to vector<8x4xbf16>
    %329 = vector.extract_strided_slice %286 {offsets = [0, 8], sizes = [8, 4], strides = [1, 1]} : vector<8x32xf32> to vector<8x4xf32>
    %330 = arith.truncf %329 : vector<8x4xf32> to vector<8x4xbf16>
    %cst_101 = arith.constant dense<0.000000e+00> : vector<8x8xf32>
    %331 = tpu.matmul %326, %328, %cst_101 {dimension_numbers = #tpu.dot_dimension_numbers<[1], [1], [0], [0], [0, 0, 1, 0], [], []>} : vector<8x4xbf16>, vector<8x4xbf16>, vector<8x8xf32> -> vector<8x8xf32>
    %cst_102 = arith.constant dense<0xFF800000> : vector<8xf32>
    %332 = vector.multi_reduction <maximumf>, %331, %cst_102 [1] : vector<8x8xf32> to vector<8xf32>
    %333 = vector.shape_cast %332 : vector<8xf32> to vector<8x1xf32>
    %334 = vector.broadcast %333 : vector<8x1xf32> to vector<8x8xf32>
    %335 = arith.subf %331, %334 : vector<8x8xf32>
    %336 = math.exp %335 : vector<8x8xf32>
    %cst_103 = arith.constant dense<0.000000e+00> : vector<8xf32>
    %337 = vector.multi_reduction <add>, %336, %cst_103 [1] : vector<8x8xf32> to vector<8xf32>
    %338 = vector.shape_cast %337 : vector<8xf32> to vector<8x1xf32>
    %339 = tpu.reciprocal %338 {approx = true} : vector<8x1xf32> -> vector<8x1xf32>
    %340 = vector.broadcast %339 : vector<8x1xf32> to vector<8x8xf32>
    %341 = arith.mulf %336, %340 : vector<8x8xf32>
    %342 = arith.truncf %341 : vector<8x8xf32> to vector<8x8xbf16>
    %cst_104 = arith.constant dense<0.000000e+00> : vector<8x4xf32>
    %343 = tpu.matmul %342, %330, %cst_104 {dimension_numbers = #tpu.dot_dimension_numbers<[1], [0], [0], [1], [0, 0, 1, 1], [], []>} : vector<8x8xbf16>, vector<8x4xbf16>, vector<8x4xf32> -> vector<8x4xf32>
    %344 = vector.extract_strided_slice %284 {offsets = [0, 12], sizes = [8, 4], strides = [1, 1]} : vector<8x32xf32> to vector<8x4xf32>
    %345 = arith.truncf %344 : vector<8x4xf32> to vector<8x4xbf16>
    %346 = vector.extract_strided_slice %285 {offsets = [0, 12], sizes = [8, 4], strides = [1, 1]} : vector<8x32xf32> to vector<8x4xf32>
    %347 = arith.truncf %346 : vector<8x4xf32> to vector<8x4xbf16>
    %348 = vector.extract_strided_slice %286 {offsets = [0, 12], sizes = [8, 4], strides = [1, 1]} : vector<8x32xf32> to vector<8x4xf32>
    %349 = arith.truncf %348 : vector<8x4xf32> to vector<8x4xbf16>
    %cst_105 = arith.constant dense<0.000000e+00> : vector<8x8xf32>
    %350 = tpu.matmul %345, %347, %cst_105 {dimension_numbers = #tpu.dot_dimension_numbers<[1], [1], [0], [0], [0, 0, 1, 0], [], []>} : vector<8x4xbf16>, vector<8x4xbf16>, vector<8x8xf32> -> vector<8x8xf32>
    %cst_106 = arith.constant dense<0xFF800000> : vector<8xf32>
    %351 = vector.multi_reduction <maximumf>, %350, %cst_106 [1] : vector<8x8xf32> to vector<8xf32>
    %352 = vector.shape_cast %351 : vector<8xf32> to vector<8x1xf32>
    %353 = vector.broadcast %352 : vector<8x1xf32> to vector<8x8xf32>
    %354 = arith.subf %350, %353 : vector<8x8xf32>
    %355 = math.exp %354 : vector<8x8xf32>
    %cst_107 = arith.constant dense<0.000000e+00> : vector<8xf32>
    %356 = vector.multi_reduction <add>, %355, %cst_107 [1] : vector<8x8xf32> to vector<8xf32>
    %357 = vector.shape_cast %356 : vector<8xf32> to vector<8x1xf32>
    %358 = tpu.reciprocal %357 {approx = true} : vector<8x1xf32> -> vector<8x1xf32>
    %359 = vector.broadcast %358 : vector<8x1xf32> to vector<8x8xf32>
    %360 = arith.mulf %355, %359 : vector<8x8xf32>
    %361 = arith.truncf %360 : vector<8x8xf32> to vector<8x8xbf16>
    %cst_108 = arith.constant dense<0.000000e+00> : vector<8x4xf32>
    %362 = tpu.matmul %361, %349, %cst_108 {dimension_numbers = #tpu.dot_dimension_numbers<[1], [0], [0], [1], [0, 0, 1, 1], [], []>} : vector<8x8xbf16>, vector<8x4xbf16>, vector<8x4xf32> -> vector<8x4xf32>
    %363 = vector.extract_strided_slice %284 {offsets = [0, 16], sizes = [8, 4], strides = [1, 1]} : vector<8x32xf32> to vector<8x4xf32>
    %364 = arith.truncf %363 : vector<8x4xf32> to vector<8x4xbf16>
    %365 = vector.extract_strided_slice %285 {offsets = [0, 16], sizes = [8, 4], strides = [1, 1]} : vector<8x32xf32> to vector<8x4xf32>
    %366 = arith.truncf %365 : vector<8x4xf32> to vector<8x4xbf16>
    %367 = vector.extract_strided_slice %286 {offsets = [0, 16], sizes = [8, 4], strides = [1, 1]} : vector<8x32xf32> to vector<8x4xf32>
    %368 = arith.truncf %367 : vector<8x4xf32> to vector<8x4xbf16>
    %cst_109 = arith.constant dense<0.000000e+00> : vector<8x8xf32>
    %369 = tpu.matmul %364, %366, %cst_109 {dimension_numbers = #tpu.dot_dimension_numbers<[1], [1], [0], [0], [0, 0, 1, 0], [], []>} : vector<8x4xbf16>, vector<8x4xbf16>, vector<8x8xf32> -> vector<8x8xf32>
    %cst_110 = arith.constant dense<0xFF800000> : vector<8xf32>
    %370 = vector.multi_reduction <maximumf>, %369, %cst_110 [1] : vector<8x8xf32> to vector<8xf32>
    %371 = vector.shape_cast %370 : vector<8xf32> to vector<8x1xf32>
    %372 = vector.broadcast %371 : vector<8x1xf32> to vector<8x8xf32>
    %373 = arith.subf %369, %372 : vector<8x8xf32>
    %374 = math.exp %373 : vector<8x8xf32>
    %cst_111 = arith.constant dense<0.000000e+00> : vector<8xf32>
    %375 = vector.multi_reduction <add>, %374, %cst_111 [1] : vector<8x8xf32> to vector<8xf32>
    %376 = vector.shape_cast %375 : vector<8xf32> to vector<8x1xf32>
    %377 = tpu.reciprocal %376 {approx = true} : vector<8x1xf32> -> vector<8x1xf32>
    %378 = vector.broadcast %377 : vector<8x1xf32> to vector<8x8xf32>
    %379 = arith.mulf %374, %378 : vector<8x8xf32>
    %380 = arith.truncf %379 : vector<8x8xf32> to vector<8x8xbf16>
    %cst_112 = arith.constant dense<0.000000e+00> : vector<8x4xf32>
    %381 = tpu.matmul %380, %368, %cst_112 {dimension_numbers = #tpu.dot_dimension_numbers<[1], [0], [0], [1], [0, 0, 1, 1], [], []>} : vector<8x8xbf16>, vector<8x4xbf16>, vector<8x4xf32> -> vector<8x4xf32>
    %382 = vector.extract_strided_slice %284 {offsets = [0, 20], sizes = [8, 4], strides = [1, 1]} : vector<8x32xf32> to vector<8x4xf32>
    %383 = arith.truncf %382 : vector<8x4xf32> to vector<8x4xbf16>
    %384 = vector.extract_strided_slice %285 {offsets = [0, 20], sizes = [8, 4], strides = [1, 1]} : vector<8x32xf32> to vector<8x4xf32>
    %385 = arith.truncf %384 : vector<8x4xf32> to vector<8x4xbf16>
    %386 = vector.extract_strided_slice %286 {offsets = [0, 20], sizes = [8, 4], strides = [1, 1]} : vector<8x32xf32> to vector<8x4xf32>
    %387 = arith.truncf %386 : vector<8x4xf32> to vector<8x4xbf16>
    %cst_113 = arith.constant dense<0.000000e+00> : vector<8x8xf32>
    %388 = tpu.matmul %383, %385, %cst_113 {dimension_numbers = #tpu.dot_dimension_numbers<[1], [1], [0], [0], [0, 0, 1, 0], [], []>} : vector<8x4xbf16>, vector<8x4xbf16>, vector<8x8xf32> -> vector<8x8xf32>
    %cst_114 = arith.constant dense<0xFF800000> : vector<8xf32>
    %389 = vector.multi_reduction <maximumf>, %388, %cst_114 [1] : vector<8x8xf32> to vector<8xf32>
    %390 = vector.shape_cast %389 : vector<8xf32> to vector<8x1xf32>
    %391 = vector.broadcast %390 : vector<8x1xf32> to vector<8x8xf32>
    %392 = arith.subf %388, %391 : vector<8x8xf32>
    %393 = math.exp %392 : vector<8x8xf32>
    %cst_115 = arith.constant dense<0.000000e+00> : vector<8xf32>
    %394 = vector.multi_reduction <add>, %393, %cst_115 [1] : vector<8x8xf32> to vector<8xf32>
    %395 = vector.shape_cast %394 : vector<8xf32> to vector<8x1xf32>
    %396 = tpu.reciprocal %395 {approx = true} : vector<8x1xf32> -> vector<8x1xf32>
    %397 = vector.broadcast %396 : vector<8x1xf32> to vector<8x8xf32>
    %398 = arith.mulf %393, %397 : vector<8x8xf32>
    %399 = arith.truncf %398 : vector<8x8xf32> to vector<8x8xbf16>
    %cst_116 = arith.constant dense<0.000000e+00> : vector<8x4xf32>
    %400 = tpu.matmul %399, %387, %cst_116 {dimension_numbers = #tpu.dot_dimension_numbers<[1], [0], [0], [1], [0, 0, 1, 1], [], []>} : vector<8x8xbf16>, vector<8x4xbf16>, vector<8x4xf32> -> vector<8x4xf32>
    %401 = vector.extract_strided_slice %284 {offsets = [0, 24], sizes = [8, 4], strides = [1, 1]} : vector<8x32xf32> to vector<8x4xf32>
    %402 = arith.truncf %401 : vector<8x4xf32> to vector<8x4xbf16>
    %403 = vector.extract_strided_slice %285 {offsets = [0, 24], sizes = [8, 4], strides = [1, 1]} : vector<8x32xf32> to vector<8x4xf32>
    %404 = arith.truncf %403 : vector<8x4xf32> to vector<8x4xbf16>
    %405 = vector.extract_strided_slice %286 {offsets = [0, 24], sizes = [8, 4], strides = [1, 1]} : vector<8x32xf32> to vector<8x4xf32>
    %406 = arith.truncf %405 : vector<8x4xf32> to vector<8x4xbf16>
    %cst_117 = arith.constant dense<0.000000e+00> : vector<8x8xf32>
    %407 = tpu.matmul %402, %404, %cst_117 {dimension_numbers = #tpu.dot_dimension_numbers<[1], [1], [0], [0], [0, 0, 1, 0], [], []>} : vector<8x4xbf16>, vector<8x4xbf16>, vector<8x8xf32> -> vector<8x8xf32>
    %cst_118 = arith.constant dense<0xFF800000> : vector<8xf32>
    %408 = vector.multi_reduction <maximumf>, %407, %cst_118 [1] : vector<8x8xf32> to vector<8xf32>
    %409 = vector.shape_cast %408 : vector<8xf32> to vector<8x1xf32>
    %410 = vector.broadcast %409 : vector<8x1xf32> to vector<8x8xf32>
    %411 = arith.subf %407, %410 : vector<8x8xf32>
    %412 = math.exp %411 : vector<8x8xf32>
    %cst_119 = arith.constant dense<0.000000e+00> : vector<8xf32>
    %413 = vector.multi_reduction <add>, %412, %cst_119 [1] : vector<8x8xf32> to vector<8xf32>
    %414 = vector.shape_cast %413 : vector<8xf32> to vector<8x1xf32>
    %415 = tpu.reciprocal %414 {approx = true} : vector<8x1xf32> -> vector<8x1xf32>
    %416 = vector.broadcast %415 : vector<8x1xf32> to vector<8x8xf32>
    %417 = arith.mulf %412, %416 : vector<8x8xf32>
    %418 = arith.truncf %417 : vector<8x8xf32> to vector<8x8xbf16>
    %cst_120 = arith.constant dense<0.000000e+00> : vector<8x4xf32>
    %419 = tpu.matmul %418, %406, %cst_120 {dimension_numbers = #tpu.dot_dimension_numbers<[1], [0], [0], [1], [0, 0, 1, 1], [], []>} : vector<8x8xbf16>, vector<8x4xbf16>, vector<8x4xf32> -> vector<8x4xf32>
    %420 = vector.extract_strided_slice %284 {offsets = [0, 28], sizes = [8, 4], strides = [1, 1]} : vector<8x32xf32> to vector<8x4xf32>
    %421 = arith.truncf %420 : vector<8x4xf32> to vector<8x4xbf16>
    %422 = vector.extract_strided_slice %285 {offsets = [0, 28], sizes = [8, 4], strides = [1, 1]} : vector<8x32xf32> to vector<8x4xf32>
    %423 = arith.truncf %422 : vector<8x4xf32> to vector<8x4xbf16>
    %424 = vector.extract_strided_slice %286 {offsets = [0, 28], sizes = [8, 4], strides = [1, 1]} : vector<8x32xf32> to vector<8x4xf32>
    %425 = arith.truncf %424 : vector<8x4xf32> to vector<8x4xbf16>
    %cst_121 = arith.constant dense<0.000000e+00> : vector<8x8xf32>
    %426 = tpu.matmul %421, %423, %cst_121 {dimension_numbers = #tpu.dot_dimension_numbers<[1], [1], [0], [0], [0, 0, 1, 0], [], []>} : vector<8x4xbf16>, vector<8x4xbf16>, vector<8x8xf32> -> vector<8x8xf32>
    %cst_122 = arith.constant dense<0xFF800000> : vector<8xf32>
    %427 = vector.multi_reduction <maximumf>, %426, %cst_122 [1] : vector<8x8xf32> to vector<8xf32>
    %428 = vector.shape_cast %427 : vector<8xf32> to vector<8x1xf32>
    %429 = vector.broadcast %428 : vector<8x1xf32> to vector<8x8xf32>
    %430 = arith.subf %426, %429 : vector<8x8xf32>
    %431 = math.exp %430 : vector<8x8xf32>
    %cst_123 = arith.constant dense<0.000000e+00> : vector<8xf32>
    %432 = vector.multi_reduction <add>, %431, %cst_123 [1] : vector<8x8xf32> to vector<8xf32>
    %433 = vector.shape_cast %432 : vector<8xf32> to vector<8x1xf32>
    %434 = tpu.reciprocal %433 {approx = true} : vector<8x1xf32> -> vector<8x1xf32>
    %435 = vector.broadcast %434 : vector<8x1xf32> to vector<8x8xf32>
    %436 = arith.mulf %431, %435 : vector<8x8xf32>
    %437 = arith.truncf %436 : vector<8x8xf32> to vector<8x8xbf16>
    %cst_124 = arith.constant dense<0.000000e+00> : vector<8x4xf32>
    %438 = tpu.matmul %437, %425, %cst_124 {dimension_numbers = #tpu.dot_dimension_numbers<[1], [0], [0], [1], [0, 0, 1, 1], [], []>} : vector<8x8xbf16>, vector<8x4xbf16>, vector<8x4xf32> -> vector<8x4xf32>
    %439 = tpu.concatenate %305, %324, %343, %362, %381, %400, %419, %438 in 1 : vector<8x4xf32>, vector<8x4xf32>, vector<8x4xf32>, vector<8x4xf32>, vector<8x4xf32>, vector<8x4xf32>, vector<8x4xf32>, vector<8x4xf32> -> vector<8x32xf32>
    %440 = arith.truncf %439 : vector<8x32xf32> to vector<8x32xbf16>
    %cst_125 = arith.constant dense<0.000000e+00> : vector<8x32xf32>
    %441 = tpu.matmul %440, %2, %cst_125 {dimension_numbers = #tpu.dot_dimension_numbers<[1], [0], [0], [1], [0, 0, 1, 1], [], []>} : vector<8x32xbf16>, vector<32x32xbf16>, vector<8x32xf32> -> vector<8x32xf32>
    %442 = vector.broadcast %3 : vector<1x32xf32> to vector<8x32xf32>
    %443 = arith.addf %441, %442 : vector<8x32xf32>
    %444 = arith.addf %277, %443 : vector<8x32xf32>
    %cst_126 = arith.constant dense<0.000000e+00> : vector<8xf32>
    %445 = vector.multi_reduction <add>, %444, %cst_126 [1] : vector<8x32xf32> to vector<8xf32>
    %446 = vector.shape_cast %445 : vector<8xf32> to vector<8x1xf32>
    %cst_127 = arith.constant 3.200000e+01 : f32
    %447 = vector.broadcast %cst_127 : f32 to vector<8x1xf32>
    %448 = arith.divf %446, %447 : vector<8x1xf32>
    %449 = vector.broadcast %448 : vector<8x1xf32> to vector<8x32xf32>
    %450 = arith.subf %444, %449 : vector<8x32xf32>
    %451 = arith.mulf %450, %450 : vector<8x32xf32>
    %cst_128 = arith.constant dense<0.000000e+00> : vector<8xf32>
    %452 = vector.multi_reduction <add>, %451, %cst_128 [1] : vector<8x32xf32> to vector<8xf32>
    %453 = vector.shape_cast %452 : vector<8xf32> to vector<8x1xf32>
    %cst_129 = arith.constant 3.200000e+01 : f32
    %454 = vector.broadcast %cst_129 : f32 to vector<8x1xf32>
    %455 = arith.divf %453, %454 : vector<8x1xf32>
    %456 = vector.broadcast %448 : vector<8x1xf32> to vector<8x32xf32>
    %457 = arith.subf %444, %456 : vector<8x32xf32>
    %cst_130 = arith.constant 9.99999974E-6 : f32
    %458 = vector.broadcast %cst_130 : f32 to vector<8x1xf32>
    %459 = arith.addf %455, %458 : vector<8x1xf32>
    %460 = math.rsqrt %459 : vector<8x1xf32>
    %461 = vector.broadcast %460 : vector<8x1xf32> to vector<8x32xf32>
    %462 = arith.mulf %457, %461 : vector<8x32xf32>
    %463 = vector.broadcast %4 : vector<1x32xf32> to vector<8x32xf32>
    %464 = arith.mulf %462, %463 : vector<8x32xf32>
    %465 = vector.broadcast %5 : vector<1x32xf32> to vector<8x32xf32>
    %466 = arith.addf %464, %465 : vector<8x32xf32>
    %467 = arith.truncf %466 : vector<8x32xf32> to vector<8x32xbf16>
    %cst_131 = arith.constant dense<0.000000e+00> : vector<8x32xf32>
    %468 = tpu.matmul %467, %6, %cst_131 {dimension_numbers = #tpu.dot_dimension_numbers<[1], [0], [0], [1], [0, 0, 1, 1], [], []>} : vector<8x32xbf16>, vector<32x32xbf16>, vector<8x32xf32> -> vector<8x32xf32>
    %469 = vector.broadcast %7 : vector<1x32xf32> to vector<8x32xf32>
    %470 = arith.addf %468, %469 : vector<8x32xf32>
    %cst_132 = arith.constant 5.000000e-01 : f32
    %471 = vector.broadcast %cst_132 : f32 to vector<8x32xf32>
    %472 = arith.mulf %471, %470 : vector<8x32xf32>
    %cst_133 = arith.constant 0.707106769 : f32
    %473 = vector.broadcast %cst_133 : f32 to vector<8x32xf32>
    %474 = arith.mulf %470, %473 : vector<8x32xf32>
    %475 = math.absf %474 : vector<8x32xf32>
    %cst_134 = arith.constant 0.327591091 : f32
    %476 = vector.broadcast %cst_134 : f32 to vector<8x32xf32>
    %477 = arith.mulf %476, %475 : vector<8x32xf32>
    %cst_135 = arith.constant 1.000000e+00 : f32
    %478 = vector.broadcast %cst_135 : f32 to vector<8x32xf32>
    %479 = arith.addf %478, %477 : vector<8x32xf32>
    %480 = tpu.reciprocal %479 {approx = true} : vector<8x32xf32> -> vector<8x32xf32>
    %cst_136 = arith.constant 1.06140542 : f32
    %481 = vector.broadcast %cst_136 : f32 to vector<8x32xf32>
    %482 = arith.mulf %481, %480 : vector<8x32xf32>
    %cst_137 = arith.constant -1.45315206 : f32
    %483 = vector.broadcast %cst_137 : f32 to vector<8x32xf32>
    %484 = arith.addf %482, %483 : vector<8x32xf32>
    %485 = arith.mulf %484, %480 : vector<8x32xf32>
    %cst_138 = arith.constant 1.42141378 : f32
    %486 = vector.broadcast %cst_138 : f32 to vector<8x32xf32>
    %487 = arith.addf %485, %486 : vector<8x32xf32>
    %488 = arith.mulf %487, %480 : vector<8x32xf32>
    %cst_139 = arith.constant -0.284496725 : f32
    %489 = vector.broadcast %cst_139 : f32 to vector<8x32xf32>
    %490 = arith.addf %488, %489 : vector<8x32xf32>
    %491 = arith.mulf %490, %480 : vector<8x32xf32>
    %cst_140 = arith.constant 0.254829586 : f32
    %492 = vector.broadcast %cst_140 : f32 to vector<8x32xf32>
    %493 = arith.addf %491, %492 : vector<8x32xf32>
    %494 = arith.mulf %493, %480 : vector<8x32xf32>
    %cst_141 = arith.constant 0.000000e+00 : f32
    %495 = vector.broadcast %cst_141 : f32 to vector<8x32xf32>
    %496 = arith.subf %495, %475 : vector<8x32xf32>
    %497 = arith.mulf %496, %475 : vector<8x32xf32>
    %498 = math.exp %497 : vector<8x32xf32>
    %499 = arith.mulf %494, %498 : vector<8x32xf32>
    %cst_142 = arith.constant 1.000000e+00 : f32
    %500 = vector.broadcast %cst_142 : f32 to vector<8x32xf32>
    %501 = arith.subf %500, %499 : vector<8x32xf32>
    %cst_143 = arith.constant 0.000000e+00 : f32
    %502 = vector.broadcast %cst_143 : f32 to vector<8x32xf32>
    %503 = arith.cmpf oge, %474, %502 : vector<8x32xf32>
    %cst_144 = arith.constant 0.000000e+00 : f32
    %504 = vector.broadcast %cst_144 : f32 to vector<8x32xf32>
    %505 = arith.subf %504, %501 : vector<8x32xf32>
    %506 = arith.select %503, %501, %505 : vector<8x32xi1>, vector<8x32xf32>
    %cst_145 = arith.constant 1.000000e+00 : f32
    %507 = vector.broadcast %cst_145 : f32 to vector<8x32xf32>
    %508 = arith.addf %507, %506 : vector<8x32xf32>
    %509 = arith.mulf %472, %508 : vector<8x32xf32>
    %510 = arith.truncf %509 : vector<8x32xf32> to vector<8x32xbf16>
    %cst_146 = arith.constant dense<0.000000e+00> : vector<8x32xf32>
    %511 = tpu.matmul %510, %8, %cst_146 {dimension_numbers = #tpu.dot_dimension_numbers<[1], [0], [0], [1], [0, 0, 1, 1], [], []>} : vector<8x32xbf16>, vector<32x32xbf16>, vector<8x32xf32> -> vector<8x32xf32>
    %512 = vector.broadcast %9 : vector<1x32xf32> to vector<8x32xf32>
    %513 = arith.addf %511, %512 : vector<8x32xf32>
    %514 = arith.addf %466, %513 : vector<8x32xf32>
    %cst_147 = arith.constant dense<0.000000e+00> : vector<8xf32>
    %515 = vector.multi_reduction <add>, %514, %cst_147 [1] : vector<8x32xf32> to vector<8xf32>
    %516 = vector.shape_cast %515 : vector<8xf32> to vector<8x1xf32>
    %cst_148 = arith.constant 3.200000e+01 : f32
    %517 = vector.broadcast %cst_148 : f32 to vector<8x1xf32>
    %518 = arith.divf %516, %517 : vector<8x1xf32>
    %519 = vector.broadcast %518 : vector<8x1xf32> to vector<8x32xf32>
    %520 = arith.subf %514, %519 : vector<8x32xf32>
    %521 = arith.mulf %520, %520 : vector<8x32xf32>
    %cst_149 = arith.constant dense<0.000000e+00> : vector<8xf32>
    %522 = vector.multi_reduction <add>, %521, %cst_149 [1] : vector<8x32xf32> to vector<8xf32>
    %523 = vector.shape_cast %522 : vector<8xf32> to vector<8x1xf32>
    %cst_150 = arith.constant 3.200000e+01 : f32
    %524 = vector.broadcast %cst_150 : f32 to vector<8x1xf32>
    %525 = arith.divf %523, %524 : vector<8x1xf32>
    %526 = vector.broadcast %518 : vector<8x1xf32> to vector<8x32xf32>
    %527 = arith.subf %514, %526 : vector<8x32xf32>
    %cst_151 = arith.constant 9.99999974E-6 : f32
    %528 = vector.broadcast %cst_151 : f32 to vector<8x1xf32>
    %529 = arith.addf %525, %528 : vector<8x1xf32>
    %530 = math.rsqrt %529 : vector<8x1xf32>
    %531 = vector.broadcast %530 : vector<8x1xf32> to vector<8x32xf32>
    %532 = arith.mulf %527, %531 : vector<8x32xf32>
    %533 = vector.broadcast %10 : vector<1x32xf32> to vector<8x32xf32>
    %534 = arith.mulf %532, %533 : vector<8x32xf32>
    %535 = vector.broadcast %11 : vector<1x32xf32> to vector<8x32xf32>
    %536 = arith.addf %534, %535 : vector<8x32xf32>
    %c0_152 = arith.constant 0 : index
    %c1_153 = arith.constant 1 : index
    %c0_154 = arith.constant 0 : index
    %537 = vector.load %arg14[%c0_152, %c1_153, %c0_154] : memref<8x2x32xf32, #tpu.memory_space<vmem>>, vector<8x1x32xf32>
    %538 = vector.shape_cast %537 : vector<8x1x32xf32> to vector<8x32xf32>
    %539 = vector.shape_cast %536 : vector<8x32xf32> to vector<8x1x32xf32>
    tpu.vector_store %arg14[%c0_152, %c1_153, %c0_154], %539 {strides = array<i32>} : memref<8x2x32xf32, #tpu.memory_space<vmem>>, vector<8x1x32xf32>,
    return
  }
  func.func @transform_0(%arg0: i32) -> (i32, i32, i32) {
    %c0_i32 = arith.constant 0 : i32
    %c0_i32_0 = arith.constant 0 : i32
    %c0_i32_1 = arith.constant 0 : i32
    %c0_i32_2 = arith.constant 0 : i32
    return %c0_i32, %c0_i32_0, %c0_i32_1 : i32, i32, i32
  }
  func.func @transform_1(%arg0: i32) -> (i32, i32) {
    %c0_i32 = arith.constant 0 : i32
    %c0_i32_0 = arith.constant 0 : i32
    %c0_i32_1 = arith.constant 0 : i32
    return %c0_i32, %c0_i32_0 : i32, i32
  }
  func.func @transform_2(%arg0: i32) -> (i32, i32) {
    %c0_i32 = arith.constant 0 : i32
    %c0_i32_0 = arith.constant 0 : i32
    %c0_i32_1 = arith.constant 0 : i32
    return %c0_i32, %c0_i32_0 : i32, i32
  }
  func.func @transform_3(%arg0: i32) -> (i32, i32) {
    %c0_i32 = arith.constant 0 : i32
    %c0_i32_0 = arith.constant 0 : i32
    %c0_i32_1 = arith.constant 0 : i32
    return %c0_i32, %c0_i32_0 : i32, i32
  }
  func.func @transform_4(%arg0: i32) -> (i32, i32) {
    %c0_i32 = arith.constant 0 : i32
    %c0_i32_0 = arith.constant 0 : i32
    %c0_i32_1 = arith.constant 0 : i32
    return %c0_i32, %c0_i32_0 : i32, i32
  }
  func.func @transform_5(%arg0: i32) -> (i32, i32) {
    %c0_i32 = arith.constant 0 : i32
    %c0_i32_0 = arith.constant 0 : i32
    %c0_i32_1 = arith.constant 0 : i32
    return %c0_i32, %c0_i32_0 : i32, i32
  }
  func.func @transform_6(%arg0: i32) -> (i32, i32) {
    %c0_i32 = arith.constant 0 : i32
    %c0_i32_0 = arith.constant 0 : i32
    %c0_i32_1 = arith.constant 0 : i32
    return %c0_i32, %c0_i32_0 : i32, i32
  }
  func.func @transform_7(%arg0: i32) -> (i32, i32) {
    %c0_i32 = arith.constant 0 : i32
    %c0_i32_0 = arith.constant 0 : i32
    %c0_i32_1 = arith.constant 0 : i32
    return %c0_i32, %c0_i32_0 : i32, i32
  }
  func.func @transform_8(%arg0: i32) -> (i32, i32) {
    %c0_i32 = arith.constant 0 : i32
    %c0_i32_0 = arith.constant 0 : i32
    %c0_i32_1 = arith.constant 0 : i32
    return %c0_i32, %c0_i32_0 : i32, i32
  }
  func.func @transform_9(%arg0: i32) -> (i32, i32) {
    %c0_i32 = arith.constant 0 : i32
    %c0_i32_0 = arith.constant 0 : i32
    %c0_i32_1 = arith.constant 0 : i32
    return %c0_i32, %c0_i32_0 : i32, i32
  }
  func.func @transform_10(%arg0: i32) -> (i32, i32) {
    %c0_i32 = arith.constant 0 : i32
    %c0_i32_0 = arith.constant 0 : i32
    %c0_i32_1 = arith.constant 0 : i32
    return %c0_i32, %c0_i32_0 : i32, i32
  }
  func.func @transform_11(%arg0: i32) -> (i32, i32) {
    %c0_i32 = arith.constant 0 : i32
    %c0_i32_0 = arith.constant 0 : i32
    %c0_i32_1 = arith.constant 0 : i32
    return %c0_i32, %c0_i32_0 : i32, i32
  }
  func.func @transform_12(%arg0: i32) -> (i32, i32) {
    %c0_i32 = arith.constant 0 : i32
    %c0_i32_0 = arith.constant 0 : i32
    %c0_i32_1 = arith.constant 0 : i32
    return %c0_i32, %c0_i32_0 : i32, i32
  }
  func.func @transform_13(%arg0: i32) -> (i32, i32, i32) {
    %c0_i32 = arith.constant 0 : i32
    %c0_i32_0 = arith.constant 0 : i32
    %c0_i32_1 = arith.constant 0 : i32
    %c0_i32_2 = arith.constant 0 : i32
    return %c0_i32, %c0_i32_0, %c0_i32_1 : i32, i32, i32
  }
}

</mosaic_0001>

<bundles_post_ra>
// kernel: attention_block_forward.1
= control target key start
LH: loop header
LB: loop body
LE: loop exit
PB: predicated region body
PF: predicated region fallthrough
CT: control target
= control target key end

     0   :  { %v3790_v1 = vmov 0.0   ;;  %vm3791_vm0 = vmmov 0   ;;  %vm109_vm1 = vcmask 1041409   ;;  %vm112_vm2 = vcmask 1042434   ;;  %s4911_s0 = inlined_call_operand.vmem [shape: f32[8,2,32], index: 0, kind: input, shape index: {}]   ;;  %s4912_s1 = inlined_call_operand.vmem [shape: bf16[32,96], index: 1, kind: input, shape index: {}]   ;;  %s4913_s2 = inlined_call_operand.vmem [shape: f32[1,96], index: 2, kind: input, shape index: {}]   ;;  %s4914_s3 = inlined_call_operand.vmem [shape: bf16[32,32], index: 3, kind: input, shape index: {}]   ;;  %s4915_s4 = inlined_call_operand.vmem [shape: f32[1,32], index: 4, kind: input, shape index: {}]   ;;  %s4916_s5 = inlined_call_operand.vmem [shape: f32[1,32], index: 5, kind: input, shape index: {}]   ;;  %s4917_s6 = inlined_call_operand.vmem [shape: f32[1,32], index: 6, kind: input, shape index: {}]   ;;  %s4918_s7 = inlined_call_operand.vmem [shape: bf16[32,32], index: 7, kind: input, shape index: {}]   ;;  %s4919_s8 = inlined_call_operand.vmem [shape: f32[1,32], index: 8, kind: input, shape index: {}]   ;;  %s4920_s9 = inlined_call_operand.vmem [shape: bf16[32,32], index: 9, kind: input, shape index: {}]   ;;  %s4921_s10 = inlined_call_operand.vmem [shape: f32[1,32], index: 10, kind: input, shape index: {}]   ;;  %s4922_s11 = inlined_call_operand.vmem [shape: f32[1,32], index: 11, kind: input, shape index: {}]   ;;  %s4923_s12 = inlined_call_operand.vmem [shape: f32[1,32], index: 12, kind: input, shape index: {}]   ;;  %s4924_s13 = inlined_call_operand.hbm [shape: f32[8,2,32], index: 13, kind: output, shape index: {}]  }
   0x1   :  { %v3667_v0 = vld [vmem:[%s4912_s1 + $0x8] sm:$0xff]   ;;  %3376 = vmatprep.subr.bf16.mxu0 %v3790_v1  ;;  %v3668_v2 = vld [vmem:[%s4912_s1] sm:$0xff]   ;;  %3384 = vmatprep.subr.bf16.mxu1 %v3790_v1  ;;  %vm115_vm3 = vcmask 1043459   ;;  %vm118_vm4 = vcmask 1044484   ;;  %vm121_vm5 = vcmask 1045509   ;;  %vm4946_vm6 = vcmask 1046534  }
   0x2   :  { %3377 = vmatpush3.bf16.msra.mxu0 %v3667_v0  ;;  %3380 = vmatprep.mubr.msk.bf16.mxu0 %vm3791_vm0, %v3790_v1  ;;  %v3908_v3 = vld [vmem:[%s4911_s0] sm:$0x1]  ;;  %v3913_v4 = vld [vmem:[%s4911_s0 + $0x2] sm:$0x1]  ;;  %v3918_v5 = vld [vmem:[%s4911_s0 + $0x4] sm:$0x1] }
   0x3   :  { %3378 = vmatprep.subr.bf16.mxu0 %v3790_v1  ;;  %v3924_v6 = vld [vmem:[%s4911_s0 + $0x6] sm:$0x1]  ;;  %v3929_v7 = vld [vmem:[%s4911_s0 + $0x8] sm:$0x1]  ;;  %v3934_v8 = vld [vmem:[%s4911_s0 + $0xa] sm:$0x1]  ;;  %v78_v9 = vpack.c.bf16 %v3908_v3, %v3908_v3  ;;  %v79_v10 = vpack.c.bf16 %v3913_v4, %v3913_v4  ;;  %v80_v11 = vpack.c.bf16 %v3918_v5, %v3918_v5  ;;  %3386 = vmatprep.mubr.msk.bf16.mxu1 %vm3791_vm0, %v3790_v1 }
   0x4   :  { %v3947_v12 = vld [vmem:[%s4911_s0 + $0xc] sm:$0x1]  ;;  %v3952_v13 = vld [vmem:[%s4911_s0 + $0xe] sm:$0x1]  ;;  %v81_v14 = vpack.c.bf16 %v3924_v6, %v3924_v6  ;;  %v82_v15 = vpack.c.bf16 %v3929_v7, %v3929_v7  ;;  %v83_v16 = vpack.c.bf16 %v3934_v8, %v3934_v8  ;;  %vm4945_vm7 = vcmask 1047559  }
   0x5   :  { %v84_v17 = vpack.c.bf16 %v3947_v12, %v3947_v12  ;;  %v85_v18 = vpack.c.bf16 %v3952_v13, %v3952_v13  ;;  %v100_v19 = vunpack.c.l.b16 %v78_v9  ;;  %v101_v20 = vunpack.c.l.b16 %v79_v10 }
   0x6   :  { %3379 = vmatpush3.bf16.msra.mxu0 %v3668_v2  ;;  %v102_v21 = vunpack.c.l.b16 %v80_v11  ;;  %v103_v22 = vunpack.c.l.b16 %v81_v14  ;;  %v104_v23 = vunpack.c.l.b16 %v82_v15  ;;  %v105_v24 = vunpack.c.l.b16 %v83_v16 }
   0x7   :  { %v106_v25 = vunpack.c.l.b16 %v84_v17  ;;  %v107_v26 = vunpack.c.l.b16 %v85_v18  ;;  %v108_v27 = vrot.slane %v101_v20, 7  ;;  %3390 = vmatprep.subr.bf16.mxu0 %v3790_v1 }
   0x8   :  { %v111_v28 = vrot.slane %v102_v21, 6  ;;  %v114_v29 = vrot.slane %v103_v22, 5  ;;  %v117_v30 = vrot.slane %v104_v23, 4  ;;  %v120_v32 = vrot.slane %v105_v24, 3 }
   0x9   :  { %v110_v31 = vsel %vm109_vm1, %v108_v27, %v100_v19  ;;  %v123_v34 = vrot.slane %v106_v25, 2  ;;  %v126_v36 = vrot.slane %v107_v26, 1 }
   0xa   :  { %v113_v33 = vsel %vm112_vm2, %v111_v28, %v110_v31 }
   0xb   :  { %v116_v35 = vsel %vm115_vm3, %v114_v29, %v113_v33 }
   0xc   :  { %v119_v37 = vsel %vm118_vm4, %v117_v30, %v116_v35 }
   0xd   :  { %18 = vsyncpa [#allocation3], 0  ;;  %v122_v38 = vsel %vm121_vm5, %v120_v32, %v119_v37  ;;  %vm142_vm8 = vcmask 261120   ;;  %v3232_v42 = vld [vmem:[%s4913_s2] ss:$0 sm:$0xff]  ;;  %s3792_s30 = smov 96  }
   0xe   :  { %v125_v39 = vsel %vm4946_vm6, %v123_v34, %v122_v38  ;;  %s3793_s14 = smov 124   ;;  %s3794_s15 = smov 92   ;;  %vm192_vm9 = vcmask 31744   ;;  %vm239_vm10 = vcmask 64512   ;;  %vm4940_vm11 = vcmask 1043456  }
   0xf   :  { %v128_v40 = vsel %vm4945_vm7, %v126_v36, %v125_v39  ;;  %s3795_s16 = smov 88   ;;  %s3796_s17 = smov 120   ;;  %vm1102_vm12 = vcmask 97280   ;;  %vm1104_vm13 = vcmask 130048   ;;  %vm1106_vm14 = vcmask 162816  }
  0x10   :  { %v129_v41 = vpack.c.b16 %v128_v40, %v128_v40  ;;  %s3797_s18 = smov 84   ;;  %s3798_s19 = smov 116   ;;  %vm1108_vm15 = vcmask 195584  }
  0x11   :  { %s3799_s20 = smov 80   ;;  %s3800_s21 = smov 112  }
  0x12   :  { %3381 = vmatmul.mubr.msk.bf16.vlgmr.msra.gmra.mxu0 %vm142_vm8, %v129_v41  ;;  %s3801_s22 = smov 76   ;;  %s4939_s23 = smov 108  }
  0x13   :  { %3392 = vmatprep.mubr.msk.bf16.mxu0 %vm3791_vm0, %v3790_v1  ;;  %s3803_s24 = smov 72   ;;  %s4930_s25 = smov 104  }
  0x14   :  { %s4936_s26 = smov 68   ;;  %s4925_s27 = smov 100  }
  0x15   :  { %s4929_s28 = smov 60   ;;  %s4928_s29 = smov 64  }
  0xd2   :  { %v180_v43 = vpop.f32.mrf.mxu0 }
  0xd3   :  { %v181_v44 = vadd.f32 %v3232_v42, %v180_v43 }
  0xd4   :  { %v3382_v45 = vpop.f32.mrf.mxu0 }
  0xd5   :  { %v186_v46 = vmul.f32 0.5, %v181_v44  ;;  %v3978_v47 = vpack.c.bf16 %v181_v44, %v181_v44 }
  0xd6   :  { %v183_v48 = vpop.f32.mrf.mxu0 }
  0xd7   :  { %v187_v49 = vpack.c.bf16 %v186_v46, %v186_v46  ;;  %190 = vrot.lane.b32.xlu0 %v3978_v47, %s3792_s30 }
  0xd8   :  { %v3383_v50 = vpop.f32.mrf.mxu0 }
  0xd9   :  { %302 = vrot.lane.b32.xlu1 %v187_v49, %s3793_s14 }
  0xdb   :  { %304 = vrot.lane.b32.xlu0 %v3978_v47, %s3794_s15 }
  0xdd   :  { %414 = vrot.lane.b32.xlu1 %v3978_v47, %s3795_s16 }
  0xdf   :  { %412 = vrot.lane.b32.xlu0 %v187_v49, %s3796_s17 }
  0xe1   :  { %524 = vrot.lane.b32.xlu1 %v3978_v47, %s3797_s18 }
  0xe3   :  { %522 = vrot.lane.b32.xlu0 %v187_v49, %s3798_s19 }
  0xe5   :  { %634 = vrot.lane.b32.xlu1 %v3978_v47, %s3799_s20 }
  0xe7   :  { %632 = vrot.lane.b32.xlu0 %v187_v49, %s3800_s21 }
  0xe9   :  { %744 = vrot.lane.b32.xlu1 %v3978_v47, %s3801_s22 }
  0xeb   :  { %742 = vrot.lane.b32.xlu0 %v187_v49, %s4939_s23  ;;  %s4965_s23 = smov 8  }
  0xed   :  { %854 = vrot.lane.b32.xlu1 %v3978_v47, %s3803_s24 }
  0xef   :  { %852 = vrot.lane.b32.xlu0 %v187_v49, %s4930_s25  ;;  %s4931_s25 = smov 48  }
  0xf1   :  { %964 = vrot.lane.b32.xlu1 %v3978_v47, %s4936_s26  ;;  %s4941_s26 = smov 28  }
  0xf3   :  { %962 = vrot.lane.b32.xlu0 %v187_v49, %s4925_s27  ;;  %s4926_s27 = smov 56  }
 0x149   :  { %v191_v51 = vpop.permute.xlu0 %190 }
 0x14a   :  { %v197_v52 = vsel %vm192_vm9, %v191_v51, 0 }
 0x14b   :  { %3385 = vmatpush3.bf16.xpose.msra.mxu1 %v197_v52  ;;  %v303_v54 = vpop.permute.xlu1 %302 }
 0x14c   :  { %3396 = vmatprep.subr.bf16.mxu1 %v3790_v1 }
 0x14d   :  { %v305_v53 = vpop.permute.xlu0 %304 }
 0x14e   :  { %v310_v55 = vsel %vm192_vm9, %v305_v53, 0 }
 0x14f   :  { %v415_v56 = vpop.permute.xlu1 %414 }
 0x150   :  { %v420_v57 = vsel %vm192_vm9, %v415_v56, 0 }
 0x151   :  { %v413_v59 = vpop.permute.xlu0 %412 }
 0x152   :  { %3387 = vmatmul.mubr.msk.bf16.vlgmr.msra.gmra.mxu1 %vm192_vm9, %v187_v49 }
 0x153   :  { %3397 = vmatpush3.bf16.xpose.msra.mxu1 %v310_v55  ;;  %3398 = vmatprep.mubr.msk.bf16.mxu1 %vm3791_vm0, %v3790_v1  ;;  %v525_v58 = vpop.permute.xlu1 %524 }
 0x154   :  { %3408 = vmatprep.subr.bf16.mxu1 %v3790_v1  ;;  %v530_v60 = vsel %vm192_vm9, %v525_v58, 0 }
 0x155   :  { %v523_v62 = vpop.permute.xlu0 %522 }
 0x157   :  { %v635_v61 = vpop.permute.xlu1 %634 }
 0x158   :  { %v640_v63 = vsel %vm192_vm9, %v635_v61, 0 }
 0x159   :  { %v633_v2 = vpop.permute.xlu0 %632 }
 0x15a   :  { %3399 = vmatmul.mubr.msk.bf16.vlgmr.msra.gmra.mxu1 %vm192_vm9, %v303_v54 }
 0x15b   :  { %3409 = vmatpush3.bf16.xpose.msra.mxu1 %v420_v57  ;;  %3410 = vmatprep.mubr.msk.bf16.mxu1 %vm3791_vm0, %v3790_v1  ;;  %v745_v0 = vpop.permute.xlu1 %744 }
 0x15c   :  { %3420 = vmatprep.subr.bf16.mxu1 %v3790_v1  ;;  %v750_v9 = vsel %vm192_vm9, %v745_v0, 0 }
 0x15d   :  { %v743_v11 = vpop.permute.xlu0 %742 }
 0x15f   :  { %v855_v10 = vpop.permute.xlu1 %854 }
 0x160   :  { %v860_v14 = vsel %vm192_vm9, %v855_v10, 0 }
 0x161   :  { %v853_v16 = vpop.permute.xlu0 %852 }
 0x162   :  { %3411 = vmatmul.mubr.msk.bf16.vlgmr.msra.gmra.mxu1 %vm192_vm9, %v413_v59 }
 0x163   :  { %3421 = vmatpush3.bf16.xpose.msra.mxu1 %v530_v60  ;;  %3422 = vmatprep.mubr.msk.bf16.mxu1 %vm3791_vm0, %v3790_v1  ;;  %v965_v15 = vpop.permute.xlu1 %964 }
 0x164   :  { %3432 = vmatprep.subr.bf16.mxu1 %v3790_v1  ;;  %v970_v17 = vsel %vm192_vm9, %v965_v15, 0 }
 0x165   :  { %v963_v18 = vpop.permute.xlu0 %962 }
 0x16a   :  { %3423 = vmatmul.mubr.msk.bf16.vlgmr.msra.gmra.mxu1 %vm192_vm9, %v523_v62 }
 0x16b   :  { %3433 = vmatpush3.bf16.xpose.msra.mxu1 %v640_v63  ;;  %3434 = vmatprep.mubr.msk.bf16.mxu1 %vm3791_vm0, %v3790_v1 }
 0x16c   :  { %3444 = vmatprep.subr.bf16.mxu1 %v3790_v1 }
 0x172   :  { %3435 = vmatmul.mubr.msk.bf16.vlgmr.msra.gmra.mxu1 %vm192_vm9, %v633_v2 }
 0x173   :  { %3445 = vmatpush3.bf16.xpose.msra.mxu1 %v750_v9  ;;  %3446 = vmatprep.mubr.msk.bf16.mxu1 %vm3791_vm0, %v3790_v1 }
 0x174   :  { %3456 = vmatprep.subr.bf16.mxu1 %v3790_v1 }
 0x17a   :  { %3447 = vmatmul.mubr.msk.bf16.vlgmr.msra.gmra.mxu1 %vm192_vm9, %v743_v11 }
 0x17b   :  { %3457 = vmatpush3.bf16.xpose.msra.mxu1 %v860_v14  ;;  %3458 = vmatprep.mubr.msk.bf16.mxu1 %vm3791_vm0, %v3790_v1 }
 0x17c   :  { %3468 = vmatprep.subr.bf16.mxu1 %v3790_v1 }
 0x182   :  { %3459 = vmatmul.mubr.msk.bf16.vlgmr.msra.gmra.mxu1 %vm192_vm9, %v853_v16 }
 0x183   :  { %3469 = vmatpush3.bf16.xpose.msra.mxu1 %v970_v17  ;;  %3470 = vmatprep.mubr.msk.bf16.mxu1 %vm3791_vm0, %v3790_v1 }
 0x184   :  { %3480 = vmatprep.subr.bf16.mxu1 %v3790_v1 }
 0x18a   :  { %3471 = vmatmul.mubr.msk.bf16.vlgmr.msra.gmra.mxu1 %vm192_vm9, %v963_v18 }
 0x18b   :  { %3484 = vmatprep.mubr.msk.bf16.mxu1 %vm3791_vm0, %v3790_v1 }
 0x212   :  { %v233_v19 = vpop.f32.mrf.mxu1 }
 0x213   :  { %v240_v20 = vsel %vm239_vm10, %v233_v19, -inf }
 0x214   :  { %241 = vmax.xlane.f32.xlu1 %v240_v20  ;;  %v3388_v21 = vpop.f32.mrf.mxu1 }
 0x216   :  { %v236_v22 = vpop.f32.mrf.mxu1 }
 0x218   :  { %v3389_v23 = vpop.f32.mrf.mxu1 }
 0x21a   :  { %v346_v24 = vpop.f32.mrf.mxu1 }
 0x21b   :  { %v352_v25 = vsel %vm239_vm10, %v346_v24, -inf }
 0x21c   :  { %353 = vmax.xlane.f32.xlu0 %v352_v25  ;;  %v3400_v26 = vpop.f32.mrf.mxu1 }
 0x21e   :  { %v349_v27 = vpop.f32.mrf.mxu1 }
 0x220   :  { %v3401_v28 = vpop.f32.mrf.mxu1 }
 0x222   :  { %v456_v29 = vpop.f32.mrf.mxu1 }
 0x223   :  { %v462_v30 = vsel %vm239_vm10, %v456_v29, -inf }
 0x224   :  { %463 = vmax.xlane.f32.xlu0 %v462_v30  ;;  %v3412_v31 = vpop.f32.mrf.mxu1 }
 0x226   :  { %v459_v32 = vpop.f32.mrf.mxu1 }
 0x228   :  { %v3413_v33 = vpop.f32.mrf.mxu1 }
 0x22a   :  { %v566_v34 = vpop.f32.mrf.mxu1 }
 0x22b   :  { %v572_v35 = vsel %vm239_vm10, %v566_v34, -inf }
 0x22c   :  { %573 = vmax.xlane.f32.xlu1 %v572_v35  ;;  %v3424_v36 = vpop.f32.mrf.mxu1 }
 0x22e   :  { %v569_v37 = vpop.f32.mrf.mxu1 }
 0x230   :  { %v3425_v38 = vpop.f32.mrf.mxu1 }
 0x232   :  { %v676_v39 = vpop.f32.mrf.mxu1 }
 0x233   :  { %v682_v40 = vsel %vm239_vm10, %v676_v39, -inf }
 0x234   :  { %683 = vmax.xlane.f32.xlu0 %v682_v40  ;;  %v3436_v41 = vpop.f32.mrf.mxu1 }
 0x236   :  { %v679_v42 = vpop.f32.mrf.mxu1 }
 0x238   :  { %v3437_v43 = vpop.f32.mrf.mxu1 }
 0x23a   :  { %v4048_v44 = vpop.f32.mrf.mxu1 }
 0x23b   :  { %v792_v45 = vsel %vm239_vm10, %v4048_v44, -inf }
 0x23c   :  { %793 = vmax.xlane.f32.xlu1 %v792_v45  ;;  %v3448_v46 = vpop.f32.mrf.mxu1 }
 0x23e   :  { %v789_v48 = vpop.f32.mrf.mxu1 }
 0x240   :  { %v3449_v49 = vpop.f32.mrf.mxu1 }
 0x242   :  { %v896_v50 = vpop.f32.mrf.mxu1 }
 0x243   :  { %v902_v51 = vsel %vm239_vm10, %v896_v50, -inf }
 0x244   :  { %903 = vmax.xlane.f32.xlu0 %v902_v51  ;;  %v3460_v52 = vpop.f32.mrf.mxu1 }
 0x246   :  { %v899_v53 = vpop.f32.mrf.mxu1 }
 0x248   :  { %v3461_v54 = vpop.f32.mrf.mxu1 }
 0x24a   :  { %v4053_v55 = vpop.f32.mrf.mxu1 }
 0x24b   :  { %v1012_v59 = vsel %vm239_vm10, %v4053_v55, -inf }
 0x24c   :  { %v3472_v56 = vpop.f32.mrf.mxu1 }
 0x24d   :  { %364 = vrot.lane.b32.xlu1 %v3978_v47, %s4929_s28  ;;  %s4932_s28 = smov 36  }
 0x24e   :  { %v1009_v57 = vpop.f32.mrf.mxu1 }
 0x250   :  { %v3473_v58 = vpop.f32.mrf.mxu1 }
 0x25a   :  { %252 = vrot.lane.b32.xlu0 %v3978_v47, %s4928_s29  ;;  %s4933_s29 = smov 40  }
 0x271   :  { %1013 = vmax.xlane.f32.xlu1 %v1012_v59 }
 0x282   :  { %474 = vrot.lane.b32.xlu1 %v3978_v47, %s4926_s27  ;;  %s4927_s27 = smov 52  }
 0x29d   :  { %v242_v60 = vpop.xlane.xlu1 %241 }
 0x29e   :  { %v243_v61 = vsub.f32 %v233_v19, %v242_v60 }
 0x2a0   :  { %v244_v62 = vmul.f32 1.442695, %v243_v61 }
 0x2a2   :  { %3675 = vpow2.f32 %v244_v62 }
 0x2a5   :  { %v354_v63 = vpop.xlane.xlu0 %353 }
 0x2a6   :  { %v355_v0 = vsub.f32 %v346_v24, %v354_v63 }
 0x2a8   :  { %v356_v2 = vmul.f32 1.442695, %v355_v0 }
 0x2aa   :  { %3677 = vpow2.f32 %v356_v2 }
 0x2ad   :  { %v464_v9 = vpop.xlane.xlu0 %463 }
 0x2ae   :  { %v465_v10 = vsub.f32 %v456_v29, %v464_v9 }
 0x2af   :  { %v4063_v11 = vpop.eup %3675 }
 0x2b0   :  { %v466_v14 = vmul.f32 1.442695, %v465_v10  ;;  %v246_v15 = vsel %vm239_vm10, %v4063_v11, 0.0 }
 0x2b1   :  { %247 = vadd.xlane.f32.xlu0 %v246_v15 }
 0x2b2   :  { %3679 = vpow2.f32 %v466_v14 }
 0x2b5   :  { %v574_v16 = vpop.xlane.xlu1 %573 }
 0x2b6   :  { %v575_v17 = vsub.f32 %v566_v34, %v574_v16 }
 0x2b7   :  { %v4067_v18 = vpop.eup %3677 }
 0x2b8   :  { %v576_v19 = vmul.f32 1.442695, %v575_v17  ;;  %v358_v20 = vsel %vm239_vm10, %v4067_v18, 0.0 }
 0x2b9   :  { %359 = vadd.xlane.f32.xlu1 %v358_v20 }
 0x2ba   :  { %3681 = vpow2.f32 %v576_v19 }
 0x2bd   :  { %v684_v21 = vpop.xlane.xlu0 %683 }
 0x2be   :  { %v685_v22 = vsub.f32 %v676_v39, %v684_v21 }
 0x2bf   :  { %v4071_v23 = vpop.eup %3679 }
 0x2c0   :  { %v686_v24 = vmul.f32 1.442695, %v685_v22  ;;  %v468_v25 = vsel %vm239_vm10, %v4071_v23, 0.0 }
 0x2c1   :  { %469 = vadd.xlane.f32.xlu0 %v468_v25 }
 0x2c2   :  { %3683 = vpow2.f32 %v686_v24 }
 0x2c5   :  { %v794_v35 = vpop.xlane.xlu1 %793 }
 0x2c6   :  { %v795_v36 = vsub.f32 %v4048_v44, %v794_v35 }
 0x2c7   :  { %v4075_v26 = vpop.eup %3681 }
 0x2c8   :  { %v578_v27 = vsel %vm239_vm10, %v4075_v26, 0.0  ;;  %v796_v39 = vmul.f32 1.442695, %v795_v36 }
 0x2c9   :  { %579 = vadd.xlane.f32.xlu1 %v578_v27  ;;  %v365_v42 = vpop.permute.xlu1 %364 }
 0x2ca   :  { %v370_v56 = vsel %vm4940_vm11, %v365_v42, 0 }
 0x2cd   :  { %v904_v28 = vpop.xlane.xlu0 %903 }
 0x2ce   :  { %v905_v29 = vsub.f32 %v896_v50, %v904_v28 }
 0x2cf   :  { %v4079_v30 = vpop.eup %3683 }
 0x2d0   :  { %v906_v31 = vmul.f32 1.442695, %v905_v29  ;;  %v688_v32 = vsel %vm239_vm10, %v4079_v30, 0.0 }
 0x2d1   :  { %v253_v33 = vpop.permute.xlu0 %252  ;;  %689 = vadd.xlane.f32.xlu1 %v688_v32 }
 0x2d2   :  { %3685 = vpow2.f32 %v906_v31  ;;  %v259_v34 = vsel %vm4940_vm11, %v253_v33, 0 }
 0x2d3   :  { %3391 = vmatpush3.bf16.msra.mxu0 %v259_v34  ;;  %3687 = vpow2.f32 %v796_v39 }
 0x2d4   :  { %3402 = vmatprep.subr.bf16.mxu0 %v3790_v1 }
 0x2d7   :  { %584 = vrot.lane.b32.xlu0 %v3978_v47, %s4927_s27  ;;  %s4934_s27 = smov 44  }
 0x2df   :  { %v4088_v37 = vpop.eup %3685 }
 0x2e0   :  { %v908_v38 = vsel %vm239_vm10, %v4088_v37, 0.0  ;;  %v4092_v40 = vpop.eup %3687 }
 0x2e1   :  { %909 = vadd.xlane.f32.xlu1 %v908_v38  ;;  %v798_v41 = vsel %vm239_vm10, %v4092_v40, 0.0 }
 0x2f6   :  { %799 = vadd.xlane.f32.xlu0 %v798_v41 }
 0x2fa   :  { %v1014_v43 = vpop.xlane.xlu1 %1013 }
 0x2fb   :  { %v1015_v45 = vsub.f32 %v4053_v55, %v1014_v43 }
 0x2fd   :  { %v1016_v46 = vmul.f32 1.442695, %v1015_v45 }
 0x2fe   :  { %v475_v50 = vpop.permute.xlu1 %474 }
 0x2ff   :  { %3689 = vpow2.f32 %v1016_v46  ;;  %v480_v60 = vsel %vm4940_vm11, %v475_v50, 0 }
 0x30c   :  { %v4097_v44 = vpop.eup %3689  ;;  %804 = vrot.lane.b32.xlu0 %v3978_v47, %s4934_s27  ;;  %s4944_s27 = smov 16  }
 0x30d   :  { %v1018_v48 = vsel %vm239_vm10, %v4097_v44, 0.0 }
 0x30e   :  { %1019 = vadd.xlane.f32.xlu1 %v1018_v48 }
 0x310   :  { %914 = vrot.lane.b32.xlu0 %v3978_v47, %s4933_s29  ;;  %s4937_s29 = smov 12  }
 0x314   :  { %1024 = vrot.lane.b32.xlu0 %v3978_v47, %s4932_s28  ;;  %s4938_s28 = smov 8  }
 0x31f   :  { %694 = vrot.lane.b32.xlu1 %v3978_v47, %s4931_s25  ;;  %s4935_s25 = smov 4  }
 0x33a   :  { %v248_v49 = vpop.xlane.xlu0 %247 }
 0x33b   :  { %3691 = vrcp.f32 %v248_v49 }
 0x342   :  { %v360_v51 = vpop.xlane.xlu1 %359 }
 0x343   :  { %3693 = vrcp.f32 %v360_v51 }
 0x348   :  { %v3692_v52 = vpop.eup %3691 }
 0x349   :  { %v250_v53 = vmul.f32 %v3692_v52, %v4063_v11 }
 0x34a   :  { %v470_v54 = vpop.xlane.xlu0 %469 }
 0x34b   :  { %3695 = vrcp.f32 %v470_v54  ;;  %v251_v55 = vpack.c.bf16 %v250_v53, %v250_v53 }
 0x34d   :  { %3393 = vmatmul.mubr.msk.bf16.vlgmr.msra.gmra.mxu0 %vm239_vm10, %v251_v55 }
 0x34e   :  { %3403 = vmatpush3.bf16.msra.mxu0 %v370_v56  ;;  %3404 = vmatprep.mubr.msk.bf16.mxu0 %vm3791_vm0, %v3790_v1  ;;  %v585_v63 = vpop.permute.xlu0 %584 }
 0x34f   :  { %3414 = vmatprep.subr.bf16.mxu0 %v3790_v1  ;;  %v590_v2 = vsel %vm4940_vm11, %v585_v63, 0 }
 0x350   :  { %v3694_v47 = vpop.eup %3693 }
 0x351   :  { %v362_v57 = vmul.f32 %v3694_v47, %v4067_v18 }
 0x352   :  { %v580_v58 = vpop.xlane.xlu1 %579 }
 0x353   :  { %3697 = vrcp.f32 %v580_v58  ;;  %v363_v59 = vpack.c.bf16 %v362_v57, %v362_v57  ;;  %v4162_v57 = vld [vmem:[%s4914_s3 + $0x8] sm:$0xff]  }
 0x354   :  { %3481 = vmatpush3.bf16.msra.mxu1 %v4162_v57 }
 0x355   :  { %3405 = vmatmul.mubr.msk.bf16.vlgmr.msra.gmra.mxu0 %vm239_vm10, %v363_v59  ;;  %3482 = vmatprep.subr.bf16.mxu1 %v3790_v1 }
 0x356   :  { %3415 = vmatpush3.bf16.msra.mxu0 %v480_v60  ;;  %3416 = vmatprep.mubr.msk.bf16.mxu0 %vm3791_vm0, %v3790_v1 }
 0x357   :  { %3426 = vmatprep.subr.bf16.mxu0 %v3790_v1 }
 0x358   :  { %v3696_v61 = vpop.eup %3695 }
 0x359   :  { %v472_v62 = vmul.f32 %v3696_v61, %v4071_v23  ;;  %v4170_v61 = vld [vmem:[%s4914_s3] sm:$0xff]   ;;  %s4969_s3 = smov 24  }
 0x35a   :  { %v690_v14 = vpop.xlane.xlu1 %689  ;;  %3483 = vmatpush3.bf16.msra.mxu1 %v4170_v61 }
 0x35b   :  { %v473_v0 = vpack.c.bf16 %v472_v62, %v472_v62  ;;  %3699 = vrcp.f32 %v690_v14  ;;  %3496 = vmatprep.subr.bf16.mxu1 %v3790_v1 }
 0x35d   :  { %3417 = vmatmul.mubr.msk.bf16.vlgmr.msra.gmra.mxu0 %vm239_vm10, %v473_v0 }
 0x35e   :  { %3427 = vmatpush3.bf16.msra.mxu0 %v590_v2  ;;  %3428 = vmatprep.mubr.msk.bf16.mxu0 %vm3791_vm0, %v3790_v1 }
 0x35f   :  { %3438 = vmatprep.subr.bf16.mxu0 %v3790_v1 }
 0x360   :  { %v3698_v9 = vpop.eup %3697 }
 0x361   :  { %v582_v10 = vmul.f32 %v3698_v9, %v4075_v26 }
 0x363   :  { %v583_v11 = vpack.c.bf16 %v582_v10, %v582_v10 }
 0x365   :  { %3429 = vmatmul.mubr.msk.bf16.vlgmr.msra.gmra.mxu0 %vm239_vm10, %v583_v11 }
 0x366   :  { %3440 = vmatprep.mubr.msk.bf16.mxu0 %vm3791_vm0, %v3790_v1 }
 0x368   :  { %v3700_v17 = vpop.eup %3699 }
 0x369   :  { %v692_v19 = vmul.f32 %v3700_v17, %v4079_v30 }
 0x36a   :  { %v910_v16 = vpop.xlane.xlu1 %909 }
 0x36b   :  { %v693_v23 = vpack.c.bf16 %v692_v19, %v692_v19 }
 0x37f   :  { %v800_v15 = vpop.xlane.xlu0 %799 }
 0x380   :  { %3701 = vrcp.f32 %v800_v15 }
 0x381   :  { %3703 = vrcp.f32 %v910_v16 }
 0x383   :  { %v805_v22 = vpop.permute.xlu0 %804 }
 0x384   :  { %v810_v25 = vsel %vm4940_vm11, %v805_v22, 0 }
 0x387   :  { %v915_v27 = vpop.permute.xlu0 %914 }
 0x388   :  { %v920_v30 = vsel %vm4940_vm11, %v915_v27, 0 }
 0x38b   :  { %v1025_v32 = vpop.permute.xlu0 %1024 }
 0x38c   :  { %v1030_v35 = vsel %vm4940_vm11, %v1025_v32, 0  ;;  %v3252_v32 = vld [vmem:[%s4915_s4] ss:$0 sm:$0xff] }
 0x38d   :  { %v3702_v24 = vpop.eup %3701 }
 0x38e   :  { %v802_v26 = vmul.f32 %v3702_v24, %v4092_v40  ;;  %v3704_v29 = vpop.eup %3703 }
 0x38f   :  { %v912_v31 = vmul.f32 %v3704_v29, %v4088_v37 }
 0x390   :  { %v803_v28 = vpack.c.bf16 %v802_v26, %v802_v26 }
 0x391   :  { %v913_v33 = vpack.c.bf16 %v912_v31, %v912_v31 }
 0x397   :  { %v1020_v18 = vpop.xlane.xlu1 %1019 }
 0x398   :  { %3705 = vrcp.f32 %v1020_v18 }
 0x39b   :  { %v695_v20 = vpop.permute.xlu1 %694 }
 0x39c   :  { %v700_v21 = vsel %vm4940_vm11, %v695_v20, 0  ;;  %vm1110_vm11 = vcmask 228352  }
 0x39d   :  { %3439 = vmatpush3.bf16.msra.mxu0 %v700_v21 }
 0x39e   :  { %3450 = vmatprep.subr.bf16.mxu0 %v3790_v1 }
 0x3a0   :  { %3441 = vmatmul.mubr.msk.bf16.vlgmr.msra.gmra.mxu0 %vm239_vm10, %v693_v23 }
 0x3a1   :  { %3451 = vmatpush3.bf16.msra.mxu0 %v810_v25  ;;  %3452 = vmatprep.mubr.msk.bf16.mxu0 %vm3791_vm0, %v3790_v1 }
 0x3a2   :  { %3462 = vmatprep.subr.bf16.mxu0 %v3790_v1 }
 0x3a5   :  { %v3706_v34 = vpop.eup %3705 }
 0x3a6   :  { %v1022_v36 = vmul.f32 %v3706_v34, %v4097_v44 }
 0x3a8   :  { %3453 = vmatmul.mubr.msk.bf16.vlgmr.msra.gmra.mxu0 %vm239_vm10, %v803_v28  ;;  %v1023_v38 = vpack.c.bf16 %v1022_v36, %v1022_v36 }
 0x3a9   :  { %3463 = vmatpush3.bf16.msra.mxu0 %v920_v30  ;;  %3464 = vmatprep.mubr.msk.bf16.mxu0 %vm3791_vm0, %v3790_v1 }
 0x3aa   :  { %3474 = vmatprep.subr.bf16.mxu0 %v3790_v1 }
 0x3b0   :  { %3465 = vmatmul.mubr.msk.bf16.vlgmr.msra.gmra.mxu0 %vm239_vm10, %v913_v33 }
 0x3b1   :  { %3475 = vmatpush3.bf16.msra.mxu0 %v1030_v35  ;;  %3476 = vmatprep.mubr.msk.bf16.mxu0 %vm3791_vm0, %v3790_v1 }
 0x3b2   :  { %3488 = vmatprep.subr.bf16.mxu0 %v3790_v1 }
 0x3b8   :  { %3477 = vmatmul.mubr.msk.bf16.vlgmr.msra.gmra.mxu0 %vm239_vm10, %v1023_v38 }
 0x3b9   :  { %3492 = vmatprep.mubr.msk.bf16.mxu0 %vm3791_vm0, %v3790_v1 }
 0x40d   :  { %v295_v37 = vpop.f32.mrf.mxu0 }
 0x40f   :  { %v3394_v39 = vpop.f32.mrf.mxu0 }
 0x411   :  { %v298_v40 = vpop.f32.mrf.mxu0 }
 0x413   :  { %v3395_v41 = vpop.f32.mrf.mxu0 }
 0x415   :  { %v406_v42 = vpop.f32.mrf.mxu0 }
 0x416   :  { %1073 = vrot.lane.b32.xlu1 %v406_v42, %s4935_s25  ;;  %s4942_s25 = smov 24  }
 0x417   :  { %v3406_v43 = vpop.f32.mrf.mxu0 }
 0x419   :  { %v409_v45 = vpop.f32.mrf.mxu0 }
 0x41b   :  { %v3407_v46 = vpop.f32.mrf.mxu0 }
 0x41d   :  { %v516_v44 = vpop.f32.mrf.mxu0 }
 0x41e   :  { %1077 = vrot.lane.b32.xlu0 %v516_v44, %s4938_s28  ;;  %s4968_s28 = smov 20  }
 0x41f   :  { %v3418_v48 = vpop.f32.mrf.mxu0 }
 0x421   :  { %v519_v49 = vpop.f32.mrf.mxu0 }
 0x423   :  { %v3419_v50 = vpop.f32.mrf.mxu0 }
 0x425   :  { %v626_v51 = vpop.f32.mrf.mxu0 }
 0x426   :  { %1081 = vrot.lane.b32.xlu1 %v626_v51, %s4937_s29  ;;  %s4943_s29 = smov 20  }
 0x427   :  { %v3430_v52 = vpop.f32.mrf.mxu0 }
 0x429   :  { %v629_v53 = vpop.f32.mrf.mxu0 }
 0x42b   :  { %v3431_v54 = vpop.f32.mrf.mxu0 }
 0x460   :  { %v736_v55 = vpop.f32.mrf.mxu0 }
 0x461   :  { %1085 = vrot.lane.b32.xlu0 %v736_v55, %s4944_s27 }
 0x462   :  { %v3442_v56 = vpop.f32.mrf.mxu0 }
 0x464   :  { %v739_v47 = vpop.f32.mrf.mxu0 }
 0x466   :  { %v3443_v58 = vpop.f32.mrf.mxu0 }
 0x468   :  { %v846_v59 = vpop.f32.mrf.mxu0 }
 0x469   :  { %1089 = vrot.lane.b32.xlu1 %v846_v59, %s4943_s29  ;;  %s4966_s29 = smov 12  }
 0x46a   :  { %v3454_v60 = vpop.f32.mrf.mxu0 }
 0x46c   :  { %v849_v62 = vpop.f32.mrf.mxu0 }
 0x46e   :  { %v3455_v63 = vpop.f32.mrf.mxu0 }
 0x470   :  { %v956_v0 = vpop.f32.mrf.mxu0 }
 0x471   :  { %1093 = vrot.lane.b32.xlu0 %v956_v0, %s4942_s25  ;;  %s4967_s25 = smov 16  }
 0x472   :  { %v3466_v2 = vpop.f32.mrf.mxu0 }
 0x474   :  { %v959_v9 = vpop.f32.mrf.mxu0 }
 0x476   :  { %v3467_v10 = vpop.f32.mrf.mxu0 }
 0x478   :  { %v1066_v11 = vpop.f32.mrf.mxu0 }
 0x479   :  { %1097 = vrot.lane.b32.xlu1 %v1066_v11, %s4941_s26  ;;  %s4964_s26 = smov 4  }
 0x47a   :  { %v3478_v14 = vpop.f32.mrf.mxu0 }
 0x47c   :  { %v1069_v15 = vpop.f32.mrf.mxu0 }
 0x47e   :  { %v3479_v16 = vpop.f32.mrf.mxu0 }
 0x488   :  { %v1074_v17 = vpop.permute.xlu1 %1073 }
 0x489   :  { %v1100_v21 = vsel %vm192_vm9, %v295_v37, %v1074_v17 }
 0x490   :  { %v1078_v18 = vpop.permute.xlu0 %1077 }
 0x491   :  { %v1101_v22 = vsel %vm239_vm10, %v1100_v21, %v1078_v18 }
 0x498   :  { %v1082_v19 = vpop.permute.xlu1 %1081 }
 0x499   :  { %v1103_v24 = vsel %vm1102_vm12, %v1101_v22, %v1082_v19 }
 0x4d3   :  { %v1086_v20 = vpop.permute.xlu0 %1085 }
 0x4d4   :  { %v1105_v26 = vsel %vm1104_vm13, %v1103_v24, %v1086_v20 }
 0x4db   :  { %v1090_v23 = vpop.permute.xlu1 %1089 }
 0x4dc   :  { %v1107_v27 = vsel %vm1106_vm14, %v1105_v26, %v1090_v23 }
 0x4e3   :  { %v1094_v25 = vpop.permute.xlu0 %1093 }
 0x4e4   :  { %v1109_v28 = vsel %vm1108_vm15, %v1107_v27, %v1094_v25 }
 0x4eb   :  { %v1098_v29 = vpop.permute.xlu1 %1097 }
 0x4ec   :  { %v1111_v30 = vsel %vm1110_vm11, %v1109_v28, %v1098_v29 }
 0x4ed   :  { %v1112_v31 = vpack.c.bf16 %v1111_v30, %v1111_v30 }
 0x4ef   :  { %3485 = vmatmul.mubr.msk.bf16.vlgmr.msra.gmra.mxu1 %vm142_vm8, %v1112_v31 }
 0x4f0   :  { %3500 = vmatprep.mubr.msk.bf16.mxu1 %vm3791_vm0, %v3790_v1 }
 0x5af   :  { %v1168_v33 = vpop.f32.mrf.mxu1 }
 0x5b0   :  { %v1169_v34 = vadd.f32 %v3252_v32, %v1168_v33 }
 0x5b1   :  { %v3486_v35 = vpop.f32.mrf.mxu1 }
 0x5b2   :  { %v1175_v36 = vrot.slane %v1169_v34, 1  ;;  %v1176_v38 = vrot.slane %v1169_v34, 2  ;;  %v1177_v37 = vrot.slane %v1169_v34, 3  ;;  %v1178_v39 = vrot.slane %v1169_v34, 4 }
 0x5b3   :  { %v1171_v40 = vpop.f32.mrf.mxu1  ;;  %v1179_v41 = vrot.slane %v1169_v34, 5  ;;  %v1180_v42 = vrot.slane %v1169_v34, 6  ;;  %v1181_v43 = vrot.slane %v1169_v34, 7  ;;  %v1190_v50 = vadd.f32 %v1169_v34, %v3908_v3 }
 0x5b4   :  { %v1191_v45 = vadd.f32 %v1175_v36, %v3913_v4  ;;  %v1192_v46 = vadd.f32 %v1176_v38, %v3918_v5  ;;  %v1193_v44 = vadd.f32 %v1177_v37, %v3924_v6  ;;  %v1194_v49 = vadd.f32 %v1178_v39, %v3929_v7 }
 0x5b5   :  { %v3487_v48 = vpop.f32.mrf.mxu1  ;;  %v1195_v51 = vadd.f32 %v1179_v41, %v3934_v8  ;;  %v1196_v54 = vadd.f32 %v1180_v42, %v3947_v12  ;;  %v1197_v55 = vadd.f32 %v1181_v43, %v3952_v13 }
 0x5b6   :  { %v1206_v52 = vrot.slane %v1191_v45, 7  ;;  %v1208_v53 = vrot.slane %v1192_v46, 6  ;;  %v1210_v4 = vrot.slane %v1193_v44, 5  ;;  %v1212_v47 = vrot.slane %v1194_v49, 4  ;;  %v4248_v48 = vld [vmem:[%s4918_s7 + $0x8] sm:$0xff]  }
 0x5b7   :  { %v1214_v58 = vrot.slane %v1195_v51, 3  ;;  %v1216_v3 = vrot.slane %v1196_v54, 2  ;;  %v1218_v59 = vrot.slane %v1197_v55, 1  ;;  %3489 = vmatpush3.bf16.msra.mxu0 %v4248_v48 }
 0x5b8   :  { %v1207_v56 = vsel %vm109_vm1, %v1206_v52, %v1190_v50  ;;  %3490 = vmatprep.subr.bf16.mxu0 %v3790_v1 }
 0x5b9   :  { %v1209_v5 = vsel %vm112_vm2, %v1208_v53, %v1207_v56  ;;  %v1700_v56 = vld [vmem:[%s4911_s0 + $0x1] sm:$0x1] }
 0x5ba   :  { %v1211_v6 = vsel %vm115_vm3, %v1210_v4, %v1209_v5  ;;  %v1703_v5 = vld [vmem:[%s4911_s0 + $0x7] sm:$0x1] }
 0x5bb   :  { %v1213_v7 = vsel %vm118_vm4, %v1212_v47, %v1211_v6  ;;  %v1708_v47 = vpack.c.bf16 %v1700_v56, %v1700_v56  ;;  %v4329_v56 = vld [vmem:[%s4911_s0 + $0xf] sm:$0x1] }
 0x5bc   :  { %v1215_v8 = vsel %vm121_vm5, %v1214_v58, %v1213_v7  ;;  %v1711_v58 = vpack.c.bf16 %v1703_v5, %v1703_v5 }
 0x5bd   :  { %v1217_v60 = vsel %vm4946_vm6, %v1216_v3, %v1215_v8  ;;  %v1704_v3 = vld [vmem:[%s4911_s0 + $0x9] sm:$0x1]  ;;  %v1724_v8 = vunpack.c.l.b16 %v1708_v47 }
 0x5be   :  { %v1219_v12 = vsel %vm4945_vm7, %v1218_v59, %v1217_v60  ;;  %v1712_v60 = vpack.c.bf16 %v1704_v3, %v1704_v3 }
 0x5bf   :  { %v1221_v13 = vsel %vm142_vm8, %v1219_v12, 0.0  ;;  %v1727_v12 = vunpack.c.l.b16 %v1711_v58 }
 0x5c0   :  { %1222 = vadd.xlane.f32.xlu0 %v1221_v13 }
 0x649   :  { %v1223_v62 = vpop.xlane.xlu0 %1222 }
 0x64a   :  { %v1225_v63 = vmul.f32 0.03125, %v1223_v62  ;;  %v1705_v62 = vld [vmem:[%s4911_s0 + $0xb] sm:$0x1] }
 0x64c   :  { %v1227_v0 = vrot.slane %v1225_v63, 1  ;;  %v1228_v2 = vrot.slane %v1225_v63, 2  ;;  %v1229_v9 = vrot.slane %v1225_v63, 3  ;;  %v1230_v10 = vrot.slane %v1225_v63, 4 }
 0x64d   :  { %v1231_v11 = vrot.slane %v1225_v63, 5  ;;  %v1232_v14 = vrot.slane %v1225_v63, 6  ;;  %v1233_v15 = vrot.slane %v1225_v63, 7  ;;  %v4205_v16 = vsub.f32 %v1190_v50, %v1225_v63 }
 0x64e   :  { %v4207_v17 = vsub.f32 %v1191_v45, %v1227_v0  ;;  %v4209_v18 = vsub.f32 %v1192_v46, %v1228_v2  ;;  %v4211_v19 = vsub.f32 %v1193_v44, %v1229_v9  ;;  %v4213_v20 = vsub.f32 %v1194_v49, %v1230_v10  ;;  %v4254_v49 = vld [vmem:[%s4918_s7] sm:$0xff]  }
 0x64f   :  { %v4215_v21 = vsub.f32 %v1195_v51, %v1231_v11  ;;  %v4217_v22 = vsub.f32 %v1196_v54, %v1232_v14  ;;  %v4219_v23 = vsub.f32 %v1197_v55, %v1233_v15  ;;  %v1250_v28 = vmul.f32 %v4205_v16, %v4205_v16  ;;  %3491 = vmatpush3.bf16.msra.mxu0 %v4254_v49  ;;  %v1701_v51 = vld [vmem:[%s4911_s0 + $0x3] sm:$0x1]  ;;  %v1702_v54 = vld [vmem:[%s4911_s0 + $0x5] sm:$0x1]  ;;  %v3256_v14 = vld [vmem:[%s4916_s5] ss:$0 sm:$0xff] }
 0x650   :  { %v1251_v24 = vmul.f32 %v4207_v17, %v4207_v17  ;;  %v1252_v25 = vmul.f32 %v4209_v18, %v4209_v18  ;;  %v1253_v26 = vmul.f32 %v4211_v19, %v4211_v19  ;;  %v1254_v27 = vmul.f32 %v4213_v20, %v4213_v20  ;;  %3504 = vmatprep.subr.bf16.mxu0 %v3790_v1 }
 0x651   :  { %v1255_v29 = vmul.f32 %v4215_v21, %v4215_v21  ;;  %v1256_v32 = vmul.f32 %v4217_v22, %v4217_v22  ;;  %v1257_v33 = vmul.f32 %v4219_v23, %v4219_v23  ;;  %v1709_v55 = vpack.c.bf16 %v1701_v51, %v1701_v51 }
 0x652   :  { %v1266_v30 = vrot.slane %v1251_v24, 7  ;;  %v1268_v31 = vrot.slane %v1252_v25, 6  ;;  %v1270_v35 = vrot.slane %v1253_v26, 5  ;;  %v1272_v38 = vrot.slane %v1254_v27, 4 }
 0x653   :  { %v1274_v39 = vrot.slane %v1255_v29, 3  ;;  %v1276_v41 = vrot.slane %v1256_v32, 2  ;;  %v1278_v43 = vrot.slane %v1257_v33, 1  ;;  %v1710_v4 = vpack.c.bf16 %v1702_v54, %v1702_v54 }
 0x654   :  { %v1267_v34 = vsel %vm109_vm1, %v1266_v30, %v1250_v28  ;;  %v1725_v6 = vunpack.c.l.b16 %v1709_v55  ;;  %v1713_v2 = vpack.c.bf16 %v1705_v62, %v1705_v62  ;;  %v4278_v9 = vunpack.c.l.b16 %v1712_v60 }
 0x655   :  { %v1269_v36 = vsel %vm112_vm2, %v1268_v31, %v1267_v34  ;;  %v1726_v7 = vunpack.c.l.b16 %v1710_v4  ;;  %v1736_v11 = vrot.slane %v1727_v12, 5  ;;  %v3257_v31 = vld [vmem:[%s4917_s6] ss:$0 sm:$0xff]  ;;  %v1715_v60 = vpack.c.bf16 %v4329_v56, %v4329_v56 }
 0x656   :  { %v1271_v37 = vsel %vm115_vm3, %v1270_v35, %v1269_v36  ;;  %v1732_v59 = vrot.slane %v1725_v6, 7  ;;  %v1729_v6 = vunpack.c.l.b16 %v1713_v2 }
 0x657   :  { %v1273_v40 = vsel %vm118_vm4, %v1272_v38, %v1271_v37  ;;  %v1734_v13 = vrot.slane %v1726_v7, 6 }
 0x658   :  { %v1275_v42 = vsel %vm121_vm5, %v1274_v39, %v1273_v40  ;;  %v1733_v63 = vsel %vm109_vm1, %v1732_v59, %v1724_v8 }
 0x659   :  { %v1277_v45 = vsel %vm4946_vm6, %v1276_v41, %v1275_v42  ;;  %v1735_v10 = vsel %vm112_vm2, %v1734_v13, %v1733_v63  ;;  %v1738_v13 = vrot.slane %v4278_v9, 4  ;;  %v1731_v9 = vunpack.c.l.b16 %v1715_v60 }
 0x65a   :  { %v1279_v46 = vsel %vm4945_vm7, %v1278_v43, %v1277_v45  ;;  %v1737_v12 = vsel %vm115_vm3, %v1736_v11, %v1735_v10 }
 0x65b   :  { %v1281_v44 = vsel %vm142_vm8, %v1279_v46, 0.0 }
 0x65c   :  { %1282 = vadd.xlane.f32.xlu1 %v1281_v44 }
 0x6e5   :  { %v1283_v50 = vpop.xlane.xlu1 %1282 }
 0x6e6   :  { %v1284_v52 = vmul.f32 0.03125, %v1283_v50 }
 0x6e8   :  { %v1285_v53 = vadd.f32 1e-05, %v1284_v52 }
 0x6ea   :  { %3707 = vrsqrt.f32 %v1285_v53 }
 0x6f7   :  { %v3708_v0 = vpop.eup %3707 }
 0x6f8   :  { %v1288_v15 = vrot.slane %v3708_v0, 1  ;;  %v1289_v24 = vrot.slane %v3708_v0, 2  ;;  %v1290_v25 = vrot.slane %v3708_v0, 3  ;;  %v1291_v26 = vrot.slane %v3708_v0, 4 }
 0x6f9   :  { %v1292_v27 = vrot.slane %v3708_v0, 5  ;;  %v1293_v28 = vrot.slane %v3708_v0, 6  ;;  %v1294_v29 = vrot.slane %v3708_v0, 7  ;;  %v1303_v30 = vmul.f32 %v3708_v0, %v4205_v16 }
 0x6fa   :  { %v1304_v32 = vmul.f32 %v1288_v15, %v4207_v17  ;;  %v1305_v33 = vmul.f32 %v1289_v24, %v4209_v18  ;;  %v1306_v34 = vmul.f32 %v1290_v25, %v4211_v19  ;;  %v1307_v35 = vmul.f32 %v1291_v26, %v4213_v20 }
 0x6fb   :  { %v1308_v36 = vmul.f32 %v1292_v27, %v4215_v21  ;;  %v1309_v38 = vmul.f32 %v1293_v28, %v4217_v22  ;;  %v1310_v37 = vmul.f32 %v1294_v29, %v4219_v23  ;;  %v1317_v39 = vmul.f32 %v3256_v14, %v1303_v30  ;;  %v4308_v22 = vld [vmem:[%s4911_s0 + $0xd] sm:$0x1] }
 0x6fc   :  { %v1318_v16 = vmul.f32 %v3256_v14, %v1304_v32  ;;  %v1319_v40 = vmul.f32 %v3256_v14, %v1305_v33  ;;  %v1320_v41 = vmul.f32 %v3256_v14, %v1306_v34  ;;  %v1321_v42 = vmul.f32 %v3256_v14, %v1307_v35 }
 0x6fd   :  { %v1322_v43 = vmul.f32 %v3256_v14, %v1308_v36  ;;  %v1323_v45 = vmul.f32 %v3256_v14, %v1309_v38  ;;  %v1324_v17 = vmul.f32 %v3256_v14, %v1310_v37  ;;  %v4295_v46 = vadd.f32 %v3257_v31, %v1317_v39 }
 0x6fe   :  { %v4297_v18 = vadd.f32 %v3257_v31, %v1318_v16  ;;  %v4299_v19 = vadd.f32 %v3257_v31, %v1319_v40  ;;  %v4301_v20 = vadd.f32 %v3257_v31, %v1320_v41  ;;  %v4303_v21 = vadd.f32 %v3257_v31, %v1321_v42  ;;  %v3755_v41 = vld [vmem:[%s4912_s1 + $0x8] sm:$0xff]  }
 0x6ff   :  { %v4310_v23 = vadd.f32 %v3257_v31, %v1322_v43  ;;  %v4312_v44 = vadd.f32 %v3257_v31, %v1323_v45  ;;  %v4314_v50 = vadd.f32 %v3257_v31, %v1324_v17  ;;  %v1339_v51 = vpack.c.bf16 %v4295_v46, %v4295_v46  ;;  %v3756_v45 = vld [vmem:[%s4912_s1] sm:$0xff]   ;;  %v4371_v17 = vld [vmem:[%s4920_s9 + $0x8] sm:$0xff]   ;;  %s4970_s1 = smov 28  }
 0x700   :  { %v1340_v52 = vpack.c.bf16 %v4297_v18, %v4297_v18  ;;  %v1341_v53 = vpack.c.bf16 %v4299_v19, %v4299_v19  ;;  %v1342_v54 = vpack.c.bf16 %v4301_v20, %v4301_v20  ;;  %v1343_v55 = vpack.c.bf16 %v4303_v21, %v4303_v21  ;;  %3497 = vmatpush3.bf16.msra.mxu1 %v4371_v17 }
 0x701   :  { %v1344_v4 = vpack.c.bf16 %v4310_v23, %v4310_v23  ;;  %v1345_v5 = vpack.c.bf16 %v4312_v44, %v4312_v44  ;;  %v1714_v47 = vpack.c.bf16 %v4308_v22, %v4308_v22  ;;  %v1346_v58 = vpack.c.bf16 %v4314_v50, %v4314_v50  ;;  %3498 = vmatprep.subr.bf16.mxu1 %v3790_v1 }
 0x702   :  { %v1362_v7 = vunpack.c.l.b16 %v1340_v52  ;;  %v1363_v3 = vunpack.c.l.b16 %v1341_v53  ;;  %v1364_v8 = vunpack.c.l.b16 %v1342_v54  ;;  %v1365_v59 = vunpack.c.l.b16 %v1343_v55  ;;  %v3258_v52 = vld [vmem:[%s4919_s8] ss:$0 sm:$0xff] }
 0x703   :  { %v1361_v62 = vunpack.c.l.b16 %v1339_v51  ;;  %v1366_v63 = vunpack.c.l.b16 %v1344_v4  ;;  %v1367_v15 = vunpack.c.l.b16 %v1345_v5  ;;  %v1730_v2 = vunpack.c.l.b16 %v1714_v47  ;;  %v4378_v51 = vld [vmem:[%s4920_s9] sm:$0xff]  }
 0x704   :  { %v1369_v0 = vrot.slane %v1362_v7, 7  ;;  %v1371_v14 = vrot.slane %v1363_v3, 6  ;;  %v1368_v24 = vunpack.c.l.b16 %v1346_v58  ;;  %v1373_v26 = vrot.slane %v1364_v8, 5  ;;  %3499 = vmatpush3.bf16.msra.mxu1 %v4378_v51  ;;  %v3757_v8 = vld [vmem:[%s4913_s2] ss:$0 sm:$0xff]  ;;  %s4947_s2 = smov 108  }
 0x705   :  { %v1740_v27 = vrot.slane %v1729_v6, 3  ;;  %v1375_v29 = vrot.slane %v1365_v59, 4  ;;  %v1739_v30 = vsel %vm118_vm4, %v1738_v13, %v1737_v12  ;;  %v1377_v11 = vrot.slane %v1366_v63, 3  ;;  %3512 = vmatprep.subr.bf16.mxu1 %v3790_v1 }
 0x706   :  { %v1370_v25 = vsel %vm109_vm1, %v1369_v0, %v1361_v62  ;;  %v1379_v32 = vrot.slane %v1367_v15, 2  ;;  %v1742_v33 = vrot.slane %v1730_v2, 2  ;;  %v1381_v35 = vrot.slane %v1368_v24, 1 }
 0x707   :  { %v1372_v28 = vsel %vm112_vm2, %v1371_v14, %v1370_v25  ;;  %v1741_v36 = vsel %vm121_vm5, %v1740_v27, %v1739_v30  ;;  %v1744_v39 = vrot.slane %v1731_v9, 1 }
 0x708   :  { %v1374_v10 = vsel %vm115_vm3, %v1373_v26, %v1372_v28  ;;  %v1743_v40 = vsel %vm4946_vm6, %v1742_v33, %v1741_v36 }
 0x709   :  { %v1376_v31 = vsel %vm118_vm4, %v1375_v29, %v1374_v10  ;;  %v1745_v42 = vsel %vm4945_vm7, %v1744_v39, %v1743_v40 }
 0x70a   :  { %v1378_v34 = vsel %vm121_vm5, %v1377_v11, %v1376_v31  ;;  %v1746_v43 = vpack.c.b16 %v1745_v42, %v1745_v42 }
 0x70b   :  { %v1380_v38 = vsel %vm4946_vm6, %v1379_v32, %v1378_v34 }
 0x70c   :  { %v1382_v37 = vsel %vm4945_vm7, %v1381_v35, %v1380_v38 }
 0x70d   :  { %v1383_v16 = vpack.c.b16 %v1382_v37, %v1382_v37 }
 0x70f   :  { %3493 = vmatmul.mubr.msk.bf16.vlgmr.msra.gmra.mxu0 %vm142_vm8, %v1383_v16 }
 0x710   :  { %3505 = vmatpush3.bf16.msra.mxu0 %v3755_v41  ;;  %3508 = vmatprep.mubr.msk.bf16.mxu0 %vm3791_vm0, %v3790_v1 }
 0x711   :  { %3506 = vmatprep.subr.bf16.mxu0 %v3790_v1 }
 0x714   :  { %3507 = vmatpush3.bf16.msra.mxu0 %v3756_v45 }
 0x715   :  { %3518 = vmatprep.subr.bf16.mxu0 %v3790_v1 }
 0x717   :  { %3509 = vmatmul.mubr.msk.bf16.vlgmr.msra.gmra.mxu0 %vm142_vm8, %v1746_v43 }
 0x718   :  { %3520 = vmatprep.mubr.msk.bf16.mxu0 %vm3791_vm0, %v3790_v1 }
 0x7cf   :  { %v1433_v53 = vpop.f32.mrf.mxu0 }
 0x7d0   :  { %v1434_v54 = vadd.f32 %v3258_v52, %v1433_v53 }
 0x7d1   :  { %v3494_v55 = vpop.f32.mrf.mxu0 }
 0x7d2   :  { %v1440_v4 = vmul.f32 0.70710677, %v1434_v54  ;;  %v1439_v36 = vmul.f32 0.5, %v1434_v54 }
 0x7d3   :  { %v1436_v5 = vpop.f32.mrf.mxu0 }
 0x7d4   :  { %v1441_v47 = vand.u32 2147483647, %v1440_v4  ;;  %vm1460_vm7 = vcmp.ge.f32.partialorder %v1440_v4, 0.0 }
 0x7d5   :  { %v3495_v6 = vpop.f32.mrf.mxu0 }
 0x7d6   :  { %v1442_v58 = vmul.f32 0.3275911, %v1441_v47  ;;  %v1454_v14 = vsub.f32 0.0, %v1441_v47 }
 0x7d7   :  { %v1784_v7 = vpop.f32.mrf.mxu0 }
 0x7d8   :  { %v1443_v3 = vadd.f32 1.0, %v1442_v58  ;;  %v1785_v59 = vadd.f32 %v3757_v8, %v1784_v7  ;;  %v1455_v15 = vmul.f32 %v1454_v14, %v1441_v47 }
 0x7d9   :  { %v3510_v60 = vpop.f32.mrf.mxu0 }
 0x7da   :  { %3709 = vrcp.f32 %v1443_v3  ;;  %v1790_v12 = vmul.f32 0.5, %v1785_v59  ;;  %v4388_v13 = vpack.c.bf16 %v1785_v59, %v1785_v59  ;;  %v1456_v25 = vmul.f32 1.442695, %v1455_v15 }
 0x7db   :  { %v1787_v62 = vpop.f32.mrf.mxu0 }
 0x7dc   :  { %1905 = vrot.lane.b32.xlu1 %v4388_v13, %s3794_s15  ;;  %1794 = vrot.lane.b32.xlu0 %v4388_v13, %s3792_s30  ;;  %v1791_v0 = vpack.c.bf16 %v1790_v12, %v1790_v12  ;;  %3711 = vpow2.f32 %v1456_v25  ;;  %s4948_s30 = smov 68   ;;  %s4950_s15 = smov 100  }
 0x7dd   :  { %v3511_v63 = vpop.f32.mrf.mxu0 }
 0x7e0   :  { %2015 = vrot.lane.b32.xlu1 %v4388_v13, %s3795_s16  ;;  %1903 = vrot.lane.b32.xlu0 %v1791_v0, %s3793_s14  ;;  %s4949_s14 = smov 104   ;;  %s4951_s16 = smov 60  }
 0x7e4   :  { %2125 = vrot.lane.b32.xlu1 %v4388_v13, %s3797_s18  ;;  %2013 = vrot.lane.b32.xlu0 %v1791_v0, %s3796_s17  ;;  %s4952_s17 = smov 64   ;;  %s4953_s18 = smov 56  }
 0x7e7   :  { %v3710_v2 = vpop.eup %3709 }
 0x7e8   :  { %v1445_v24 = vmul.f32 1.0614054, %v3710_v2  ;;  %2235 = vrot.lane.b32.xlu1 %v4388_v13, %s3799_s20  ;;  %2123 = vrot.lane.b32.xlu0 %v1791_v0, %s3798_s19  ;;  %s4955_s19 = smov 52   ;;  %s4956_s20 = smov 44  }
 0x7e9   :  { %v3712_v31 = vpop.eup %3711 }
 0x7ea   :  { %v1446_v26 = vadd.f32 -1.4531521, %v1445_v24 }
 0x7ec   :  { %v1447_v27 = vmul.f32 %v3710_v2, %v1446_v26  ;;  %2345 = vrot.lane.b32.xlu1 %v4388_v13, %s3801_s22  ;;  %2233 = vrot.lane.b32.xlu0 %v1791_v0, %s3800_s21  ;;  %s4957_s21 = smov 40   ;;  %s4958_s22 = smov 36  }
 0x7ee   :  { %v1448_v28 = vadd.f32 1.4214138, %v1447_v27 }
 0x7f0   :  { %v1449_v29 = vmul.f32 %v3710_v2, %v1448_v28  ;;  %2455 = vrot.lane.b32.xlu1 %v4388_v13, %s3803_s24  ;;  %2343 = vrot.lane.b32.xlu0 %v1791_v0, %s4947_s2  ;;  %s4959_s24 = smov 48  }
 0x7f2   :  { %v1450_v30 = vadd.f32 -0.28449672, %v1449_v29 }
 0x7f4   :  { %v1451_v10 = vmul.f32 %v3710_v2, %v1450_v30  ;;  %2565 = vrot.lane.b32.xlu1 %v4388_v13, %s4948_s30  ;;  %2453 = vrot.lane.b32.xlu0 %v1791_v0, %s4949_s14 }
 0x7f6   :  { %v1452_v11 = vadd.f32 0.2548296, %v1451_v10 }
 0x7f8   :  { %v1453_v9 = vmul.f32 %v3710_v2, %v1452_v11  ;;  %2563 = vrot.lane.b32.xlu0 %v1791_v0, %s4950_s15 }
 0x7fa   :  { %v1458_v32 = vmul.f32 %v3712_v31, %v1453_v9 }
 0x7fc   :  { %v1459_v33 = vsub.f32 1.0, %v1458_v32 }
 0x7fe   :  { %v1461_v34 = vsub.f32 0.0, %v1459_v33 }
 0x800   :  { %v1462_v35 = vsel %vm1460_vm7, %v1459_v33, %v1461_v34  ;;  %vm4954_vm7 = vcmask 1043456  }
 0x801   :  { %v1463_v38 = vadd.f32 1.0, %v1462_v35  ;;  %vm4960_vm6 = vmmov %vm4954_vm7 }
 0x803   :  { %v1464_v37 = vmul.f32 %v1463_v38, %v1439_v36 }
 0x805   :  { %v1465_v39 = vpack.c.bf16 %v1464_v37, %v1464_v37 }
 0x807   :  { %3501 = vmatmul.mubr.msk.bf16.vlgmr.msra.gmra.mxu1 %vm142_vm8, %v1465_v39 }
 0x808   :  { %3514 = vmatprep.mubr.msk.bf16.mxu1 %vm3791_vm0, %v3790_v1 }
 0x84e   :  { %v1795_v16 = vpop.permute.xlu0 %1794  ;;  %v1906_v41 = vpop.permute.xlu1 %1905 }
 0x84f   :  { %v1800_v40 = vsel %vm192_vm9, %v1795_v16, 0  ;;  %v1911_v42 = vsel %vm192_vm9, %v1906_v41, 0 }
 0x850   :  { %3513 = vmatpush3.bf16.xpose.msra.mxu1 %v1800_v40 }
 0x851   :  { %3524 = vmatprep.subr.bf16.mxu1 %v3790_v1 }
 0x852   :  { %v2016_v43 = vpop.permute.xlu1 %2015  ;;  %v1904_v45 = vpop.permute.xlu0 %1903 }
 0x853   :  { %v2021_v52 = vsel %vm192_vm9, %v2016_v43, 0 }
 0x856   :  { %v2126_v53 = vpop.permute.xlu1 %2125  ;;  %v2014_v54 = vpop.permute.xlu0 %2013 }
 0x857   :  { %3515 = vmatmul.mubr.msk.bf16.vlgmr.msra.gmra.mxu1 %vm192_vm9, %v1791_v0  ;;  %v2131_v55 = vsel %vm192_vm9, %v2126_v53, 0 }
 0x858   :  { %3525 = vmatpush3.bf16.xpose.msra.mxu1 %v1911_v42  ;;  %3526 = vmatprep.mubr.msk.bf16.mxu1 %vm3791_vm0, %v3790_v1 }
 0x859   :  { %3536 = vmatprep.subr.bf16.mxu1 %v3790_v1 }
 0x85a   :  { %v2236_v4 = vpop.permute.xlu1 %2235  ;;  %v2124_v5 = vpop.permute.xlu0 %2123 }
 0x85b   :  { %v2241_v47 = vsel %vm192_vm9, %v2236_v4, 0 }
 0x85e   :  { %v2346_v6 = vpop.permute.xlu1 %2345  ;;  %v2234_v58 = vpop.permute.xlu0 %2233 }
 0x85f   :  { %3527 = vmatmul.mubr.msk.bf16.vlgmr.msra.gmra.mxu1 %vm192_vm9, %v1904_v45  ;;  %v2351_v7 = vsel %vm192_vm9, %v2346_v6, 0 }
 0x860   :  { %3537 = vmatpush3.bf16.xpose.msra.mxu1 %v2021_v52  ;;  %3538 = vmatprep.mubr.msk.bf16.mxu1 %vm3791_vm0, %v3790_v1 }
 0x861   :  { %3548 = vmatprep.subr.bf16.mxu1 %v3790_v1 }
 0x862   :  { %v2456_v3 = vpop.permute.xlu1 %2455  ;;  %v2344_v8 = vpop.permute.xlu0 %2343 }
 0x863   :  { %v2461_v59 = vsel %vm192_vm9, %v2456_v3, 0 }
 0x866   :  { %v2566_v60 = vpop.permute.xlu1 %2565  ;;  %v2454_v12 = vpop.permute.xlu0 %2453 }
 0x867   :  { %3539 = vmatmul.mubr.msk.bf16.vlgmr.msra.gmra.mxu1 %vm192_vm9, %v2014_v54  ;;  %v2571_v62 = vsel %vm192_vm9, %v2566_v60, 0 }
 0x868   :  { %3549 = vmatpush3.bf16.xpose.msra.mxu1 %v2131_v55  ;;  %3550 = vmatprep.mubr.msk.bf16.mxu1 %vm3791_vm0, %v3790_v1 }
 0x869   :  { %3560 = vmatprep.subr.bf16.mxu1 %v3790_v1 }
 0x86a   :  { %v2564_v63 = vpop.permute.xlu0 %2563 }
 0x86f   :  { %3551 = vmatmul.mubr.msk.bf16.vlgmr.msra.gmra.mxu1 %vm192_vm9, %v2124_v5 }
 0x870   :  { %3561 = vmatpush3.bf16.xpose.msra.mxu1 %v2241_v47  ;;  %3562 = vmatprep.mubr.msk.bf16.mxu1 %vm3791_vm0, %v3790_v1 }
 0x871   :  { %3572 = vmatprep.subr.bf16.mxu1 %v3790_v1 }
 0x877   :  { %3563 = vmatmul.mubr.msk.bf16.vlgmr.msra.gmra.mxu1 %vm192_vm9, %v2234_v58 }
 0x878   :  { %3573 = vmatpush3.bf16.xpose.msra.mxu1 %v2351_v7  ;;  %3574 = vmatprep.mubr.msk.bf16.mxu1 %vm3791_vm0, %v3790_v1 }
 0x879   :  { %3584 = vmatprep.subr.bf16.mxu1 %v3790_v1 }
 0x87f   :  { %3575 = vmatmul.mubr.msk.bf16.vlgmr.msra.gmra.mxu1 %vm192_vm9, %v2344_v8 }
 0x880   :  { %3585 = vmatpush3.bf16.xpose.msra.mxu1 %v2461_v59  ;;  %3586 = vmatprep.mubr.msk.bf16.mxu1 %vm3791_vm0, %v3790_v1 }
 0x881   :  { %3596 = vmatprep.subr.bf16.mxu1 %v3790_v1 }
 0x887   :  { %3587 = vmatmul.mubr.msk.bf16.vlgmr.msra.gmra.mxu1 %vm192_vm9, %v2454_v12 }
 0x888   :  { %3597 = vmatpush3.bf16.xpose.msra.mxu1 %v2571_v62  ;;  %3598 = vmatprep.mubr.msk.bf16.mxu1 %vm3791_vm0, %v3790_v1 }
 0x889   :  { %3608 = vmatprep.subr.bf16.mxu1 %v3790_v1 }
 0x88f   :  { %3599 = vmatmul.mubr.msk.bf16.vlgmr.msra.gmra.mxu1 %vm192_vm9, %v2564_v63 }
 0x890   :  { %3609 = vmatpush3.bf16.msra.mxu1 %v4162_v57  ;;  %3612 = vmatprep.mubr.msk.bf16.mxu1 %vm3791_vm0, %v3790_v1 }
 0x891   :  { %3610 = vmatprep.subr.bf16.mxu1 %v3790_v1 }
 0x894   :  { %3611 = vmatpush3.bf16.msra.mxu1 %v4170_v61 }
 0x895   :  { %3624 = vmatprep.subr.bf16.mxu1 %v3790_v1 }
 0x8c7   :  { %v4460_v0 = vpop.f32.mrf.mxu1 }
 0x8c9   :  { %v3502_v14 = vpop.f32.mrf.mxu1 }
 0x8cb   :  { %v1524_v15 = vpop.f32.mrf.mxu1 }
 0x8cd   :  { %v3503_v2 = vpop.f32.mrf.mxu1 }
 0x917   :  { %v1836_v24 = vpop.f32.mrf.mxu1 }
 0x918   :  { %v1842_v25 = vsel %vm239_vm10, %v1836_v24, -inf }
 0x919   :  { %1843 = vmax.xlane.f32.xlu1 %v1842_v25  ;;  %v3516_v26 = vpop.f32.mrf.mxu1 }
 0x91b   :  { %v1839_v57 = vpop.f32.mrf.mxu1 }
 0x91d   :  { %v3517_v27 = vpop.f32.mrf.mxu1 }
 0x91f   :  { %v1947_v28 = vpop.f32.mrf.mxu1 }
 0x920   :  { %v1953_v29 = vsel %vm239_vm10, %v1947_v28, -inf }
 0x921   :  { %1954 = vmax.xlane.f32.xlu0 %v1953_v29  ;;  %v3528_v30 = vpop.f32.mrf.mxu1 }
 0x923   :  { %v1950_v61 = vpop.f32.mrf.mxu1 }
 0x925   :  { %v3529_v10 = vpop.f32.mrf.mxu1 }
 0x927   :  { %v2057_v11 = vpop.f32.mrf.mxu1 }
 0x928   :  { %v2063_v9 = vsel %vm239_vm10, %v2057_v11, -inf }
 0x929   :  { %2064 = vmax.xlane.f32.xlu0 %v2063_v9  ;;  %v3540_v31 = vpop.f32.mrf.mxu1 }
 0x92b   :  { %v2060_v32 = vpop.f32.mrf.mxu1 }
 0x92d   :  { %v3541_v33 = vpop.f32.mrf.mxu1 }
 0x92f   :  { %v2167_v34 = vpop.f32.mrf.mxu1 }
 0x930   :  { %v2173_v35 = vsel %vm239_vm10, %v2167_v34, -inf }
 0x931   :  { %2174 = vmax.xlane.f32.xlu1 %v2173_v35  ;;  %v3552_v36 = vpop.f32.mrf.mxu1 }
 0x933   :  { %v2170_v38 = vpop.f32.mrf.mxu1 }
 0x935   :  { %v3553_v37 = vpop.f32.mrf.mxu1 }
 0x937   :  { %v2277_v39 = vpop.f32.mrf.mxu1 }
 0x938   :  { %v2283_v16 = vsel %vm239_vm10, %v2277_v39, -inf }
 0x939   :  { %2284 = vmax.xlane.f32.xlu0 %v2283_v16  ;;  %v3564_v40 = vpop.f32.mrf.mxu1 }
 0x93b   :  { %v2280_v41 = vpop.f32.mrf.mxu1 }
 0x93d   :  { %v3565_v42 = vpop.f32.mrf.mxu1 }
 0x93f   :  { %v4467_v43 = vpop.f32.mrf.mxu1 }
 0x940   :  { %v2393_v45 = vsel %vm239_vm10, %v4467_v43, -inf }
 0x941   :  { %2394 = vmax.xlane.f32.xlu1 %v2393_v45  ;;  %v3576_v52 = vpop.f32.mrf.mxu1 }
 0x943   :  { %v2390_v53 = vpop.f32.mrf.mxu1 }
 0x945   :  { %v3577_v54 = vpop.f32.mrf.mxu1 }
 0x947   :  { %v2497_v55 = vpop.f32.mrf.mxu1 }
 0x948   :  { %v2503_v4 = vsel %vm239_vm10, %v2497_v55, -inf }
 0x949   :  { %2504 = vmax.xlane.f32.xlu0 %v2503_v4  ;;  %v3588_v5 = vpop.f32.mrf.mxu1 }
 0x94b   :  { %v2500_v47 = vpop.f32.mrf.mxu1 }
 0x94d   :  { %v3589_v6 = vpop.f32.mrf.mxu1 }
 0x94f   :  { %v4472_v58 = vpop.f32.mrf.mxu1 }
 0x950   :  { %v2613_v59 = vsel %vm239_vm10, %v4472_v58, -inf }
 0x951   :  { %v3600_v7 = vpop.f32.mrf.mxu1 }
 0x952   :  { %1965 = vrot.lane.b32.xlu1 %v4388_v13, %s4951_s16 }
 0x953   :  { %v2610_v3 = vpop.f32.mrf.mxu1 }
 0x955   :  { %v3601_v8 = vpop.f32.mrf.mxu1 }
 0x95f   :  { %1854 = vrot.lane.b32.xlu0 %v4388_v13, %s4952_s17 }
 0x976   :  { %2614 = vmax.xlane.f32.xlu1 %v2613_v59 }
 0x987   :  { %2075 = vrot.lane.b32.xlu1 %v4388_v13, %s4953_s18 }
 0x9a2   :  { %v1844_v60 = vpop.xlane.xlu1 %1843 }
 0x9a3   :  { %v1845_v12 = vsub.f32 %v1836_v24, %v1844_v60 }
 0x9a5   :  { %v1846_v62 = vmul.f32 1.442695, %v1845_v12 }
 0x9a7   :  { %3713 = vpow2.f32 %v1846_v62 }
 0x9aa   :  { %v1955_v63 = vpop.xlane.xlu0 %1954 }
 0x9ab   :  { %v1956_v14 = vsub.f32 %v1947_v28, %v1955_v63 }
 0x9ad   :  { %v1957_v15 = vmul.f32 1.442695, %v1956_v14 }
 0x9af   :  { %3715 = vpow2.f32 %v1957_v15 }
 0x9b2   :  { %v2065_v2 = vpop.xlane.xlu0 %2064 }
 0x9b3   :  { %v2066_v25 = vsub.f32 %v2057_v11, %v2065_v2 }
 0x9b4   :  { %v3714_v26 = vpop.eup %3713 }
 0x9b5   :  { %v2067_v57 = vmul.f32 1.442695, %v2066_v25  ;;  %v1848_v27 = vsel %vm239_vm10, %v3714_v26, 0.0 }
 0x9b6   :  { %1849 = vadd.xlane.f32.xlu0 %v1848_v27 }
 0x9b7   :  { %3717 = vpow2.f32 %v2067_v57 }
 0x9ba   :  { %v2175_v29 = vpop.xlane.xlu1 %2174 }
 0x9bb   :  { %v2176_v30 = vsub.f32 %v2167_v34, %v2175_v29 }
 0x9bc   :  { %v4483_v61 = vpop.eup %3715 }
 0x9bd   :  { %v2177_v10 = vmul.f32 1.442695, %v2176_v30  ;;  %v1959_v24 = vsel %vm239_vm10, %v4483_v61, 0.0 }
 0x9be   :  { %1960 = vadd.xlane.f32.xlu1 %v1959_v24 }
 0x9bf   :  { %3719 = vpow2.f32 %v2177_v10 }
 0x9c2   :  { %v2285_v28 = vpop.xlane.xlu0 %2284 }
 0x9c3   :  { %v2286_v9 = vsub.f32 %v2277_v39, %v2285_v28 }
 0x9c4   :  { %v4487_v31 = vpop.eup %3717 }
 0x9c5   :  { %v2287_v11 = vmul.f32 1.442695, %v2286_v9  ;;  %v2069_v32 = vsel %vm239_vm10, %v4487_v31, 0.0 }
 0x9c6   :  { %2070 = vadd.xlane.f32.xlu0 %v2069_v32 }
 0x9c7   :  { %3721 = vpow2.f32 %v2287_v11 }
 0x9ca   :  { %v2395_v41 = vpop.xlane.xlu1 %2394 }
 0x9cb   :  { %v2396_v42 = vsub.f32 %v4467_v43, %v2395_v41 }
 0x9cc   :  { %v4491_v33 = vpop.eup %3719 }
 0x9cd   :  { %v2179_v34 = vsel %vm239_vm10, %v4491_v33, 0.0  ;;  %v2397_v53 = vmul.f32 1.442695, %v2396_v42 }
 0x9ce   :  { %2180 = vadd.xlane.f32.xlu1 %v2179_v34  ;;  %v1966_v4 = vpop.permute.xlu1 %1965 }
 0x9cf   :  { %v1971_v63 = vsel %vm4954_vm7, %v1966_v4, 0 }
 0x9d2   :  { %v2505_v35 = vpop.xlane.xlu0 %2504 }
 0x9d3   :  { %v2506_v36 = vsub.f32 %v2497_v55, %v2505_v35 }
 0x9d4   :  { %v4495_v38 = vpop.eup %3721 }
 0x9d5   :  { %v2507_v37 = vmul.f32 1.442695, %v2506_v36  ;;  %v2289_v39 = vsel %vm239_vm10, %v4495_v38, 0.0 }
 0x9d6   :  { %v1855_v16 = vpop.permute.xlu0 %1854  ;;  %2290 = vadd.xlane.f32.xlu1 %v2289_v39 }
 0x9d7   :  { %3723 = vpow2.f32 %v2507_v37  ;;  %v1860_v40 = vsel %vm4954_vm7, %v1855_v16, 0  ;;  %vm4961_vm7 = vmmov %vm4960_vm6 }
 0x9d8   :  { %3519 = vmatpush3.bf16.msra.mxu0 %v1860_v40  ;;  %3725 = vpow2.f32 %v2397_v53 }
 0x9d9   :  { %3530 = vmatprep.subr.bf16.mxu0 %v3790_v1 }
 0x9dc   :  { %2185 = vrot.lane.b32.xlu0 %v4388_v13, %s4955_s19 }
 0x9e4   :  { %v4504_v45 = vpop.eup %3723 }
 0x9e5   :  { %v2509_v52 = vsel %vm239_vm10, %v4504_v45, 0.0  ;;  %v4508_v54 = vpop.eup %3725 }
 0x9e6   :  { %2510 = vadd.xlane.f32.xlu1 %v2509_v52  ;;  %v2399_v55 = vsel %vm239_vm10, %v4508_v54, 0.0 }
 0x9fb   :  { %2400 = vadd.xlane.f32.xlu0 %v2399_v55 }
 0x9ff   :  { %v2615_v5 = vpop.xlane.xlu1 %2614 }
 0xa00   :  { %v2616_v47 = vsub.f32 %v4472_v58, %v2615_v5 }
 0xa02   :  { %v2617_v6 = vmul.f32 1.442695, %v2616_v47 }
 0xa03   :  { %v2076_v3 = vpop.permute.xlu1 %2075 }
 0xa04   :  { %3727 = vpow2.f32 %v2617_v6  ;;  %v2081_v25 = vsel %vm4960_vm6, %v2076_v3, 0 }
 0xa11   :  { %v4513_v43 = vpop.eup %3727  ;;  %2405 = vrot.lane.b32.xlu0 %v4388_v13, %s4956_s20 }
 0xa12   :  { %v2619_v7 = vsel %vm239_vm10, %v4513_v43, 0.0 }
 0xa13   :  { %2620 = vadd.xlane.f32.xlu1 %v2619_v7 }
 0xa15   :  { %2515 = vrot.lane.b32.xlu0 %v4388_v13, %s4957_s21 }
 0xa19   :  { %2625 = vrot.lane.b32.xlu0 %v4388_v13, %s4958_s22 }
 0xa24   :  { %2295 = vrot.lane.b32.xlu1 %v4388_v13, %s4959_s24 }
 0xa3f   :  { %v1850_v58 = vpop.xlane.xlu0 %1849 }
 0xa40   :  { %3729 = vrcp.f32 %v1850_v58 }
 0xa47   :  { %v1961_v8 = vpop.xlane.xlu1 %1960 }
 0xa48   :  { %3731 = vrcp.f32 %v1961_v8 }
 0xa4d   :  { %v3730_v59 = vpop.eup %3729 }
 0xa4e   :  { %v1852_v60 = vmul.f32 %v3730_v59, %v3714_v26 }
 0xa4f   :  { %v2071_v12 = vpop.xlane.xlu0 %2070 }
 0xa50   :  { %3733 = vrcp.f32 %v2071_v12  ;;  %v1853_v62 = vpack.c.bf16 %v1852_v60, %v1852_v60 }
 0xa52   :  { %3521 = vmatmul.mubr.msk.bf16.vlgmr.msra.gmra.mxu0 %vm239_vm10, %v1853_v62 }
 0xa53   :  { %3531 = vmatpush3.bf16.msra.mxu0 %v1971_v63  ;;  %3532 = vmatprep.mubr.msk.bf16.mxu0 %vm3791_vm0, %v3790_v1  ;;  %v2186_v27 = vpop.permute.xlu0 %2185 }
 0xa54   :  { %3542 = vmatprep.subr.bf16.mxu0 %v3790_v1  ;;  %v2191_v30 = vsel %vm4961_vm7, %v2186_v27, 0  ;;  %vm4962_vm7 = vmmov %vm4960_vm6 }
 0xa55   :  { %v3732_v13 = vpop.eup %3731 }
 0xa56   :  { %v1963_v14 = vmul.f32 %v3732_v13, %v4483_v61 }
 0xa57   :  { %v2181_v15 = vpop.xlane.xlu1 %2180 }
 0xa58   :  { %3735 = vrcp.f32 %v2181_v15  ;;  %v1964_v2 = vpack.c.bf16 %v1963_v14, %v1963_v14 }
 0xa5a   :  { %3533 = vmatmul.mubr.msk.bf16.vlgmr.msra.gmra.mxu0 %vm239_vm10, %v1964_v2 }
 0xa5b   :  { %3543 = vmatpush3.bf16.msra.mxu0 %v2081_v25  ;;  %3544 = vmatprep.mubr.msk.bf16.mxu0 %vm3791_vm0, %v3790_v1 }
 0xa5c   :  { %3554 = vmatprep.subr.bf16.mxu0 %v3790_v1 }
 0xa5d   :  { %v3734_v26 = vpop.eup %3733 }
 0xa5e   :  { %v2073_v57 = vmul.f32 %v3734_v26, %v4487_v31 }
 0xa5f   :  { %v2291_v28 = vpop.xlane.xlu1 %2290 }
 0xa60   :  { %v2074_v29 = vpack.c.bf16 %v2073_v57, %v2073_v57  ;;  %3737 = vrcp.f32 %v2291_v28 }
 0xa62   :  { %3545 = vmatmul.mubr.msk.bf16.vlgmr.msra.gmra.mxu0 %vm239_vm10, %v2074_v29 }
 0xa63   :  { %3555 = vmatpush3.bf16.msra.mxu0 %v2191_v30  ;;  %3556 = vmatprep.mubr.msk.bf16.mxu0 %vm3791_vm0, %v3790_v1 }
 0xa64   :  { %3566 = vmatprep.subr.bf16.mxu0 %v3790_v1 }
 0xa65   :  { %v3736_v61 = vpop.eup %3735 }
 0xa66   :  { %v2183_v10 = vmul.f32 %v3736_v61, %v4491_v33 }
 0xa68   :  { %v2184_v24 = vpack.c.bf16 %v2183_v10, %v2183_v10 }
 0xa6a   :  { %3557 = vmatmul.mubr.msk.bf16.vlgmr.msra.gmra.mxu0 %vm239_vm10, %v2184_v24 }
 0xa6b   :  { %3568 = vmatprep.mubr.msk.bf16.mxu0 %vm3791_vm0, %v3790_v1 }
 0xa6d   :  { %v3738_v11 = vpop.eup %3737 }
 0xa6e   :  { %v2293_v34 = vmul.f32 %v3738_v11, %v4495_v38 }
 0xa6f   :  { %v2511_v31 = vpop.xlane.xlu1 %2510 }
 0xa70   :  { %v2294_v37 = vpack.c.bf16 %v2293_v34, %v2293_v34 }
 0xa84   :  { %v2401_v9 = vpop.xlane.xlu0 %2400 }
 0xa85   :  { %3739 = vrcp.f32 %v2401_v9 }
 0xa86   :  { %3741 = vrcp.f32 %v2511_v31 }
 0xa88   :  { %v2406_v33 = vpop.permute.xlu0 %2405 }
 0xa89   :  { %v2411_v16 = vsel %vm4962_vm7, %v2406_v33, 0  ;;  %vm4963_vm7 = vmmov %vm4960_vm6 }
 0xa8c   :  { %v2516_v40 = vpop.permute.xlu0 %2515 }
 0xa8d   :  { %v2521_v52 = vsel %vm4960_vm6, %v2516_v40, 0 }
 0xa90   :  { %v2626_v55 = vpop.permute.xlu0 %2625 }
 0xa92   :  { %v3740_v39 = vpop.eup %3739 }
 0xa93   :  { %v2403_v38 = vmul.f32 %v3740_v39, %v4508_v54  ;;  %v3742_v42 = vpop.eup %3741  ;;  %v2631_v54 = vsel %vm4963_vm7, %v2626_v55, 0 }
 0xa94   :  { %v2513_v53 = vmul.f32 %v3742_v42, %v4504_v45 }
 0xa95   :  { %v2404_v41 = vpack.c.bf16 %v2403_v38, %v2403_v38 }
 0xa96   :  { %v2514_v4 = vpack.c.bf16 %v2513_v53, %v2513_v53 }
 0xa9c   :  { %v2621_v32 = vpop.xlane.xlu1 %2620 }
 0xa9d   :  { %3743 = vrcp.f32 %v2621_v32 }
 0xaa0   :  { %v2296_v35 = vpop.permute.xlu1 %2295 }
 0xaa1   :  { %v2301_v36 = vsel %vm4960_vm6, %v2296_v35, 0  ;;  %vm1691_vm6 = vcmask 253952  }
 0xaa2   :  { %3567 = vmatpush3.bf16.msra.mxu0 %v2301_v36 }
 0xaa3   :  { %3578 = vmatprep.subr.bf16.mxu0 %v3790_v1 }
 0xaa5   :  { %3569 = vmatmul.mubr.msk.bf16.vlgmr.msra.gmra.mxu0 %vm239_vm10, %v2294_v37 }
 0xaa6   :  { %3579 = vmatpush3.bf16.msra.mxu0 %v2411_v16  ;;  %3580 = vmatprep.mubr.msk.bf16.mxu0 %vm3791_vm0, %v3790_v1 }
 0xaa7   :  { %3590 = vmatprep.subr.bf16.mxu0 %v3790_v1 }
 0xaaa   :  { %v3744_v5 = vpop.eup %3743 }
 0xaab   :  { %v2623_v47 = vmul.f32 %v3744_v5, %v4513_v43 }
 0xaad   :  { %3581 = vmatmul.mubr.msk.bf16.vlgmr.msra.gmra.mxu0 %vm239_vm10, %v2404_v41  ;;  %v2624_v6 = vpack.c.bf16 %v2623_v47, %v2623_v47 }
 0xaae   :  { %3591 = vmatpush3.bf16.msra.mxu0 %v2521_v52  ;;  %3592 = vmatprep.mubr.msk.bf16.mxu0 %vm3791_vm0, %v3790_v1 }
 0xaaf   :  { %3602 = vmatprep.subr.bf16.mxu0 %v3790_v1 }
 0xab5   :  { %3593 = vmatmul.mubr.msk.bf16.vlgmr.msra.gmra.mxu0 %vm239_vm10, %v2514_v4 }
 0xab6   :  { %3603 = vmatpush3.bf16.msra.mxu0 %v2631_v54  ;;  %3604 = vmatprep.mubr.msk.bf16.mxu0 %vm3791_vm0, %v3790_v1  ;;  %v4596_v54 = vld [vmem:[%s4921_s10] ss:$0 sm:$0xff] }
 0xab7   :  { %3616 = vmatprep.subr.bf16.mxu0 %v3790_v1  ;;  %v1522_v47 = vadd.f32 %v4596_v54, %v4460_v0 }
 0xabd   :  { %3605 = vmatmul.mubr.msk.bf16.vlgmr.msra.gmra.mxu0 %vm239_vm10, %v2624_v6  ;;  %v1528_v6 = vrot.slane %v1522_v47, 1 }
 0xabe   :  { %3617 = vmatpush3.bf16.msra.mxu0 %v4248_v48  ;;  %3620 = vmatprep.mubr.msk.bf16.mxu0 %vm3791_vm0, %v3790_v1 }
 0xabf   :  { %3618 = vmatprep.subr.bf16.mxu0 %v3790_v1 }
 0xac2   :  { %3619 = vmatpush3.bf16.msra.mxu0 %v4254_v49 }
 0xb12   :  { %v1896_v45 = vpop.f32.mrf.mxu0 }
 0xb14   :  { %v3522_v7 = vpop.f32.mrf.mxu0 }
 0xb15   :  { %v4601_v7 = vadd.f32 %v1528_v6, %v4297_v18 }
 0xb16   :  { %v1899_v58 = vpop.f32.mrf.mxu0 }
 0xb17   :  { %v1530_v58 = vrot.slane %v1522_v47, 3 }
 0xb18   :  { %v3523_v3 = vpop.f32.mrf.mxu0 }
 0xb1a   :  { %v2007_v8 = vpop.f32.mrf.mxu0 }
 0xb1b   :  { %2674 = vrot.lane.b32.xlu1 %v2007_v8, %s4964_s26  ;;  %v1531_v8 = vrot.slane %v1522_v47, 4 }
 0xb1c   :  { %v3534_v43 = vpop.f32.mrf.mxu0 }
 0xb1d   :  { %v4612_v43 = vadd.f32 %v1530_v58, %v4301_v20 }
 0xb1e   :  { %v2010_v59 = vpop.f32.mrf.mxu0 }
 0xb1f   :  { %v1532_v59 = vrot.slane %v1522_v47, 5  ;;  %v1563_v20 = vrot.slane %v4612_v43, 5 }
 0xb20   :  { %v3535_v60 = vpop.f32.mrf.mxu0 }
 0xb22   :  { %v2117_v12 = vpop.f32.mrf.mxu0 }
 0xb23   :  { %2678 = vrot.lane.b32.xlu0 %v2117_v12, %s4965_s23 }
 0xb24   :  { %v3546_v48 = vpop.f32.mrf.mxu0 }
 0xb25   :  { %v1533_v48 = vrot.slane %v1522_v47, 6 }
 0xb26   :  { %v2120_v62 = vpop.f32.mrf.mxu0 }
 0xb27   :  { %v4621_v62 = vadd.f32 %v1531_v8, %v4303_v21  ;;  %v3759_v21 = vld [vmem:[%s4911_s0 + $0x3] sm:$0x1] }
 0xb28   :  { %v3547_v63 = vpop.f32.mrf.mxu0 }
 0xb2a   :  { %v2227_v13 = vpop.f32.mrf.mxu0 }
 0xb2b   :  { %2682 = vrot.lane.b32.xlu1 %v2227_v13, %s4966_s29 }
 0xb2c   :  { %v3558_v49 = vpop.f32.mrf.mxu0 }
 0xb2e   :  { %v2230_v14 = vpop.f32.mrf.mxu0 }
 0xb30   :  { %v3559_v15 = vpop.f32.mrf.mxu0 }
 0xb65   :  { %v2337_v2 = vpop.f32.mrf.mxu0 }
 0xb66   :  { %2686 = vrot.lane.b32.xlu0 %v2337_v2, %s4967_s25 }
 0xb67   :  { %v3570_v25 = vpop.f32.mrf.mxu0 }
 0xb69   :  { %v2340_v26 = vpop.f32.mrf.mxu0 }
 0xb6a   :  { %v4625_v26 = vadd.f32 %v1532_v59, %v4310_v23 }
 0xb6b   :  { %v3571_v57 = vpop.f32.mrf.mxu0 }
 0xb6d   :  { %v2447_v27 = vpop.f32.mrf.mxu0 }
 0xb6e   :  { %2690 = vrot.lane.b32.xlu1 %v2447_v27, %s4968_s28 }
 0xb6f   :  { %v3582_v29 = vpop.f32.mrf.mxu0 }
 0xb71   :  { %v2450_v30 = vpop.f32.mrf.mxu0 }
 0xb72   :  { %v3760_v30 = vld [vmem:[%s4911_s0 + $0x5] sm:$0x1] }
 0xb73   :  { %v3583_v61 = vpop.f32.mrf.mxu0 }
 0xb75   :  { %v2557_v10 = vpop.f32.mrf.mxu0 }
 0xb76   :  { %2694 = vrot.lane.b32.xlu0 %v2557_v10, %s4969_s3  ;;  %v3761_v10 = vld [vmem:[%s4911_s0 + $0x7] sm:$0x1] }
 0xb77   :  { %v3594_v24 = vpop.f32.mrf.mxu0 }
 0xb79   :  { %v2560_v28 = vpop.f32.mrf.mxu0 }
 0xb7a   :  { %v3762_v28 = vld [vmem:[%s4911_s0 + $0x9] sm:$0x1] }
 0xb7b   :  { %v3595_v9 = vpop.f32.mrf.mxu0 }
 0xb7d   :  { %v2667_v31 = vpop.f32.mrf.mxu0 }
 0xb7e   :  { %2698 = vrot.lane.b32.xlu1 %v2667_v31, %s4970_s1  ;;  %v1534_v31 = vrot.slane %v1522_v47, 7 }
 0xb7f   :  { %v3606_v11 = vpop.f32.mrf.mxu0 }
 0xb80   :  { %v1565_v11 = vrot.slane %v4621_v62, 4 }
 0xb81   :  { %v2670_v32 = vpop.f32.mrf.mxu0 }
 0xb82   :  { %v3763_v32 = vld [vmem:[%s4911_s0 + $0x1] sm:$0x1] }
 0xb83   :  { %v3607_v34 = vpop.f32.mrf.mxu0 }
 0xb8d   :  { %v2675_v35 = vpop.permute.xlu1 %2674 }
 0xb8e   :  { %v2701_v39 = vsel %vm192_vm9, %v1896_v45, %v2675_v35  ;;  %v1529_v45 = vrot.slane %v1522_v47, 2  ;;  %v3764_v35 = vld [vmem:[%s4911_s0 + $0xb] sm:$0x1] }
 0xb95   :  { %v2679_v36 = vpop.permute.xlu0 %2678 }
 0xb96   :  { %v2702_v16 = vsel %vm239_vm10, %v2701_v39, %v2679_v36  ;;  %vm4973_vm10 = vcmask 1047559  }
 0xb9d   :  { %v2683_v33 = vpop.permute.xlu1 %2682 }
 0xb9e   :  { %v2703_v40 = vsel %vm1102_vm12, %v2702_v16, %v2683_v33  ;;  %v4649_v16 = vadd.f32 %v1533_v48, %v4312_v44 }
 0xbd8   :  { %v2687_v37 = vpop.permute.xlu0 %2686 }
 0xbd9   :  { %v2704_v42 = vsel %vm1104_vm13, %v2703_v40, %v2687_v37  ;;  %vm4976_vm13 = vmmov %vm4973_vm10 }
 0xbe0   :  { %v2691_v38 = vpop.permute.xlu1 %2690 }
 0xbe1   :  { %v2705_v52 = vsel %vm1106_vm14, %v2704_v42, %v2691_v38 }
 0xbe8   :  { %v2695_v41 = vpop.permute.xlu0 %2694 }
 0xbe9   :  { %v2706_v53 = vsel %vm1108_vm15, %v2705_v52, %v2695_v41  ;;  %v1567_v52 = vrot.slane %v4625_v26, 3  ;;  %vm4978_vm15 = vmmov %vm4973_vm10 }
 0xbf0   :  { %v2699_v55 = vpop.permute.xlu1 %2698 }
 0xbf1   :  { %v2707_v4 = vsel %vm1110_vm11, %v2706_v53, %v2699_v55  ;;  %vm4974_vm11 = vmmov %vm4973_vm10 }
 0xbf2   :  { %v2708_v5 = vpack.c.bf16 %v2707_v4, %v2707_v4 }
 0xbf4   :  { %3613 = vmatmul.mubr.msk.bf16.vlgmr.msra.gmra.mxu1 %vm142_vm8, %v2708_v5 }
 0xbf5   :  { %3625 = vmatpush3.bf16.msra.mxu1 %v4371_v17  ;;  %3628 = vmatprep.mubr.msk.bf16.mxu1 %vm3791_vm0, %v3790_v1  ;;  %v4604_v17 = vadd.f32 %v1529_v45, %v4299_v19  ;;  %v3758_v19 = vld [vmem:[%s4915_s4] ss:$0 sm:$0xff]  ;;  %vm4971_vm0 = vcmask 1046534  }
 0xbf6   :  { %3626 = vmatprep.subr.bf16.mxu1 %v3790_v1  ;;  %v1559_v1 = vrot.slane %v4601_v7, 7  ;;  %vm4972_vm9 = vmmov %vm4971_vm0 }
 0xbf7   :  { %v1561_v3 = vrot.slane %v4604_v17, 6  ;;  %vm4975_vm12 = vmmov %vm4971_vm0 }
 0xbf8   :  { %vm4977_vm14 = vmmov %vm4971_vm0 }
 0xbf9   :  { %3627 = vmatpush3.bf16.msra.mxu1 %v4378_v51  ;;  %v4608_v51 = vadd.f32 %v1522_v47, %v4295_v46  ;;  %vm4979_vm7 = vmmov %vm4971_vm0 }
 0xbfb   :  { %v1560_v0 = vsel %vm109_vm1, %v1559_v1, %v4608_v51 }
 0xbfc   :  { %v1562_v12 = vsel %vm112_vm2, %v1561_v3, %v1560_v0 }
 0xbfd   :  { %v1564_v57 = vsel %vm115_vm3, %v1563_v20, %v1562_v12 }
 0xbfe   :  { %v1566_v38 = vsel %vm118_vm4, %v1565_v11, %v1564_v57 }
 0xbff   :  { %v1568_v44 = vsel %vm121_vm5, %v1567_v52, %v1566_v38 }
 0xcb4   :  { %v2746_v18 = vpop.f32.mrf.mxu1 }
 0xcb5   :  { %v2747_v60 = vadd.f32 %v3758_v19, %v2746_v18 }
 0xcb6   :  { %v3614_v46 = vpop.f32.mrf.mxu1 }
 0xcb7   :  { %v2753_v63 = vrot.slane %v2747_v60, 1  ;;  %v2754_v13 = vrot.slane %v2747_v60, 2  ;;  %v2755_v49 = vrot.slane %v2747_v60, 3  ;;  %v2756_v14 = vrot.slane %v2747_v60, 4 }
 0xcb8   :  { %v2749_v15 = vpop.f32.mrf.mxu1  ;;  %v2757_v2 = vrot.slane %v2747_v60, 5  ;;  %v2758_v25 = vrot.slane %v2747_v60, 6  ;;  %v2759_v27 = vrot.slane %v2747_v60, 7  ;;  %v2768_v34 = vadd.f32 %v3763_v32, %v2747_v60 }
 0xcb9   :  { %v2769_v29 = vadd.f32 %v3759_v21, %v2753_v63  ;;  %v2770_v61 = vadd.f32 %v3760_v30, %v2754_v13  ;;  %v2771_v24 = vadd.f32 %v3761_v10, %v2755_v49  ;;  %v2772_v9 = vadd.f32 %v3762_v28, %v2756_v14 }
 0xcba   :  { %v3615_v23 = vpop.f32.mrf.mxu1  ;;  %v2773_v36 = vadd.f32 %v3764_v35, %v2757_v2  ;;  %v2774_v39 = vadd.f32 %v2758_v25, %v4308_v22  ;;  %v2775_v40 = vadd.f32 %v2759_v27, %v4329_v56  ;;  %v4658_v22 = vadd.f32 %v1534_v31, %v4314_v50 }
 0xcbb   :  { %v2784_v33 = vrot.slane %v2769_v29, 7  ;;  %v2786_v37 = vrot.slane %v2770_v61, 6  ;;  %v2788_v42 = vrot.slane %v2771_v24, 5  ;;  %v2790_v55 = vrot.slane %v2772_v9, 4 }
 0xcbc   :  { %v2792_v5 = vrot.slane %v2773_v36, 3  ;;  %v2794_v6 = vrot.slane %v2774_v39, 2  ;;  %v1569_v56 = vrot.slane %v4649_v16, 2  ;;  %v2796_v58 = vrot.slane %v2775_v40, 1 }
 0xcbd   :  { %v2785_v41 = vsel %vm109_vm1, %v2784_v33, %v2768_v34  ;;  %v1571_v0 = vrot.slane %v4658_v22, 1 }
 0xcbe   :  { %v2787_v53 = vsel %vm112_vm2, %v2786_v37, %v2785_v41  ;;  %v1570_v3 = vsel %vm4972_vm9, %v1569_v56, %v1568_v44 }
 0xcbf   :  { %v2789_v4 = vsel %vm115_vm3, %v2788_v42, %v2787_v53  ;;  %v1572_v18 = vsel %vm4974_vm11, %v1571_v0, %v1570_v3 }
 0xcc0   :  { %v2791_v47 = vsel %vm118_vm4, %v2790_v55, %v2789_v4  ;;  %v1574_v59 = vsel %vm142_vm8, %v1572_v18, 0.0 }
 0xcc1   :  { %v2793_v45 = vsel %vm121_vm5, %v2792_v5, %v2791_v47 }
 0xcc2   :  { %v2795_v1 = vsel %vm4971_vm0, %v2794_v6, %v2793_v45  ;;  %vm4980_vm0 = vmmov %vm4973_vm10 }
 0xcc3   :  { %v2797_v8 = vsel %vm4973_vm10, %v2796_v58, %v2795_v1  ;;  %vm4981_vm10 = vmmov %vm4979_vm7 }
 0xcc4   :  { %v2799_v50 = vsel %vm142_vm8, %v2797_v8, 0.0  ;;  %vm4982_vm11 = vmmov %vm4980_vm0 }
 0xcc5   :  { %2800 = vadd.xlane.f32.xlu0 %v2799_v50 }
 0xcc9   :  { %1575 = vadd.xlane.f32.xlu0 %v1574_v59 }
 0xd4e   :  { %v2801_v19 = vpop.xlane.xlu0 %2800 }
 0xd4f   :  { %v2802_v60 = vmul.f32 0.03125, %v2801_v19 }
 0xd51   :  { %v2804_v12 = vrot.slane %v2802_v60, 1  ;;  %v2805_v46 = vrot.slane %v2802_v60, 2  ;;  %v2806_v48 = vrot.slane %v2802_v60, 3  ;;  %v2807_v20 = vrot.slane %v2802_v60, 4 }
 0xd52   :  { %v1576_v63 = vpop.xlane.xlu0 %1575  ;;  %v2808_v13 = vrot.slane %v2802_v60, 5  ;;  %v2809_v49 = vrot.slane %v2802_v60, 6  ;;  %v2810_v14 = vrot.slane %v2802_v60, 7  ;;  %v4671_v15 = vsub.f32 %v2768_v34, %v2802_v60 }
 0xd53   :  { %v1577_v2 = vmul.f32 0.03125, %v1576_v63  ;;  %v4673_v25 = vsub.f32 %v2769_v29, %v2804_v12  ;;  %v4675_v57 = vsub.f32 %v2770_v61, %v2805_v46  ;;  %v4677_v27 = vsub.f32 %v2771_v24, %v2806_v48 }
 0xd54   :  { %v4679_v21 = vsub.f32 %v2772_v9, %v2807_v20  ;;  %v4681_v30 = vsub.f32 %v2773_v36, %v2808_v13  ;;  %v4683_v10 = vsub.f32 %v2774_v39, %v2809_v49  ;;  %v4685_v23 = vsub.f32 %v2775_v40, %v2810_v14 }
 0xd55   :  { %v2828_v28 = vmul.f32 %v4673_v25, %v4673_v25  ;;  %v2829_v31 = vmul.f32 %v4675_v57, %v4675_v57  ;;  %v2830_v29 = vmul.f32 %v4677_v27, %v4677_v27  ;;  %v2827_v61 = vmul.f32 %v4671_v15, %v4671_v15 }
 0xd56   :  { %v2831_v24 = vmul.f32 %v4679_v21, %v4679_v21  ;;  %v2832_v9 = vmul.f32 %v4681_v30, %v4681_v30  ;;  %v2833_v11 = vmul.f32 %v4683_v10, %v4683_v10  ;;  %v2834_v32 = vmul.f32 %v4685_v23, %v4685_v23 }
 0xd57   :  { %v2843_v34 = vrot.slane %v2828_v28, 7  ;;  %v2845_v35 = vrot.slane %v2829_v31, 6  ;;  %v1579_v36 = vrot.slane %v1577_v2, 1  ;;  %v2847_v33 = vrot.slane %v2830_v29, 5 }
 0xd58   :  { %v2849_v37 = vrot.slane %v2831_v24, 4  ;;  %v2851_v39 = vrot.slane %v2832_v9, 3  ;;  %v2853_v38 = vrot.slane %v2833_v11, 2  ;;  %v1580_v41 = vrot.slane %v1577_v2, 2 }
 0xd59   :  { %v2844_v40 = vsel %vm109_vm1, %v2843_v34, %v2827_v61  ;;  %v1581_v42 = vrot.slane %v1577_v2, 3  ;;  %v1582_v52 = vrot.slane %v1577_v2, 4  ;;  %v1583_v55 = vrot.slane %v1577_v2, 5 }
 0xd5a   :  { %v2846_v53 = vsel %vm112_vm2, %v2845_v35, %v2844_v40  ;;  %v1584_v4 = vrot.slane %v1577_v2, 6  ;;  %v1585_v5 = vrot.slane %v1577_v2, 7  ;;  %v4707_v47 = vsub.f32 %v4608_v51, %v1577_v2 }
 0xd5b   :  { %v2848_v44 = vsel %vm115_vm3, %v2847_v33, %v2846_v53  ;;  %v4710_v6 = vsub.f32 %v4601_v7, %v1579_v36  ;;  %v4713_v56 = vsub.f32 %v4604_v17, %v1580_v41  ;;  %v4717_v58 = vsub.f32 %v4612_v43, %v1581_v42 }
 0xd5c   :  { %v2850_v45 = vsel %vm118_vm4, %v2849_v37, %v2848_v44  ;;  %v4720_v1 = vsub.f32 %v4621_v62, %v1582_v52  ;;  %v4723_v3 = vsub.f32 %v4625_v26, %v1583_v55  ;;  %v2855_v8 = vrot.slane %v2834_v32, 1 }
 0xd5d   :  { %v2852_v51 = vsel %vm121_vm5, %v2851_v39, %v2850_v45  ;;  %v4727_v7 = vsub.f32 %v4649_v16, %v1584_v4  ;;  %v4730_v17 = vsub.f32 %v4658_v22, %v1585_v5  ;;  %v1603_v43 = vmul.f32 %v4710_v6, %v4710_v6 }
 0xd5e   :  { %v2854_v0 = vsel %vm4975_vm12, %v2853_v38, %v2852_v51  ;;  %v1604_v62 = vmul.f32 %v4713_v56, %v4713_v56  ;;  %v1605_v26 = vmul.f32 %v4717_v58, %v4717_v58  ;;  %v1602_v16 = vmul.f32 %v4707_v47, %v4707_v47  ;;  %vm4983_vm12 = vmmov %vm4979_vm7 }
 0xd5f   :  { %v2856_v50 = vsel %vm4976_vm13, %v2855_v8, %v2854_v0  ;;  %v1606_v22 = vmul.f32 %v4720_v1, %v4720_v1  ;;  %v1607_v59 = vmul.f32 %v4723_v3, %v4723_v3  ;;  %v1618_v19 = vrot.slane %v1603_v43, 7  ;;  %v3765_v43 = vld [vmem:[%s4916_s5] ss:$0 sm:$0xff]  ;;  %vm4984_vm13 = vmmov %vm4980_vm0 }
 0xd60   :  { %v2858_v18 = vsel %vm142_vm8, %v2856_v50, 0.0  ;;  %v1620_v60 = vrot.slane %v1604_v62, 6  ;;  %v1608_v12 = vmul.f32 %v4727_v7, %v4727_v7  ;;  %v1609_v46 = vmul.f32 %v4730_v17, %v4730_v17 }
 0xd61   :  { %2859 = vadd.xlane.f32.xlu1 %v2858_v18  ;;  %v1619_v48 = vsel %vm109_vm1, %v1618_v19, %v1602_v16  ;;  %v1622_v20 = vrot.slane %v1605_v26, 5  ;;  %v1624_v13 = vrot.slane %v1606_v22, 4  ;;  %v1626_v14 = vrot.slane %v1607_v59, 3 }
 0xd62   :  { %v1621_v63 = vsel %vm112_vm2, %v1620_v60, %v1619_v48  ;;  %v1628_v28 = vrot.slane %v1608_v12, 2  ;;  %v1630_v29 = vrot.slane %v1609_v46, 1 }
 0xd63   :  { %v1623_v49 = vsel %vm115_vm3, %v1622_v20, %v1621_v63 }
 0xd64   :  { %v1625_v2 = vsel %vm118_vm4, %v1624_v13, %v1623_v49 }
 0xd65   :  { %v1627_v31 = vsel %vm121_vm5, %v1626_v14, %v1625_v2 }
 0xd66   :  { %v1629_v61 = vsel %vm4977_vm14, %v1628_v28, %v1627_v31 }
 0xd67   :  { %v1631_v24 = vsel %vm4978_vm15, %v1630_v29, %v1629_v61 }
 0xd68   :  { %v1633_v9 = vsel %vm142_vm8, %v1631_v24, 0.0 }
 0xd69   :  { %1634 = vadd.xlane.f32.xlu1 %v1633_v9 }
 0xdea   :  { %v2860_v11 = vpop.xlane.xlu1 %2859 }
 0xdeb   :  { %v2861_v32 = vmul.f32 0.03125, %v2860_v11 }
 0xded   :  { %v2862_v34 = vadd.f32 1e-05, %v2861_v32 }
 0xdef   :  { %3745 = vrsqrt.f32 %v2862_v34 }
 0xdf2   :  { %v1635_v35 = vpop.xlane.xlu1 %1634 }
 0xdf3   :  { %v1636_v36 = vmul.f32 0.03125, %v1635_v35 }
 0xdf5   :  { %v1637_v33 = vadd.f32 1e-05, %v1636_v36 }
 0xdf7   :  { %3747 = vrsqrt.f32 %v1637_v33 }
 0xdfc   :  { %v3746_v37 = vpop.eup %3745 }
 0xdfd   :  { %v2865_v39 = vrot.slane %v3746_v37, 1  ;;  %v2866_v38 = vrot.slane %v3746_v37, 2  ;;  %v2867_v40 = vrot.slane %v3746_v37, 3  ;;  %v2868_v41 = vrot.slane %v3746_v37, 4 }
 0xdfe   :  { %v2869_v42 = vrot.slane %v3746_v37, 5  ;;  %v2870_v52 = vrot.slane %v3746_v37, 6  ;;  %v2871_v53 = vrot.slane %v3746_v37, 7  ;;  %v2880_v55 = vmul.f32 %v3746_v37, %v4671_v15 }
 0xdff   :  { %v2881_v4 = vmul.f32 %v2865_v39, %v4673_v25  ;;  %v2882_v5 = vmul.f32 %v2866_v38, %v4675_v57  ;;  %v2883_v44 = vmul.f32 %v2867_v40, %v4677_v27  ;;  %v2884_v45 = vmul.f32 %v2868_v41, %v4679_v21  ;;  %v3766_v21 = vld [vmem:[%s4917_s6] ss:$0 sm:$0xff] }
 0xe00   :  { %v2885_v51 = vmul.f32 %v2869_v42, %v4681_v30  ;;  %v2886_v8 = vmul.f32 %v2870_v52, %v4683_v10  ;;  %v2887_v0 = vmul.f32 %v2871_v53, %v4685_v23  ;;  %v2888_v62 = vmul.f32 %v3765_v43, %v2880_v55 }
 0xe01   :  { %v2889_v15 = vmul.f32 %v3765_v43, %v2881_v4  ;;  %v2890_v26 = vmul.f32 %v3765_v43, %v2882_v5  ;;  %v2891_v25 = vmul.f32 %v3765_v43, %v2883_v44  ;;  %v2892_v50 = vmul.f32 %v3765_v43, %v2884_v45  ;;  %v4810_v5 = vld [vmem:[%s4922_s11] ss:$0 sm:$0xff] }
 0xe02   :  { %v2893_v57 = vmul.f32 %v3765_v43, %v2885_v51  ;;  %v2894_v16 = vmul.f32 %v3765_v43, %v2886_v8  ;;  %v2895_v27 = vmul.f32 %v3765_v43, %v2887_v0  ;;  %v4773_v30 = vadd.f32 %v3766_v21, %v2888_v62 }
 0xe03   :  { %v4775_v10 = vadd.f32 %v3766_v21, %v2889_v15  ;;  %v4777_v23 = vadd.f32 %v3766_v21, %v2890_v26  ;;  %v4779_v22 = vadd.f32 %v3766_v21, %v2891_v25  ;;  %v4781_v18 = vadd.f32 %v3766_v21, %v2892_v50 }
 0xe04   :  { %v4783_v59 = vadd.f32 %v3766_v21, %v2893_v57  ;;  %v4785_v19 = vadd.f32 %v3766_v21, %v2894_v16  ;;  %v4787_v60 = vadd.f32 %v3766_v21, %v2895_v27  ;;  %v2904_v12 = vpack.c.bf16 %v4773_v30, %v4773_v30  ;;  %v3748_v46 = vpop.eup %3747 }
 0xe05   :  { %v2905_v48 = vpack.c.bf16 %v4775_v10, %v4775_v10  ;;  %v2906_v20 = vpack.c.bf16 %v4777_v23, %v4777_v23  ;;  %v2907_v63 = vpack.c.bf16 %v4779_v22, %v4779_v22  ;;  %v2908_v13 = vpack.c.bf16 %v4781_v18, %v4781_v18 }
 0xe06   :  { %v2909_v49 = vpack.c.bf16 %v4783_v59, %v4783_v59  ;;  %v2910_v14 = vpack.c.bf16 %v4785_v19, %v4785_v19  ;;  %v2911_v2 = vpack.c.bf16 %v4787_v60, %v4787_v60  ;;  %v2920_v28 = vunpack.c.l.b16 %v2904_v12 }
 0xe07   :  { %v2921_v31 = vunpack.c.l.b16 %v2905_v48  ;;  %v2922_v29 = vunpack.c.l.b16 %v2906_v20  ;;  %v2923_v61 = vunpack.c.l.b16 %v2907_v63  ;;  %v2924_v24 = vunpack.c.l.b16 %v2908_v13 }
 0xe08   :  { %v2925_v9 = vunpack.c.l.b16 %v2909_v49  ;;  %v2926_v11 = vunpack.c.l.b16 %v2910_v14  ;;  %v2927_v32 = vunpack.c.l.b16 %v2911_v2  ;;  %v1640_v34 = vrot.slane %v3748_v46, 1 }
 0xe09   :  { %v2928_v35 = vrot.slane %v2921_v31, 7  ;;  %v2930_v36 = vrot.slane %v2922_v29, 6  ;;  %v2932_v33 = vrot.slane %v2923_v61, 5  ;;  %v2934_v37 = vrot.slane %v2924_v24, 4  ;;  %v3767_v29 = vld [vmem:[%s4919_s8] ss:$0 sm:$0xff] }
 0xe0a   :  { %v2936_v39 = vrot.slane %v2925_v9, 3  ;;  %v2938_v38 = vrot.slane %v2926_v11, 2  ;;  %v2940_v40 = vrot.slane %v2927_v32, 1  ;;  %v1641_v41 = vrot.slane %v3748_v46, 2  ;;  %s3822_s8 = smov [#allocation2]  }
 0xe0b   :  { %v2929_v42 = vsel %vm109_vm1, %v2928_v35, %v2920_v28  ;;  %v1642_v52 = vrot.slane %v3748_v46, 3  ;;  %v1643_v53 = vrot.slane %v3748_v46, 4  ;;  %v1644_v55 = vrot.slane %v3748_v46, 5  ;;  %s3221_s28 = sshll.u32 %s3822_s8, 4  ;;  %s3222_s28 = int_to_ptr.vmem [resolvable:$true] %s3221_s28 }
 0xe0c   :  { %v2931_v4 = vsel %vm112_vm2, %v2930_v36, %v2929_v42  ;;  %v1645_v44 = vrot.slane %v3748_v46, 6  ;;  %v1646_v45 = vrot.slane %v3748_v46, 7  ;;  %v1655_v51 = vmul.f32 %v3748_v46, %v4707_v47  ;;  %v4825_v47 = vld [vmem:[%s4923_s12] ss:$0 sm:$0xff]  ;;  %s3768_s3 = scalar_lea.vmem %s3222_s28, 256  ;;  %p3773_p1 = scmp.lt.s32.totalorder %s3222_s28, %s3222_s28 }
 0xe0d   :  { %v2933_v8 = vsel %vm115_vm3, %v2932_v33, %v2931_v4  ;;  %v1656_v0 = vmul.f32 %v1640_v34, %v4710_v6  ;;  %v1657_v43 = vmul.f32 %v1641_v41, %v4713_v56  ;;  %v1658_v62 = vmul.f32 %v1642_v52, %v4717_v58  ;;  %p3769_p0 = scmp.ne.s32.totalorder %s3222_s28, %s3768_s3  ;;  %p3774_p2 = scmp.lt.s32.totalorder %s3768_s3, %s3768_s3 }
 0xe0e   :  { %v2935_v15 = vsel %vm118_vm4, %v2934_v37, %v2933_v8  ;;  %v1659_v26 = vmul.f32 %v1643_v53, %v4720_v1  ;;  %v1660_v25 = vmul.f32 %v1644_v55, %v4723_v3  ;;  %v1661_v50 = vmul.f32 %v1645_v44, %v4727_v7 }
 0xe0f   :  { %v2937_v57 = vsel %vm121_vm5, %v2936_v39, %v2935_v15  ;;  %v1662_v6 = vmul.f32 %v1646_v45, %v4730_v17  ;;  %v1669_v56 = vmul.f32 %v4810_v5, %v1655_v51  ;;  %v1670_v58 = vmul.f32 %v4810_v5, %v1656_v0  ;;  %p3775_p3 = por %p3774_p2, %p3773_p1 }
 0xe10   :  { %v2939_v16 = vsel %vm4979_vm7, %v2938_v38, %v2937_v57  ;;  %v1671_v1 = vmul.f32 %v4810_v5, %v1657_v43  ;;  %v1672_v3 = vmul.f32 %v4810_v5, %v1658_v62  ;;  %v1673_v7 = vmul.f32 %v4810_v5, %v1659_v26 }
 0xe11   :  { %v2941_v27 = vsel %vm4980_vm0, %v2940_v40, %v2939_v16  ;;  %v1674_v21 = vmul.f32 %v4810_v5, %v1660_v25  ;;  %v1675_v12 = vmul.f32 %v4810_v5, %v1661_v50  ;;  %v1676_v17 = vmul.f32 %v4810_v5, %v1662_v6  ;;  %p3776_p4 = pnand %p3775_p3, %p3769_p0 }
 0xe12   :  { %v2942_v46 = vpack.c.b16 %v2941_v27, %v2941_v27  ;;  %v1683_v48 = vadd.f32 %v4825_v47, %v1669_v56  ;;  %v1684_v20 = vadd.f32 %v4825_v47, %v1670_v58  ;;  %v1685_v63 = vadd.f32 %v4825_v47, %v1671_v1 }
 0xe13   :  { %v1686_v13 = vadd.f32 %v4825_v47, %v1672_v3  ;;  %v1687_v49 = vadd.f32 %v4825_v47, %v1673_v7  ;;  %v1688_v14 = vadd.f32 %v4825_v47, %v1674_v21  ;;  %v1689_v2 = vadd.f32 %v4825_v47, %v1675_v12 }
 0xe14   :  { %3621 = vmatmul.mubr.msk.bf16.vlgmr.msra.gmra.mxu0 %vm142_vm8, %v2942_v46  ;;  %v1690_v28 = vadd.f32 %v4825_v47, %v1676_v17  ;;  %1692 = vst.msk [vmem:[#allocation2] sm:$0x1] %vm1691_vm6, %v1683_v48  ;;  %1693 = vst.msk [vmem:[#allocation2 + $0x2] sm:$0x1] %vm1691_vm6, %v1684_v20 }
 0xe15   :  { %1694 = vst.msk [vmem:[#allocation2 + $0x4] sm:$0x1] %vm1691_vm6, %v1685_v63  ;;  %1695 = vst.msk [vmem:[#allocation2 + $0x6] sm:$0x1] %vm1691_vm6, %v1686_v13 }
 0xe16   :  { %1696 = vst.msk [vmem:[#allocation2 + $0x8] sm:$0x1] %vm1691_vm6, %v1687_v49  ;;  %1697 = vst.msk [vmem:[#allocation2 + $0xa] sm:$0x1] %vm1691_vm6, %v1688_v14 }
 0xe17   :  { %1698 = vst.msk [vmem:[#allocation2 + $0xc] sm:$0x1] %vm1691_vm6, %v1689_v2  ;;  %1699 = vst.msk [vmem:[#allocation2 + $0xe] sm:$0x1] %vm1691_vm6, %v1690_v28 }
 0xed4   :  { %v2980_v31 = vpop.f32.mrf.mxu0 }
 0xed5   :  { %v2981_v61 = vadd.f32 %v3767_v29, %v2980_v31 }
 0xed6   :  { %v3622_v24 = vpop.f32.mrf.mxu0 }
 0xed7   :  { %v2987_v9 = vmul.f32 0.70710677, %v2981_v61  ;;  %v2986_v15 = vmul.f32 0.5, %v2981_v61 }
 0xed8   :  { %v2983_v11 = vpop.f32.mrf.mxu0 }
 0xed9   :  { %v2988_v32 = vand.u32 2147483647, %v2987_v9  ;;  %vm3007_vm9 = vcmp.ge.f32.partialorder %v2987_v9, 0.0 }
 0xeda   :  { %v3623_v34 = vpop.f32.mrf.mxu0 }
 0xedb   :  { %v2989_v35 = vmul.f32 0.3275911, %v2988_v32  ;;  %v3001_v33 = vsub.f32 0.0, %v2988_v32 }
 0xedd   :  { %v2990_v36 = vadd.f32 1.0, %v2989_v35  ;;  %v3002_v37 = vmul.f32 %v3001_v33, %v2988_v32 }
 0xedf   :  { %3749 = vrcp.f32 %v2990_v36  ;;  %v3003_v40 = vmul.f32 1.442695, %v3002_v37 }
 0xee1   :  { %3751 = vpow2.f32 %v3003_v40 }
 0xeec   :  { %v3750_v39 = vpop.eup %3749 }
 0xeed   :  { %v2992_v38 = vmul.f32 1.0614054, %v3750_v39 }
 0xeee   :  { %v3752_v51 = vpop.eup %3751 }
 0xeef   :  { %v2993_v41 = vadd.f32 -1.4531521, %v2992_v38 }
 0xef1   :  { %v2994_v42 = vmul.f32 %v3750_v39, %v2993_v41 }
 0xef3   :  { %v2995_v52 = vadd.f32 1.4214138, %v2994_v42 }
 0xef5   :  { %v2996_v53 = vmul.f32 %v3750_v39, %v2995_v52 }
 0xef7   :  { %v2997_v55 = vadd.f32 -0.28449672, %v2996_v53 }
 0xef9   :  { %v2998_v4 = vmul.f32 %v3750_v39, %v2997_v55 }
 0xefb   :  { %v2999_v44 = vadd.f32 0.2548296, %v2998_v4 }
 0xefd   :  { %v3000_v45 = vmul.f32 %v3750_v39, %v2999_v44 }
 0xeff   :  { %v3005_v8 = vmul.f32 %v3752_v51, %v3000_v45 }
 0xf01   :  { %v3006_v0 = vsub.f32 1.0, %v3005_v8 }
 0xf03   :  { %v3008_v43 = vsub.f32 0.0, %v3006_v0 }
 0xf05   :  { %v3009_v62 = vsel %vm3007_vm9, %v3006_v0, %v3008_v43 }
 0xf06   :  { %v3010_v26 = vadd.f32 1.0, %v3009_v62 }
 0xf08   :  { %v3011_v25 = vmul.f32 %v3010_v26, %v2986_v15 }
 0xf0a   :  { %v3012_v50 = vpack.c.bf16 %v3011_v25, %v3011_v25 }
 0xf0c   :  { %3629 = vmatmul.mubr.msk.bf16.vlgmr.msra.gmra.mxu1 %vm142_vm8, %v3012_v50 }
 0xfcc   :  { %v3050_v57 = vpop.f32.mrf.mxu1 }
 0xfcd   :  { %v3051_v6 = vadd.f32 %v4596_v54, %v3050_v57 }
 0xfce   :  { %v3630_v56 = vpop.f32.mrf.mxu1 }
 0xfcf   :  { %v3057_v58 = vrot.slane %v3051_v6, 1  ;;  %v3058_v16 = vrot.slane %v3051_v6, 2  ;;  %v3059_v1 = vrot.slane %v3051_v6, 3  ;;  %v3060_v3 = vrot.slane %v3051_v6, 4 }
 0xfd0   :  { %v3053_v7 = vpop.f32.mrf.mxu1  ;;  %v3061_v27 = vrot.slane %v3051_v6, 5  ;;  %v3062_v21 = vrot.slane %v3051_v6, 6  ;;  %v3063_v12 = vrot.slane %v3051_v6, 7  ;;  %v3072_v54 = vadd.f32 %v3051_v6, %v4773_v30 }
 0xfd1   :  { %v3073_v17 = vadd.f32 %v3057_v58, %v4775_v10  ;;  %v3074_v46 = vadd.f32 %v3058_v16, %v4777_v23  ;;  %v3075_v48 = vadd.f32 %v3059_v1, %v4779_v22  ;;  %v3076_v63 = vadd.f32 %v3060_v3, %v4781_v18 }
 0xfd2   :  { %v3631_v20 = vpop.f32.mrf.mxu1  ;;  %v3077_v13 = vadd.f32 %v3061_v27, %v4783_v59  ;;  %v3078_v2 = vadd.f32 %v3062_v21, %v4785_v19  ;;  %v3079_v28 = vadd.f32 %v3063_v12, %v4787_v60 }
 0xfd3   :  { %v3088_v49 = vrot.slane %v3073_v17, 7  ;;  %v3090_v14 = vrot.slane %v3074_v46, 6  ;;  %v3092_v10 = vrot.slane %v3075_v48, 5  ;;  %v3094_v29 = vrot.slane %v3076_v63, 4 }
 0xfd4   :  { %v3096_v61 = vrot.slane %v3077_v13, 3  ;;  %v3098_v30 = vrot.slane %v3078_v2, 2  ;;  %v3100_v24 = vrot.slane %v3079_v28, 1 }
 0xfd5   :  { %v3089_v31 = vsel %vm109_vm1, %v3088_v49, %v3072_v54 }
 0xfd6   :  { %v3091_v23 = vsel %vm112_vm2, %v3090_v14, %v3089_v31 }
 0xfd7   :  { %v3093_v22 = vsel %vm115_vm3, %v3092_v10, %v3091_v23 }
 0xfd8   :  { %v3095_v18 = vsel %vm118_vm4, %v3094_v29, %v3093_v22 }
 0xfd9   :  { %v3097_v59 = vsel %vm121_vm5, %v3096_v61, %v3095_v18 }
 0xfda   :  { %v3099_v9 = vsel %vm4981_vm10, %v3098_v30, %v3097_v59 }
 0xfdb   :  { %v3101_v19 = vsel %vm4982_vm11, %v3100_v24, %v3099_v9 }
 0xfdc   :  { %v3103_v60 = vsel %vm142_vm8, %v3101_v19, 0.0 }
 0xfdd   :  { %3104 = vadd.xlane.f32.xlu0 %v3103_v60 }
0x1066   :  { %v3105_v11 = vpop.xlane.xlu0 %3104 }
0x1067   :  { %v3106_v32 = vmul.f32 0.03125, %v3105_v11 }
0x1069   :  { %v3108_v34 = vrot.slane %v3106_v32, 1  ;;  %v3109_v35 = vrot.slane %v3106_v32, 2  ;;  %v3110_v36 = vrot.slane %v3106_v32, 3  ;;  %v3111_v33 = vrot.slane %v3106_v32, 4 }
0x106a   :  { %v3112_v37 = vrot.slane %v3106_v32, 5  ;;  %v3113_v39 = vrot.slane %v3106_v32, 6  ;;  %v3114_v38 = vrot.slane %v3106_v32, 7  ;;  %v3123_v40 = vsub.f32 %v3072_v54, %v3106_v32 }
0x106b   :  { %v3124_v41 = vsub.f32 %v3073_v17, %v3108_v34  ;;  %v3125_v42 = vsub.f32 %v3074_v46, %v3109_v35  ;;  %v3126_v52 = vsub.f32 %v3075_v48, %v3110_v36  ;;  %v3127_v53 = vsub.f32 %v3076_v63, %v3111_v33 }
0x106c   :  { %v3128_v55 = vsub.f32 %v3077_v13, %v3112_v37  ;;  %v3129_v4 = vsub.f32 %v3078_v2, %v3113_v39  ;;  %v3130_v44 = vsub.f32 %v3079_v28, %v3114_v38  ;;  %v3131_v43 = vmul.f32 %v3123_v40, %v3123_v40 }
0x106d   :  { %v3132_v45 = vmul.f32 %v3124_v41, %v3124_v41  ;;  %v3133_v51 = vmul.f32 %v3125_v42, %v3125_v42  ;;  %v3134_v8 = vmul.f32 %v3126_v52, %v3126_v52  ;;  %v3135_v0 = vmul.f32 %v3127_v53, %v3127_v53 }
0x106e   :  { %v3136_v62 = vmul.f32 %v3128_v55, %v3128_v55  ;;  %v3137_v25 = vmul.f32 %v3129_v4, %v3129_v4  ;;  %v3138_v50 = vmul.f32 %v3130_v44, %v3130_v44 }
0x106f   :  { %v3147_v15 = vrot.slane %v3132_v45, 7  ;;  %v3149_v26 = vrot.slane %v3133_v51, 6  ;;  %v3151_v6 = vrot.slane %v3134_v8, 5  ;;  %v3153_v58 = vrot.slane %v3135_v0, 4 }
0x1070   :  { %v3155_v1 = vrot.slane %v3136_v62, 3  ;;  %v3157_v7 = vrot.slane %v3137_v25, 2  ;;  %v3159_v21 = vrot.slane %v3138_v50, 1 }
0x1071   :  { %v3148_v57 = vsel %vm109_vm1, %v3147_v15, %v3131_v43 }
0x1072   :  { %v3150_v56 = vsel %vm112_vm2, %v3149_v26, %v3148_v57 }
0x1073   :  { %v3152_v16 = vsel %vm115_vm3, %v3151_v6, %v3150_v56 }
0x1074   :  { %v3154_v3 = vsel %vm118_vm4, %v3153_v58, %v3152_v16 }
0x1075   :  { %v3156_v27 = vsel %vm121_vm5, %v3155_v1, %v3154_v3 }
0x1076   :  { %v3158_v12 = vsel %vm4983_vm12, %v3157_v7, %v3156_v27 }
0x1077   :  { %v3160_v17 = vsel %vm4984_vm13, %v3159_v21, %v3158_v12 }
0x1078   :  { %v3162_v46 = vsel %vm142_vm8, %v3160_v17, 0.0 }
0x1079   :  { %3163 = vadd.xlane.f32.xlu0 %v3162_v46 }
0x1102   :  { %v3164_v48 = vpop.xlane.xlu0 %3163 }
0x1103   :  { %v3165_v20 = vmul.f32 0.03125, %v3164_v48 }
0x1105   :  { %v3166_v63 = vadd.f32 1e-05, %v3165_v20 }
0x1107   :  { %3753 = vrsqrt.f32 %v3166_v63 }
0x1114   :  { %v3754_v54 = vpop.eup %3753 }
0x1115   :  { %v3169_v13 = vrot.slane %v3754_v54, 1  ;;  %v3170_v49 = vrot.slane %v3754_v54, 2  ;;  %v3171_v14 = vrot.slane %v3754_v54, 3  ;;  %v3172_v2 = vrot.slane %v3754_v54, 4 }
0x1116   :  { %v3173_v28 = vrot.slane %v3754_v54, 5  ;;  %v3174_v31 = vrot.slane %v3754_v54, 6  ;;  %v3175_v10 = vrot.slane %v3754_v54, 7  ;;  %v3184_v23 = vmul.f32 %v3754_v54, %v3123_v40 }
0x1117   :  { %v3185_v29 = vmul.f32 %v3169_v13, %v3124_v41  ;;  %v3186_v22 = vmul.f32 %v3170_v49, %v3125_v42  ;;  %v3187_v61 = vmul.f32 %v3171_v14, %v3126_v52  ;;  %v3188_v18 = vmul.f32 %v3172_v2, %v3127_v53 }
0x1118   :  { %v3189_v30 = vmul.f32 %v3173_v28, %v3128_v55  ;;  %v3190_v59 = vmul.f32 %v3174_v31, %v3129_v4  ;;  %v3191_v24 = vmul.f32 %v3175_v10, %v3130_v44  ;;  %v3192_v9 = vmul.f32 %v4810_v5, %v3184_v23 }
0x1119   :  { %v3193_v19 = vmul.f32 %v4810_v5, %v3185_v29  ;;  %v3194_v60 = vmul.f32 %v4810_v5, %v3186_v22  ;;  %v3195_v11 = vmul.f32 %v4810_v5, %v3187_v61  ;;  %v3196_v32 = vmul.f32 %v4810_v5, %v3188_v18 }
0x111a   :  { %v3197_v34 = vmul.f32 %v4810_v5, %v3189_v30  ;;  %v3198_v35 = vmul.f32 %v4810_v5, %v3190_v59  ;;  %v3199_v36 = vmul.f32 %v4810_v5, %v3191_v24  ;;  %v3200_v33 = vadd.f32 %v4825_v47, %v3192_v9 }
0x111b   :  { %v3201_v37 = vadd.f32 %v4825_v47, %v3193_v19  ;;  %v3202_v39 = vadd.f32 %v4825_v47, %v3194_v60  ;;  %v3203_v38 = vadd.f32 %v4825_v47, %v3195_v11  ;;  %v3204_v40 = vadd.f32 %v4825_v47, %v3196_v32 }
0x111c   :  { %v3205_v41 = vadd.f32 %v4825_v47, %v3197_v34  ;;  %v3206_v42 = vadd.f32 %v4825_v47, %v3198_v35  ;;  %v3207_v52 = vadd.f32 %v4825_v47, %v3199_v36  ;;  %3208 = vst.msk [vmem:[#allocation2 + $0x1] sm:$0x1] %vm1691_vm6, %v3200_v33 }
0x111d   :  { %3209 = vst.msk [vmem:[#allocation2 + $0x3] sm:$0x1] %vm1691_vm6, %v3201_v37  ;;  %3210 = vst.msk [vmem:[#allocation2 + $0x5] sm:$0x1] %vm1691_vm6, %v3202_v39 }
0x111e   :  { %3211 = vst.msk [vmem:[#allocation2 + $0x7] sm:$0x1] %vm1691_vm6, %v3203_v38  ;;  %3212 = vst.msk [vmem:[#allocation2 + $0x9] sm:$0x1] %vm1691_vm6, %v3204_v40 }
0x111f   :  { %3213 = vst.msk [vmem:[#allocation2 + $0xb] sm:$0x1] %vm1691_vm6, %v3205_v41  ;;  %3214 = vst.msk [vmem:[#allocation2 + $0xd] sm:$0x1] %vm1691_vm6, %v3206_v42 }
0x1120   :  { %3215 = vst.msk [vmem:[#allocation2 + $0xf] sm:$0x1] %vm1691_vm6, %v3207_v52 }
0x1121   :  { %3779 = shalt.err (!%p3776_p4)
}
0x1122   :  { %s3823_s1 = smov 32   ;;  %s3824_s27 = smov 2  }
0x1123   :  { %3227 = dma.vmem_to_hbm [thread:$0]  %s3222_s28, 256, %s4924_s13, [#allocation3], %s3823_s1, %s3823_s1, %s3824_s27  }
0x1124   :  { %3788 = dma.done.wait [#allocation3], 256  }
0x1125   :  { %3789 = vsyncadd [#allocation3], 4294967040 }
0x1126   :  { %3231 = vsyncpa [#allocation3], 1 }

</bundles_post_ra>
